<compile_context>
chip_gen: v7x
topology: tpu7x:2x2x1
jax: 0.10.0
libtpu: 0.0.40
codegen_flags: <defaults>
</compile_context>

<pallas_src>
import jax
import jax.numpy as jnp
from jax.experimental import pallas as pl
from jax.experimental.pallas import tpu as pltpu


# ---------------------------- fused kernel ----------------------------

def _basic_block_kernel(xp_ref, w1_ref, w2_ref, b1_ref, b2_ref, out_ref, ypad_ref):
    # xp_ref:   (Hp, Wpp, Cp) f32  spatially padded (halo 1, width aligned to 8),
    #                              channel-padded input
    # w1_ref:   (9, Cp, Cp)   cdt  conv1 weights, BN1 scale folded in, one slab per tap
    # w2_ref:   (9, Cp, Cp)   cdt  conv2 weights, BN2 scale folded in
    # b1_ref:   (1, Cp)       f32  BN1 shift
    # b2_ref:   (1, Cp)       f32  BN2 shift
    # out_ref:  (H, W, Cp)    f32  output block (lane-dense channels)
    # ypad_ref: (Hp, Wpp, Cp) cdt  VMEM scratch holding the padded intermediate
    Hp, Wpp, Cp = xp_ref.shape
    H, W = out_ref.shape[0], out_ref.shape[1]
    cdt = w1_ref.dtype                      # compute dtype (bf16 by default)

    def conv3x3(src_ref, w_ref, center_override=None):
        # shift-and-accumulate over the 9 taps: windowed loads -> MXU matmuls (K=Cp)
        acc = None
        for kh in range(3):
            for kw in range(3):
                if center_override is not None and kh == 1 and kw == 1:
                    lhs = center_override
                else:
                    lhs = src_ref[kh:kh + H, kw:kw + W, :].reshape(H * W, Cp).astype(cdt)
                p = jnp.dot(lhs, w_ref[kh * 3 + kw],
                            preferred_element_type=jnp.float32)
                acc = p if acc is None else acc + p
        return acc                          # (H*W, Cp) f32

    # f32 center window: reused as conv1's center tap and as the residual.
    x_center = xp_ref[1:1 + H, 1:1 + W, :].reshape(H * W, Cp)

    # ---- conv1 + bn1 + relu ----
    acc1 = conv3x3(xp_ref, w1_ref, center_override=x_center.astype(cdt))
    y = jnp.maximum(acc1 + b1_ref[...], 0.0)

    # Re-pad the intermediate in VMEM.  Only the 1-px frame conv2 actually reads is
    # zeroed (rows 0 / H+1 fully, cols 0 / W+1 of the interior rows); the interior is
    # fully overwritten each step, so no full-buffer clear and no cross-step state.
    ypad_ref[0:1, :, :] = jnp.zeros((1, Wpp, Cp), ypad_ref.dtype)
    ypad_ref[1 + H:2 + H, :, :] = jnp.zeros((1, Wpp, Cp), ypad_ref.dtype)
    ypad_ref[1:1 + H, 0:1, :] = jnp.zeros((H, 1, Cp), ypad_ref.dtype)
    ypad_ref[1:1 + H, 1 + W:2 + W, :] = jnp.zeros((H, 1, Cp), ypad_ref.dtype)
    ypad_ref[1:1 + H, 1:1 + W, :] = y.reshape(H, W, Cp).astype(ypad_ref.dtype)

    # ---- conv2 + bn2 + residual (f32) + relu ----
    acc2 = conv3x3(ypad_ref, w2_ref)
    out = jnp.maximum(acc2 + b2_ref[...] + x_center, 0.0)
    out_ref[...] = out.reshape(H, W, Cp).astype(out_ref.dtype)


# ---------------------------- wrapper ----------------------------

def _round_up(x, m):
    return (x + m - 1) // m * m


def _bn_affine(p, eps=1e-5):
    scale = p['gamma'] / jnp.sqrt(p['var'] + eps)
    shift = p['beta'] - p['mean'] * scale
    return scale, shift


def _prep_w(w_oihw, scale, c_pad, dtype):
    # OIHW (Cout, Cin, 3, 3) -> (3, 3, Cin, Cout), fold BN scale into out-channels,
    # zero-pad channels to c_pad, split taps -> (9, c_pad, c_pad), tap t = kh*3+kw.
    cout, cin = w_oihw.shape[0], w_oihw.shape[1]
    w = jnp.transpose(w_oihw, (2, 3, 1, 0)) * scale[None, None, None, :]
    w = jnp.pad(w, ((0, 0), (0, 0), (0, c_pad - cin), (0, c_pad - cout)))
    return w.reshape(9, c_pad, c_pad).astype(dtype)


def basic_block_forward(params, x_nchw, *, compute_dtype=jnp.bfloat16):
    x = jnp.transpose(x_nchw, (0, 2, 3, 1)).astype(jnp.float32)   # NHWC, f32
    N, H, W, C = x.shape
    planes = params['w1'].shape[0]
    assert planes == C, "identity shortcut requires inplanes == planes (stride=1, no downsample)"
    Cp = _round_up(C, 128)             # lane-dense channel dim
    Wpp = _round_up(W + 2, 8)          # sublane-aligned padded width
    Hp = H + 2

    s1, b1 = _bn_affine(params['bn1'])
    s2, b2 = _bn_affine(params['bn2'])
    w1 = _prep_w(params['w1'], s1, Cp, compute_dtype)
    w2 = _prep_w(params['w2'], s2, Cp, compute_dtype)
    b1p = jnp.pad(b1, (0, Cp - C)).reshape(1, Cp).astype(jnp.float32)
    b2p = jnp.pad(b2, (0, Cp - C)).reshape(1, Cp).astype(jnp.float32)

    # halo of 1 (top/left), halo + alignment on the bottom/right, channel pad; f32
    # (the compute-dtype cast happens per-tap inside the kernel, residual stays f32).
    xp = jnp.pad(x, ((0, 0), (1, 1), (1, Wpp - W - 1), (0, Cp - C)))

    # vmem budget derived from the actual tile shapes (+ headroom), capped by device.
    cd_bytes = jnp.dtype(compute_dtype).itemsize
    xp_blk = Hp * Wpp * Cp * 4
    out_blk = H * W * Cp * 4
    w_bytes = 2 * 9 * Cp * Cp * cd_bytes
    scratch = Hp * Wpp * Cp * cd_bytes
    tmp = 4 * H * W * Cp * 4
    needed = 2 * (xp_blk + out_blk + w_bytes) + scratch + tmp + (1 << 20)
    try:
        vmem_cap = pltpu.get_tpu_info().vmem_capacity_bytes
    except Exception:
        vmem_cap = 64 * 1024 * 1024
    vmem_limit = min(max(2 * needed, 32 * 1024 * 1024), int(0.9 * vmem_cap))

    out = pl.pallas_call(
        _basic_block_kernel,
        out_shape=jax.ShapeDtypeStruct((N, H, W, Cp), jnp.float32),
        grid_spec=pltpu.PrefetchScalarGridSpec(
            num_scalar_prefetch=0,
            grid=(N,),
            in_specs=[
                pl.BlockSpec((None, Hp, Wpp, Cp), lambda n: (n, 0, 0, 0)),
                pl.BlockSpec((9, Cp, Cp), lambda n: (0, 0, 0)),
                pl.BlockSpec((9, Cp, Cp), lambda n: (0, 0, 0)),
                pl.BlockSpec((1, Cp), lambda n: (0, 0)),
                pl.BlockSpec((1, Cp), lambda n: (0, 0)),
            ],
            out_specs=pl.BlockSpec((None, H, W, Cp), lambda n: (n, 0, 0, 0)),
            scratch_shapes=[pltpu.VMEM((Hp, Wpp, Cp), compute_dtype)],
        ),
        compiler_params=pltpu.CompilerParams(
            dimension_semantics=("parallel",),
            vmem_limit_bytes=vmem_limit,
        ),
    )(xp, w1, w2, b1p, b2p)

    out = out[..., :C]                                   # drop lane padding
    return jnp.transpose(out, (0, 3, 1, 2))              # back to NCHW


# ---------------- parameter init (deterministic, synthetic) ----------------

def init_basic_block_params(key, inplanes, planes):
    ks = jax.random.split(key, 10)
    def bn(kg, kb, km, kv, c):
        return dict(
            gamma=1.0 + 0.1 * jax.random.normal(kg, (c,), jnp.float32),
            beta=0.1 * jax.random.normal(kb, (c,), jnp.float32),
            mean=0.1 * jax.random.normal(km, (c,), jnp.float32),
            var=jax.random.uniform(kv, (c,), jnp.float32, 0.5, 1.5),
        )
    return dict(
        w1=0.1 * jax.random.normal(ks[0], (planes, inplanes, 3, 3), jnp.float32),
        w2=0.1 * jax.random.normal(ks[1], (planes, planes, 3, 3), jnp.float32),
        bn1=bn(ks[2], ks[3], ks[4], ks[5], planes),
        bn2=bn(ks[6], ks[7], ks[8], ks[9], planes),
    )


# ---------------- pure-JAX reference (for correctness check) ----------------

def _ref_forward(params, x_nchw):
    def conv(x, w):
        return jax.lax.conv_general_dilated(
            x, w, (1, 1), 'SAME', dimension_numbers=('NCHW', 'OIHW', 'NCHW'))
    def bn(x, p, eps=1e-5):
        scale = p['gamma'] / jnp.sqrt(p['var'] + eps)
        shift = p['beta'] - p['mean'] * scale
        return x * scale[None, :, None, None] + shift[None, :, None, None]
    out = jax.nn.relu(bn(conv(x_nchw, params['w1']), params['bn1']))
    out = bn(conv(out, params['w2']), params['bn2']) + x_nchw
    return jax.nn.relu(out)


if __name__ == "__main__":
    key = jax.random.PRNGKey(0)
    kx, kp = jax.random.split(key)

    N, C, H, W = 2, 8, 16, 16          # inplanes == planes (identity shortcut)
    x = jax.random.normal(kx, (N, C, H, W), jnp.float32)
    params = init_basic_block_params(kp, inplanes=C, planes=C)

    ref = jax.block_until_ready(_ref_forward(params, x))

    # exactness path: f32 conv operands, tight tolerance
    out_f32 = jax.block_until_ready(
        basic_block_forward(params, x, compute_dtype=jnp.float32))
    assert out_f32.shape == (N, C, H, W), out_f32.shape
    assert jnp.allclose(out_f32, ref, atol=1e-4, rtol=1e-4), \
        float(jnp.max(jnp.abs(out_f32 - ref)))

    # performance path (default): bf16 conv operands, f32 accumulation, f32 residual
    out_bf16 = jax.block_until_ready(basic_block_forward(params, x))
    assert out_bf16.shape == (N, C, H, W), out_bf16.shape
    assert jnp.allclose(out_bf16, ref, atol=5e-2, rtol=5e-2), \
        float(jnp.max(jnp.abs(out_bf16 - ref)))

    print("KERNEL_OK")
</pallas_src>

<mosaic_0001>
module attributes {stable_mosaic.version = 11 : i64} {
  func.func @_basic_block_kernel(%arg0: i32, %arg1: memref<1x18x24x128xf32, #tpu.memory_space<vmem>>, %arg2: memref<9x128x128xf32, #tpu.memory_space<vmem>>, %arg3: memref<9x128x128xf32, #tpu.memory_space<vmem>>, %arg4: memref<1x128xf32, #tpu.memory_space<vmem>>, %arg5: memref<1x128xf32, #tpu.memory_space<vmem>>, %arg6: memref<1x16x16x128xf32, #tpu.memory_space<vmem>>, %arg7: memref<18x24x128xf32, #tpu.memory_space<vmem>>) attributes {dimension_semantics = [#tpu.dimension_semantics<parallel>], iteration_bounds = array<i64: 2>, scalar_prefetch = 0 : i64, scratch_operands = 1 : i64, tpu.core_type = #tpu.core_type<tc>, window_params = [{transform_indices = @transform_0, window_bounds = array<i64: 1, 18, 24, 128>}, {pipeline_mode = #tpu.pipeline_mode<synchronous>, transform_indices = @transform_1, window_bounds = array<i64: 9, 128, 128>}, {pipeline_mode = #tpu.pipeline_mode<synchronous>, transform_indices = @transform_2, window_bounds = array<i64: 9, 128, 128>}, {pipeline_mode = #tpu.pipeline_mode<synchronous>, transform_indices = @transform_3, window_bounds = array<i64: 1, 128>}, {pipeline_mode = #tpu.pipeline_mode<synchronous>, transform_indices = @transform_4, window_bounds = array<i64: 1, 128>}, {transform_indices = @transform_5, window_bounds = array<i64: 1, 16, 16, 128>}]} {
    %c0 = arith.constant 0 : index
    %c1 = arith.constant 1 : index
    %c1_0 = arith.constant 1 : index
    %c0_1 = arith.constant 0 : index
    %0 = vector.load %arg1[%c0, %c1, %c1_0, %c0_1] : memref<1x18x24x128xf32, #tpu.memory_space<vmem>>, vector<1x16x16x128xf32>
    %1 = vector.shape_cast %0 : vector<1x16x16x128xf32> to vector<16x16x128xf32>
    %2 = vector.shape_cast %1 : vector<16x16x128xf32> to vector<256x128xf32>
    %c0_2 = arith.constant 0 : index
    %c0_3 = arith.constant 0 : index
    %c0_4 = arith.constant 0 : index
    %c0_5 = arith.constant 0 : index
    %3 = vector.load %arg1[%c0_2, %c0_3, %c0_4, %c0_5] : memref<1x18x24x128xf32, #tpu.memory_space<vmem>>, vector<1x16x16x128xf32>
    %4 = vector.shape_cast %3 : vector<1x16x16x128xf32> to vector<16x16x128xf32>
    %5 = vector.shape_cast %4 : vector<16x16x128xf32> to vector<256x128xf32>
    %c0_6 = arith.constant 0 : index
    %c0_7 = arith.constant 0 : index
    %c0_8 = arith.constant 0 : index
    %6 = vector.load %arg2[%c0_6, %c0_7, %c0_8] : memref<9x128x128xf32, #tpu.memory_space<vmem>>, vector<1x128x128xf32>
    %7 = vector.shape_cast %6 : vector<1x128x128xf32> to vector<128x128xf32>
    %cst = arith.constant dense<0.000000e+00> : vector<256x128xf32>
    %8 = tpu.matmul %5, %7, %cst {dimension_numbers = #tpu.dot_dimension_numbers<[1], [0], [0], [1], [0, 0, 1, 1], [], []>} : vector<256x128xf32>, vector<128x128xf32>, vector<256x128xf32> -> vector<256x128xf32>
    %c0_9 = arith.constant 0 : index
    %c0_10 = arith.constant 0 : index
    %c1_11 = arith.constant 1 : index
    %c0_12 = arith.constant 0 : index
    %9 = vector.load %arg1[%c0_9, %c0_10, %c1_11, %c0_12] : memref<1x18x24x128xf32, #tpu.memory_space<vmem>>, vector<1x16x16x128xf32>
    %10 = vector.shape_cast %9 : vector<1x16x16x128xf32> to vector<16x16x128xf32>
    %11 = vector.shape_cast %10 : vector<16x16x128xf32> to vector<256x128xf32>
    %c1_13 = arith.constant 1 : index
    %c0_14 = arith.constant 0 : index
    %c0_15 = arith.constant 0 : index
    %12 = vector.load %arg2[%c1_13, %c0_14, %c0_15] : memref<9x128x128xf32, #tpu.memory_space<vmem>>, vector<1x128x128xf32>
    %13 = vector.shape_cast %12 : vector<1x128x128xf32> to vector<128x128xf32>
    %cst_16 = arith.constant dense<0.000000e+00> : vector<256x128xf32>
    %14 = tpu.matmul %11, %13, %cst_16 {dimension_numbers = #tpu.dot_dimension_numbers<[1], [0], [0], [1], [0, 0, 1, 1], [], []>} : vector<256x128xf32>, vector<128x128xf32>, vector<256x128xf32> -> vector<256x128xf32>
    %15 = arith.addf %8, %14 : vector<256x128xf32>
    %c0_17 = arith.constant 0 : index
    %c0_18 = arith.constant 0 : index
    %c2 = arith.constant 2 : index
    %c0_19 = arith.constant 0 : index
    %16 = vector.load %arg1[%c0_17, %c0_18, %c2, %c0_19] : memref<1x18x24x128xf32, #tpu.memory_space<vmem>>, vector<1x16x16x128xf32>
    %17 = vector.shape_cast %16 : vector<1x16x16x128xf32> to vector<16x16x128xf32>
    %18 = vector.shape_cast %17 : vector<16x16x128xf32> to vector<256x128xf32>
    %c2_20 = arith.constant 2 : index
    %c0_21 = arith.constant 0 : index
    %c0_22 = arith.constant 0 : index
    %19 = vector.load %arg2[%c2_20, %c0_21, %c0_22] : memref<9x128x128xf32, #tpu.memory_space<vmem>>, vector<1x128x128xf32>
    %20 = vector.shape_cast %19 : vector<1x128x128xf32> to vector<128x128xf32>
    %cst_23 = arith.constant dense<0.000000e+00> : vector<256x128xf32>
    %21 = tpu.matmul %18, %20, %cst_23 {dimension_numbers = #tpu.dot_dimension_numbers<[1], [0], [0], [1], [0, 0, 1, 1], [], []>} : vector<256x128xf32>, vector<128x128xf32>, vector<256x128xf32> -> vector<256x128xf32>
    %22 = arith.addf %15, %21 : vector<256x128xf32>
    %c0_24 = arith.constant 0 : index
    %c1_25 = arith.constant 1 : index
    %c0_26 = arith.constant 0 : index
    %c0_27 = arith.constant 0 : index
    %23 = vector.load %arg1[%c0_24, %c1_25, %c0_26, %c0_27] : memref<1x18x24x128xf32, #tpu.memory_space<vmem>>, vector<1x16x16x128xf32>
    %24 = vector.shape_cast %23 : vector<1x16x16x128xf32> to vector<16x16x128xf32>
    %25 = vector.shape_cast %24 : vector<16x16x128xf32> to vector<256x128xf32>
    %c3 = arith.constant 3 : index
    %c0_28 = arith.constant 0 : index
    %c0_29 = arith.constant 0 : index
    %26 = vector.load %arg2[%c3, %c0_28, %c0_29] : memref<9x128x128xf32, #tpu.memory_space<vmem>>, vector<1x128x128xf32>
    %27 = vector.shape_cast %26 : vector<1x128x128xf32> to vector<128x128xf32>
    %cst_30 = arith.constant dense<0.000000e+00> : vector<256x128xf32>
    %28 = tpu.matmul %25, %27, %cst_30 {dimension_numbers = #tpu.dot_dimension_numbers<[1], [0], [0], [1], [0, 0, 1, 1], [], []>} : vector<256x128xf32>, vector<128x128xf32>, vector<256x128xf32> -> vector<256x128xf32>
    %29 = arith.addf %22, %28 : vector<256x128xf32>
    %c4 = arith.constant 4 : index
    %c0_31 = arith.constant 0 : index
    %c0_32 = arith.constant 0 : index
    %30 = vector.load %arg2[%c4, %c0_31, %c0_32] : memref<9x128x128xf32, #tpu.memory_space<vmem>>, vector<1x128x128xf32>
    %31 = vector.shape_cast %30 : vector<1x128x128xf32> to vector<128x128xf32>
    %cst_33 = arith.constant dense<0.000000e+00> : vector<256x128xf32>
    %32 = tpu.matmul %2, %31, %cst_33 {dimension_numbers = #tpu.dot_dimension_numbers<[1], [0], [0], [1], [0, 0, 1, 1], [], []>} : vector<256x128xf32>, vector<128x128xf32>, vector<256x128xf32> -> vector<256x128xf32>
    %33 = arith.addf %29, %32 : vector<256x128xf32>
    %c0_34 = arith.constant 0 : index
    %c1_35 = arith.constant 1 : index
    %c2_36 = arith.constant 2 : index
    %c0_37 = arith.constant 0 : index
    %34 = vector.load %arg1[%c0_34, %c1_35, %c2_36, %c0_37] : memref<1x18x24x128xf32, #tpu.memory_space<vmem>>, vector<1x16x16x128xf32>
    %35 = vector.shape_cast %34 : vector<1x16x16x128xf32> to vector<16x16x128xf32>
    %36 = vector.shape_cast %35 : vector<16x16x128xf32> to vector<256x128xf32>
    %c5 = arith.constant 5 : index
    %c0_38 = arith.constant 0 : index
    %c0_39 = arith.constant 0 : index
    %37 = vector.load %arg2[%c5, %c0_38, %c0_39] : memref<9x128x128xf32, #tpu.memory_space<vmem>>, vector<1x128x128xf32>
    %38 = vector.shape_cast %37 : vector<1x128x128xf32> to vector<128x128xf32>
    %cst_40 = arith.constant dense<0.000000e+00> : vector<256x128xf32>
    %39 = tpu.matmul %36, %38, %cst_40 {dimension_numbers = #tpu.dot_dimension_numbers<[1], [0], [0], [1], [0, 0, 1, 1], [], []>} : vector<256x128xf32>, vector<128x128xf32>, vector<256x128xf32> -> vector<256x128xf32>
    %40 = arith.addf %33, %39 : vector<256x128xf32>
    %c0_41 = arith.constant 0 : index
    %c2_42 = arith.constant 2 : index
    %c0_43 = arith.constant 0 : index
    %c0_44 = arith.constant 0 : index
    %41 = vector.load %arg1[%c0_41, %c2_42, %c0_43, %c0_44] : memref<1x18x24x128xf32, #tpu.memory_space<vmem>>, vector<1x16x16x128xf32>
    %42 = vector.shape_cast %41 : vector<1x16x16x128xf32> to vector<16x16x128xf32>
    %43 = vector.shape_cast %42 : vector<16x16x128xf32> to vector<256x128xf32>
    %c6 = arith.constant 6 : index
    %c0_45 = arith.constant 0 : index
    %c0_46 = arith.constant 0 : index
    %44 = vector.load %arg2[%c6, %c0_45, %c0_46] : memref<9x128x128xf32, #tpu.memory_space<vmem>>, vector<1x128x128xf32>
    %45 = vector.shape_cast %44 : vector<1x128x128xf32> to vector<128x128xf32>
    %cst_47 = arith.constant dense<0.000000e+00> : vector<256x128xf32>
    %46 = tpu.matmul %43, %45, %cst_47 {dimension_numbers = #tpu.dot_dimension_numbers<[1], [0], [0], [1], [0, 0, 1, 1], [], []>} : vector<256x128xf32>, vector<128x128xf32>, vector<256x128xf32> -> vector<256x128xf32>
    %47 = arith.addf %40, %46 : vector<256x128xf32>
    %c0_48 = arith.constant 0 : index
    %c2_49 = arith.constant 2 : index
    %c1_50 = arith.constant 1 : index
    %c0_51 = arith.constant 0 : index
    %48 = vector.load %arg1[%c0_48, %c2_49, %c1_50, %c0_51] : memref<1x18x24x128xf32, #tpu.memory_space<vmem>>, vector<1x16x16x128xf32>
    %49 = vector.shape_cast %48 : vector<1x16x16x128xf32> to vector<16x16x128xf32>
    %50 = vector.shape_cast %49 : vector<16x16x128xf32> to vector<256x128xf32>
    %c7 = arith.constant 7 : index
    %c0_52 = arith.constant 0 : index
    %c0_53 = arith.constant 0 : index
    %51 = vector.load %arg2[%c7, %c0_52, %c0_53] : memref<9x128x128xf32, #tpu.memory_space<vmem>>, vector<1x128x128xf32>
    %52 = vector.shape_cast %51 : vector<1x128x128xf32> to vector<128x128xf32>
    %cst_54 = arith.constant dense<0.000000e+00> : vector<256x128xf32>
    %53 = tpu.matmul %50, %52, %cst_54 {dimension_numbers = #tpu.dot_dimension_numbers<[1], [0], [0], [1], [0, 0, 1, 1], [], []>} : vector<256x128xf32>, vector<128x128xf32>, vector<256x128xf32> -> vector<256x128xf32>
    %54 = arith.addf %47, %53 : vector<256x128xf32>
    %c0_55 = arith.constant 0 : index
    %c2_56 = arith.constant 2 : index
    %c2_57 = arith.constant 2 : index
    %c0_58 = arith.constant 0 : index
    %55 = vector.load %arg1[%c0_55, %c2_56, %c2_57, %c0_58] : memref<1x18x24x128xf32, #tpu.memory_space<vmem>>, vector<1x16x16x128xf32>
    %56 = vector.shape_cast %55 : vector<1x16x16x128xf32> to vector<16x16x128xf32>
    %57 = vector.shape_cast %56 : vector<16x16x128xf32> to vector<256x128xf32>
    %c8 = arith.constant 8 : index
    %c0_59 = arith.constant 0 : index
    %c0_60 = arith.constant 0 : index
    %58 = vector.load %arg2[%c8, %c0_59, %c0_60] : memref<9x128x128xf32, #tpu.memory_space<vmem>>, vector<1x128x128xf32>
    %59 = vector.shape_cast %58 : vector<1x128x128xf32> to vector<128x128xf32>
    %cst_61 = arith.constant dense<0.000000e+00> : vector<256x128xf32>
    %60 = tpu.matmul %57, %59, %cst_61 {dimension_numbers = #tpu.dot_dimension_numbers<[1], [0], [0], [1], [0, 0, 1, 1], [], []>} : vector<256x128xf32>, vector<128x128xf32>, vector<256x128xf32> -> vector<256x128xf32>
    %61 = arith.addf %54, %60 : vector<256x128xf32>
    %c0_62 = arith.constant 0 : index
    %c0_63 = arith.constant 0 : index
    %62 = vector.load %arg4[%c0_62, %c0_63] : memref<1x128xf32, #tpu.memory_space<vmem>>, vector<1x128xf32>
    %63 = vector.broadcast %62 : vector<1x128xf32> to vector<256x128xf32>
    %64 = arith.addf %61, %63 : vector<256x128xf32>
    %cst_64 = arith.constant 0.000000e+00 : f32
    %65 = vector.broadcast %cst_64 : f32 to vector<256x128xf32>
    %66 = arith.maximumf %64, %65 : vector<256x128xf32>
    %cst_65 = arith.constant 0.000000e+00 : f32
    %67 = vector.broadcast %cst_65 : f32 to vector<1x24x128xf32>
    %c0_66 = arith.constant 0 : index
    %c0_67 = arith.constant 0 : index
    %c0_68 = arith.constant 0 : index
    %68 = vector.load %arg7[%c0_66, %c0_67, %c0_68] : memref<18x24x128xf32, #tpu.memory_space<vmem>>, vector<1x24x128xf32>
    tpu.vector_store %arg7[%c0_66, %c0_67, %c0_68], %67 {strides = array<i32>} : memref<18x24x128xf32, #tpu.memory_space<vmem>>, vector<1x24x128xf32>,
    %cst_69 = arith.constant 0.000000e+00 : f32
    %69 = vector.broadcast %cst_69 : f32 to vector<1x24x128xf32>
    %c17 = arith.constant 17 : index
    %c0_70 = arith.constant 0 : index
    %c0_71 = arith.constant 0 : index
    %70 = vector.load %arg7[%c17, %c0_70, %c0_71] : memref<18x24x128xf32, #tpu.memory_space<vmem>>, vector<1x24x128xf32>
    tpu.vector_store %arg7[%c17, %c0_70, %c0_71], %69 {strides = array<i32>} : memref<18x24x128xf32, #tpu.memory_space<vmem>>, vector<1x24x128xf32>,
    %cst_72 = arith.constant 0.000000e+00 : f32
    %71 = vector.broadcast %cst_72 : f32 to vector<16x1x128xf32>
    %c1_73 = arith.constant 1 : index
    %c0_74 = arith.constant 0 : index
    %c0_75 = arith.constant 0 : index
    %72 = vector.load %arg7[%c1_73, %c0_74, %c0_75] : memref<18x24x128xf32, #tpu.memory_space<vmem>>, vector<16x1x128xf32>
    tpu.vector_store %arg7[%c1_73, %c0_74, %c0_75], %71 {strides = array<i32>} : memref<18x24x128xf32, #tpu.memory_space<vmem>>, vector<16x1x128xf32>,
    %cst_76 = arith.constant 0.000000e+00 : f32
    %73 = vector.broadcast %cst_76 : f32 to vector<16x1x128xf32>
    %c1_77 = arith.constant 1 : index
    %c17_78 = arith.constant 17 : index
    %c0_79 = arith.constant 0 : index
    %74 = vector.load %arg7[%c1_77, %c17_78, %c0_79] : memref<18x24x128xf32, #tpu.memory_space<vmem>>, vector<16x1x128xf32>
    tpu.vector_store %arg7[%c1_77, %c17_78, %c0_79], %73 {strides = array<i32>} : memref<18x24x128xf32, #tpu.memory_space<vmem>>, vector<16x1x128xf32>,
    %75 = vector.shape_cast %66 : vector<256x128xf32> to vector<16x16x128xf32>
    %c1_80 = arith.constant 1 : index
    %c1_81 = arith.constant 1 : index
    %c0_82 = arith.constant 0 : index
    %76 = vector.load %arg7[%c1_80, %c1_81, %c0_82] : memref<18x24x128xf32, #tpu.memory_space<vmem>>, vector<16x16x128xf32>
    tpu.vector_store %arg7[%c1_80, %c1_81, %c0_82], %75 {strides = array<i32>} : memref<18x24x128xf32, #tpu.memory_space<vmem>>, vector<16x16x128xf32>,
    %c0_83 = arith.constant 0 : index
    %c0_84 = arith.constant 0 : index
    %c0_85 = arith.constant 0 : index
    %77 = vector.load %arg7[%c0_83, %c0_84, %c0_85] : memref<18x24x128xf32, #tpu.memory_space<vmem>>, vector<16x16x128xf32>
    %78 = vector.shape_cast %77 : vector<16x16x128xf32> to vector<256x128xf32>
    %c0_86 = arith.constant 0 : index
    %c0_87 = arith.constant 0 : index
    %c0_88 = arith.constant 0 : index
    %79 = vector.load %arg3[%c0_86, %c0_87, %c0_88] : memref<9x128x128xf32, #tpu.memory_space<vmem>>, vector<1x128x128xf32>
    %80 = vector.shape_cast %79 : vector<1x128x128xf32> to vector<128x128xf32>
    %cst_89 = arith.constant dense<0.000000e+00> : vector<256x128xf32>
    %81 = tpu.matmul %78, %80, %cst_89 {dimension_numbers = #tpu.dot_dimension_numbers<[1], [0], [0], [1], [0, 0, 1, 1], [], []>} : vector<256x128xf32>, vector<128x128xf32>, vector<256x128xf32> -> vector<256x128xf32>
    %c0_90 = arith.constant 0 : index
    %c1_91 = arith.constant 1 : index
    %c0_92 = arith.constant 0 : index
    %82 = vector.load %arg7[%c0_90, %c1_91, %c0_92] : memref<18x24x128xf32, #tpu.memory_space<vmem>>, vector<16x16x128xf32>
    %83 = vector.shape_cast %82 : vector<16x16x128xf32> to vector<256x128xf32>
    %c1_93 = arith.constant 1 : index
    %c0_94 = arith.constant 0 : index
    %c0_95 = arith.constant 0 : index
    %84 = vector.load %arg3[%c1_93, %c0_94, %c0_95] : memref<9x128x128xf32, #tpu.memory_space<vmem>>, vector<1x128x128xf32>
    %85 = vector.shape_cast %84 : vector<1x128x128xf32> to vector<128x128xf32>
    %cst_96 = arith.constant dense<0.000000e+00> : vector<256x128xf32>
    %86 = tpu.matmul %83, %85, %cst_96 {dimension_numbers = #tpu.dot_dimension_numbers<[1], [0], [0], [1], [0, 0, 1, 1], [], []>} : vector<256x128xf32>, vector<128x128xf32>, vector<256x128xf32> -> vector<256x128xf32>
    %87 = arith.addf %81, %86 : vector<256x128xf32>
    %c0_97 = arith.constant 0 : index
    %c2_98 = arith.constant 2 : index
    %c0_99 = arith.constant 0 : index
    %88 = vector.load %arg7[%c0_97, %c2_98, %c0_99] : memref<18x24x128xf32, #tpu.memory_space<vmem>>, vector<16x16x128xf32>
    %89 = vector.shape_cast %88 : vector<16x16x128xf32> to vector<256x128xf32>
    %c2_100 = arith.constant 2 : index
    %c0_101 = arith.constant 0 : index
    %c0_102 = arith.constant 0 : index
    %90 = vector.load %arg3[%c2_100, %c0_101, %c0_102] : memref<9x128x128xf32, #tpu.memory_space<vmem>>, vector<1x128x128xf32>
    %91 = vector.shape_cast %90 : vector<1x128x128xf32> to vector<128x128xf32>
    %cst_103 = arith.constant dense<0.000000e+00> : vector<256x128xf32>
    %92 = tpu.matmul %89, %91, %cst_103 {dimension_numbers = #tpu.dot_dimension_numbers<[1], [0], [0], [1], [0, 0, 1, 1], [], []>} : vector<256x128xf32>, vector<128x128xf32>, vector<256x128xf32> -> vector<256x128xf32>
    %93 = arith.addf %87, %92 : vector<256x128xf32>
    %c1_104 = arith.constant 1 : index
    %c0_105 = arith.constant 0 : index
    %c0_106 = arith.constant 0 : index
    %94 = vector.load %arg7[%c1_104, %c0_105, %c0_106] : memref<18x24x128xf32, #tpu.memory_space<vmem>>, vector<16x16x128xf32>
    %95 = vector.shape_cast %94 : vector<16x16x128xf32> to vector<256x128xf32>
    %c3_107 = arith.constant 3 : index
    %c0_108 = arith.constant 0 : index
    %c0_109 = arith.constant 0 : index
    %96 = vector.load %arg3[%c3_107, %c0_108, %c0_109] : memref<9x128x128xf32, #tpu.memory_space<vmem>>, vector<1x128x128xf32>
    %97 = vector.shape_cast %96 : vector<1x128x128xf32> to vector<128x128xf32>
    %cst_110 = arith.constant dense<0.000000e+00> : vector<256x128xf32>
    %98 = tpu.matmul %95, %97, %cst_110 {dimension_numbers = #tpu.dot_dimension_numbers<[1], [0], [0], [1], [0, 0, 1, 1], [], []>} : vector<256x128xf32>, vector<128x128xf32>, vector<256x128xf32> -> vector<256x128xf32>
    %99 = arith.addf %93, %98 : vector<256x128xf32>
    %c1_111 = arith.constant 1 : index
    %c1_112 = arith.constant 1 : index
    %c0_113 = arith.constant 0 : index
    %100 = vector.load %arg7[%c1_111, %c1_112, %c0_113] : memref<18x24x128xf32, #tpu.memory_space<vmem>>, vector<16x16x128xf32>
    %101 = vector.shape_cast %100 : vector<16x16x128xf32> to vector<256x128xf32>
    %c4_114 = arith.constant 4 : index
    %c0_115 = arith.constant 0 : index
    %c0_116 = arith.constant 0 : index
    %102 = vector.load %arg3[%c4_114, %c0_115, %c0_116] : memref<9x128x128xf32, #tpu.memory_space<vmem>>, vector<1x128x128xf32>
    %103 = vector.shape_cast %102 : vector<1x128x128xf32> to vector<128x128xf32>
    %cst_117 = arith.constant dense<0.000000e+00> : vector<256x128xf32>
    %104 = tpu.matmul %101, %103, %cst_117 {dimension_numbers = #tpu.dot_dimension_numbers<[1], [0], [0], [1], [0, 0, 1, 1], [], []>} : vector<256x128xf32>, vector<128x128xf32>, vector<256x128xf32> -> vector<256x128xf32>
    %105 = arith.addf %99, %104 : vector<256x128xf32>
    %c1_118 = arith.constant 1 : index
    %c2_119 = arith.constant 2 : index
    %c0_120 = arith.constant 0 : index
    %106 = vector.load %arg7[%c1_118, %c2_119, %c0_120] : memref<18x24x128xf32, #tpu.memory_space<vmem>>, vector<16x16x128xf32>
    %107 = vector.shape_cast %106 : vector<16x16x128xf32> to vector<256x128xf32>
    %c5_121 = arith.constant 5 : index
    %c0_122 = arith.constant 0 : index
    %c0_123 = arith.constant 0 : index
    %108 = vector.load %arg3[%c5_121, %c0_122, %c0_123] : memref<9x128x128xf32, #tpu.memory_space<vmem>>, vector<1x128x128xf32>
    %109 = vector.shape_cast %108 : vector<1x128x128xf32> to vector<128x128xf32>
    %cst_124 = arith.constant dense<0.000000e+00> : vector<256x128xf32>
    %110 = tpu.matmul %107, %109, %cst_124 {dimension_numbers = #tpu.dot_dimension_numbers<[1], [0], [0], [1], [0, 0, 1, 1], [], []>} : vector<256x128xf32>, vector<128x128xf32>, vector<256x128xf32> -> vector<256x128xf32>
    %111 = arith.addf %105, %110 : vector<256x128xf32>
    %c2_125 = arith.constant 2 : index
    %c0_126 = arith.constant 0 : index
    %c0_127 = arith.constant 0 : index
    %112 = vector.load %arg7[%c2_125, %c0_126, %c0_127] : memref<18x24x128xf32, #tpu.memory_space<vmem>>, vector<16x16x128xf32>
    %113 = vector.shape_cast %112 : vector<16x16x128xf32> to vector<256x128xf32>
    %c6_128 = arith.constant 6 : index
    %c0_129 = arith.constant 0 : index
    %c0_130 = arith.constant 0 : index
    %114 = vector.load %arg3[%c6_128, %c0_129, %c0_130] : memref<9x128x128xf32, #tpu.memory_space<vmem>>, vector<1x128x128xf32>
    %115 = vector.shape_cast %114 : vector<1x128x128xf32> to vector<128x128xf32>
    %cst_131 = arith.constant dense<0.000000e+00> : vector<256x128xf32>
    %116 = tpu.matmul %113, %115, %cst_131 {dimension_numbers = #tpu.dot_dimension_numbers<[1], [0], [0], [1], [0, 0, 1, 1], [], []>} : vector<256x128xf32>, vector<128x128xf32>, vector<256x128xf32> -> vector<256x128xf32>
    %117 = arith.addf %111, %116 : vector<256x128xf32>
    %c2_132 = arith.constant 2 : index
    %c1_133 = arith.constant 1 : index
    %c0_134 = arith.constant 0 : index
    %118 = vector.load %arg7[%c2_132, %c1_133, %c0_134] : memref<18x24x128xf32, #tpu.memory_space<vmem>>, vector<16x16x128xf32>
    %119 = vector.shape_cast %118 : vector<16x16x128xf32> to vector<256x128xf32>
    %c7_135 = arith.constant 7 : index
    %c0_136 = arith.constant 0 : index
    %c0_137 = arith.constant 0 : index
    %120 = vector.load %arg3[%c7_135, %c0_136, %c0_137] : memref<9x128x128xf32, #tpu.memory_space<vmem>>, vector<1x128x128xf32>
    %121 = vector.shape_cast %120 : vector<1x128x128xf32> to vector<128x128xf32>
    %cst_138 = arith.constant dense<0.000000e+00> : vector<256x128xf32>
    %122 = tpu.matmul %119, %121, %cst_138 {dimension_numbers = #tpu.dot_dimension_numbers<[1], [0], [0], [1], [0, 0, 1, 1], [], []>} : vector<256x128xf32>, vector<128x128xf32>, vector<256x128xf32> -> vector<256x128xf32>
    %123 = arith.addf %117, %122 : vector<256x128xf32>
    %c2_139 = arith.constant 2 : index
    %c2_140 = arith.constant 2 : index
    %c0_141 = arith.constant 0 : index
    %124 = vector.load %arg7[%c2_139, %c2_140, %c0_141] : memref<18x24x128xf32, #tpu.memory_space<vmem>>, vector<16x16x128xf32>
    %125 = vector.shape_cast %124 : vector<16x16x128xf32> to vector<256x128xf32>
    %c8_142 = arith.constant 8 : index
    %c0_143 = arith.constant 0 : index
    %c0_144 = arith.constant 0 : index
    %126 = vector.load %arg3[%c8_142, %c0_143, %c0_144] : memref<9x128x128xf32, #tpu.memory_space<vmem>>, vector<1x128x128xf32>
    %127 = vector.shape_cast %126 : vector<1x128x128xf32> to vector<128x128xf32>
    %cst_145 = arith.constant dense<0.000000e+00> : vector<256x128xf32>
    %128 = tpu.matmul %125, %127, %cst_145 {dimension_numbers = #tpu.dot_dimension_numbers<[1], [0], [0], [1], [0, 0, 1, 1], [], []>} : vector<256x128xf32>, vector<128x128xf32>, vector<256x128xf32> -> vector<256x128xf32>
    %129 = arith.addf %123, %128 : vector<256x128xf32>
    %c0_146 = arith.constant 0 : index
    %c0_147 = arith.constant 0 : index
    %130 = vector.load %arg5[%c0_146, %c0_147] : memref<1x128xf32, #tpu.memory_space<vmem>>, vector<1x128xf32>
    %131 = vector.broadcast %130 : vector<1x128xf32> to vector<256x128xf32>
    %132 = arith.addf %129, %131 : vector<256x128xf32>
    %133 = arith.addf %132, %2 : vector<256x128xf32>
    %cst_148 = arith.constant 0.000000e+00 : f32
    %134 = vector.broadcast %cst_148 : f32 to vector<256x128xf32>
    %135 = arith.maximumf %133, %134 : vector<256x128xf32>
    %136 = vector.shape_cast %135 : vector<256x128xf32> to vector<16x16x128xf32>
    %c0_149 = arith.constant 0 : index
    %c0_150 = arith.constant 0 : index
    %c0_151 = arith.constant 0 : index
    %c0_152 = arith.constant 0 : index
    %137 = vector.load %arg6[%c0_149, %c0_150, %c0_151, %c0_152] : memref<1x16x16x128xf32, #tpu.memory_space<vmem>>, vector<1x16x16x128xf32>
    %138 = vector.shape_cast %137 : vector<1x16x16x128xf32> to vector<16x16x128xf32>
    %139 = vector.shape_cast %136 : vector<16x16x128xf32> to vector<1x16x16x128xf32>
    tpu.vector_store %arg6[%c0_149, %c0_150, %c0_151, %c0_152], %139 {strides = array<i32>} : memref<1x16x16x128xf32, #tpu.memory_space<vmem>>, vector<1x16x16x128xf32>,
    return
  }
  func.func @transform_0(%arg0: i32) -> (i32, i32, i32, i32) {
    %c0_i32 = arith.constant 0 : i32
    %c0_i32_0 = arith.constant 0 : i32
    %c0_i32_1 = arith.constant 0 : i32
    %c0_i32_2 = arith.constant 0 : i32
    return %arg0, %c0_i32, %c0_i32_0, %c0_i32_1 : i32, i32, i32, i32
  }
  func.func @transform_1(%arg0: i32) -> (i32, i32, i32) {
    %c0_i32 = arith.constant 0 : i32
    %c0_i32_0 = arith.constant 0 : i32
    %c0_i32_1 = arith.constant 0 : i32
    %c0_i32_2 = arith.constant 0 : i32
    return %c0_i32, %c0_i32_0, %c0_i32_1 : i32, i32, i32
  }
  func.func @transform_2(%arg0: i32) -> (i32, i32, i32) {
    %c0_i32 = arith.constant 0 : i32
    %c0_i32_0 = arith.constant 0 : i32
    %c0_i32_1 = arith.constant 0 : i32
    %c0_i32_2 = arith.constant 0 : i32
    return %c0_i32, %c0_i32_0, %c0_i32_1 : i32, i32, i32
  }
  func.func @transform_3(%arg0: i32) -> (i32, i32) {
    %c0_i32 = arith.constant 0 : i32
    %c0_i32_0 = arith.constant 0 : i32
    %c0_i32_1 = arith.constant 0 : i32
    return %c0_i32, %c0_i32_0 : i32, i32
  }
  func.func @transform_4(%arg0: i32) -> (i32, i32) {
    %c0_i32 = arith.constant 0 : i32
    %c0_i32_0 = arith.constant 0 : i32
    %c0_i32_1 = arith.constant 0 : i32
    return %c0_i32, %c0_i32_0 : i32, i32
  }
  func.func @transform_5(%arg0: i32) -> (i32, i32, i32, i32) {
    %c0_i32 = arith.constant 0 : i32
    %c0_i32_0 = arith.constant 0 : i32
    %c0_i32_1 = arith.constant 0 : i32
    %c0_i32_2 = arith.constant 0 : i32
    return %arg0, %c0_i32, %c0_i32_0, %c0_i32_1 : i32, i32, i32, i32
  }
}

</mosaic_0001>

<bundles_post_ra>
// kernel: tpu_custom_call.1
= control target key start
LH: loop header
LB: loop body
LE: loop exit
PB: predicated region body
PF: predicated region fallthrough
CT: control target
= control target key end

     0   :  { %10 = vsyncpa [#allocation4], 0  ;;  %s11380_s0 = inlined_call_operand.hbm [shape: f32[2,18,24,128], index: 0, kind: input, shape index: {}]   ;;  %s11381_s1 = inlined_call_operand.hbm [shape: f32[9,128,128], index: 1, kind: input, shape index: {}]   ;;  %s11382_s2 = inlined_call_operand.hbm [shape: f32[9,128,128], index: 2, kind: input, shape index: {}]   ;;  %s11383_s3 = inlined_call_operand.vmem [shape: f32[1,128], index: 3, kind: input, shape index: {}]   ;;  %s11384_s4 = inlined_call_operand.vmem [shape: f32[1,128], index: 4, kind: input, shape index: {}]   ;;  %s11385_s5 = inlined_call_operand.hbm [shape: f32[2,16,16,128], index: 5, kind: output, shape index: {}]  }
   0x1   :  { %12 = vsyncpa [#allocation4 + $0x1], 0 }
   0x2   :  { %13 = vsyncpa [#allocation7], 0 }
   0x3   :  { %14 = vsyncpa [#allocation5], 0 }
   0x4   :  { %16 = vsyncpa [#allocation5 + $0x1], 0  ;;  %s9944_s18 = smov 0   ;;  %s9946_s19 = smov 0  }
   0x5   :  { %s9948_s20 = smov 0   ;;  %s9950_s21 = smov 0  }
   0x6 LB: > { %s9965_s22 = sadd.s32 4294967295, %s9903_s21   ;;  %s6037_s23 = sadd.s32 4294967294, %s9903_s21   ;;  %s9903_s21 = sphi %s9950_s21, %s11627_s21   ;;  %s9899_s20 = sphi %s9948_s20, %s11626_s20   ;;  %s9895_s19 = sphi %s9946_s19, %s11625_s19   ;;  %s9891_s18 = sphi %s9944_s18, %s11624_s18  }
   0x7   : > { %p42_p0 = scmp.ne.s32.totalorder %s9895_s19, %s9891_s18  ;;  %p11386_p1 = scmp.eq.s32.totalorder %s9965_s22, 0 }
   0x8   : > { %p156_p3 = scmp.eq.s32.totalorder %s6037_s23, 1  ;;  %p6038_p5 = scmp.ge.s32.totalorder %s9903_s21, 1 }
   0x9   : > { %p9974_p4 = por %p11386_p1, %p42_p0  ;;  %p163_p7 = scmp.lt.s32.totalorder %s9903_s21, 3 }
   0xa   : > { %p9979_p6 = por %p156_p3, %p42_p0  ;;  %s9905_s27 = smov [#allocation6]  }
   0xb   : > { %s11464_s24 = scalar_select %p9974_p4, 1, 0 }
   0xc   : > { %s11465_s25 = scalar_select %p9979_p6, 1, 0 }
   0xd   : > { %p9984_p8 = pnand %p6038_p5, %p163_p7  ;;  %s175_s28 = sshll.u32 %s9905_s27, 4  ;;  %s9988_s28 = int_to_ptr.vmem [resolvable:$true] %s175_s28 }
   0xe   : > { %s9906_s30 = smov [#allocation8]   ;;  %s9747_s9 = scalar_lea.hbm %s11381_s1, 18432 }
   0xf   : > { %p9654_p9 = pneg %p9984_p8  ;;  %s188_s6 = sshll.u32 %s9906_s30, 4  ;;  %s9999_s6 = int_to_ptr.vmem [resolvable:$true] %s188_s6 }
  0x10   : > { %p9748_p12 = scmp.ne.s32.totalorder %s11381_s1, %s9747_s9  ;;  %p9754_p5 = scmp.lt.u32.totalorder %s9747_s9, %s11381_s1 }
  0x11   : > { %p9995_p11 = pnand %p9654_p9, %p11386_p1 }
  0x13   : > { %p9749_p13 = pneg %p9995_p11 }
  0x15   : > { %p9750_p0 = pnand %p9749_p13, %p9748_p12 }
  0x17   : > { %p9751_p3 = pneg %p9750_p0 }
  0x19   : > { %p9756_p7 = pnand %p9754_p5, %p9751_p3 }
  0x1b   : > { %9759 = shalt.err (!%p9756_p7)
}
  0x1c   : > { %s9760_s14 = scalar_lea.vmem %s9988_s28, 18432  ;;  %p9768_p2 = scmp.lt.s32.totalorder %s9988_s28, %s9988_s28 }
  0x1d   : > { %p9761_p9 = scmp.ne.s32.totalorder %s9988_s28, %s9760_s14  ;;  %p9769_p12 = scmp.lt.s32.totalorder %s9760_s14, %s9760_s14 }
  0x1f   : > { %p9763_p10 = pnand %p9761_p9, %p9749_p13  ;;  %p9770_p0 = por %p9769_p12, %p9768_p2 }
  0x21   : > { %p9764_p1 = pneg %p9763_p10 }
  0x23   : > { %p9771_p6 = pnand %p9770_p0, %p9764_p1 }
  0x25   : > { %9774 = shalt.err (!%p9771_p6)
}
  0x26   : > { %s11387_s15 = smov 128   ;;  %s9908_s16 = smov 8  }
  0x27   : > { %9657 = dma.hbm_to_vmem [thread:$0]  (!%p9995_p11), %s11381_s1, 18432, %s9988_s28, [#allocation7], %s11387_s15, %s11387_s15, %s9908_s16  }
  0x28   : > { %s9775_s7 = scalar_lea.hbm %s11382_s2, 18432 }
  0x29   : > { %p9776_p1 = scmp.ne.s32.totalorder %s11382_s2, %s9775_s7  ;;  %p9782_p10 = scmp.lt.u32.totalorder %s9775_s7, %s11382_s2 }
  0x2b   : > { %p9778_p2 = pnand %p9776_p1, %p9749_p13 }
  0x2d   : > { %p9779_p6 = pneg %p9778_p2 }
  0x2f   : > { %p9784_p3 = pnand %p9782_p10, %p9779_p6 }
  0x31   : > { %9787 = shalt.err (!%p9784_p3)
}
  0x32   : > { %s9788_s28 = scalar_lea.vmem %s9999_s6, 18432  ;;  %p9796_p12 = scmp.lt.s32.totalorder %s9999_s6, %s9999_s6 }
  0x33   : > { %p9789_p5 = scmp.ne.s32.totalorder %s9999_s6, %s9788_s28  ;;  %p9797_p0 = scmp.lt.s32.totalorder %s9788_s28, %s9788_s28 }
  0x35   : > { %p9791_p7 = pnand %p9789_p5, %p9749_p13  ;;  %p9798_p1 = por %p9797_p0, %p9796_p12 }
  0x37   : > { %p9792_p9 = pneg %p9791_p7 }
  0x39   : > { %p9799_p2 = pnand %p9798_p1, %p9792_p9 }
  0x3b   : > { %9802 = shalt.err (!%p9799_p2)
}
  0x3c   : > { %9660 = dma.hbm_to_vmem [thread:$0]  (!%p9995_p11), %s11382_s2, 18432, %s9999_s6, [#allocation7], %s11387_s15, %s11387_s15, %s9908_s16  }
  0x3d   : > { %s10060_s29 = sadd.s32 1, %s9903_s21   ;;  %s29_s14 = sadd.s32 1, %s9899_s20 }
  0x3e   : > { %s26_s17 = ssub.s32 %s9903_s21, %s10060_s29  ;;  %p36_p13 = scmp.ne.s32.totalorder %s9899_s20, %s9895_s19 }
  0x3f   : > { %p27_p6 = scmp.eq.s32.totalorder %s26_s17, 0  ;;  %p37_p10 = scmp.eq.s32.totalorder %s9903_s21, 0 }
  0x40   : > { %p11468_p3 = scmp.eq.s32.totalorder %s9965_s22, 1  ;;  %p9671_p7 = scmp.lt.s32.totalorder %s9903_s21, 2 }
  0x41   : > { %s10076_s27 = scalar_select %p27_p6, %s9899_s20, %s29_s14  }
  0x42   : > { %p10070_p5 = por %p11468_p3, %p36_p13  ;;  %p38_p9 = por %p37_p10, %p36_p13 }
  0x43   : > { %s208_s30 = sand.u32 1, %s9899_s20   ;;  %s9640_s6 = smul.u32 6912, %s9903_s21 }
  0x44   : > { %s11469_s23 = scalar_select %p10070_p5, 1, 0 }
  0x45   : > { %s9639_s7 = smul.u32 432, %s208_s30  ;;  %p10080_p11 = pnand %p9671_p7, %p38_p9 }
  0x46   : > { %s10087_s11 = scalar_lea.hbm %s11380_s0, %s9640_s6  ;;  %s10091_s13 = scalar_lea.sflag [#allocation4], %s208_s30 }
  0x47   : > { %s212_s28 = scalar_lea.vmem [#allocation3], %s9639_s7  ;;  %s9803_s14 = scalar_lea.hbm %s10087_s11, 6912 }
  0x48   : > { %s219_s12 = sshll.u32 %s212_s28, 4  ;;  %p9804_p12 = scmp.ne.s32.totalorder %s10087_s11, %s9803_s14  ;;  %s10089_s12 = int_to_ptr.vmem [resolvable:$true] %s219_s12 }
  0x49   : > { %p9805_p0 = pneg %p10080_p11  ;;  %s9808_s9 = scalar_lea.hbm %s11380_s0, 13824 }
  0x4a   : > { %p9809_p13 = scmp.lt.u32.totalorder %s10087_s11, %s11380_s0  ;;  %p9810_p6 = scmp.lt.u32.totalorder %s9808_s9, %s9803_s14 }
  0x4b   : > { %p9806_p1 = pnand %p9805_p0, %p9804_p12  ;;  %p9812_p3 = scmp.lt.u32.totalorder %s9803_s14, %s10087_s11 }
  0x4c   : > { %p9811_p10 = por %p9810_p6, %p9809_p13 }
  0x4d   : > { %p9807_p2 = pneg %p9806_p1 }
  0x4e   : > { %p9813_p7 = por %p9812_p3, %p9811_p10 }
  0x50   : > { %p9814_p9 = pnand %p9813_p7, %p9807_p2 }
  0x52   : > { %9817 = shalt.err (!%p9814_p9)
}
  0x53   : > { %s9818_s30 = scalar_lea.vmem %s10089_s12, 6912  ;;  %s9909_s7 = smov [#allocation3]  }
  0x54   : > { %p9819_p12 = scmp.ne.s32.totalorder %s10089_s12, %s9818_s30  ;;  %s9823_s28 = sshll.u32 %s9909_s7, 4  ;;  %s9824_s28 = int_to_ptr.vmem [resolvable:$false] %s9823_s28 }
  0x55   : > { %s9825_s15 = scalar_lea.vmem %s9824_s28, 13824  ;;  %p9826_p4 = scmp.lt.s32.totalorder %s10089_s12, %s9824_s28 }
  0x56   : > { %p9821_p1 = pnand %p9819_p12, %p9805_p0  ;;  %p9827_p13 = scmp.lt.s32.totalorder %s9825_s15, %s9818_s30 }
  0x58   : > { %p9822_p5 = pneg %p9821_p1  ;;  %p9828_p6 = por %p9827_p13, %p9826_p4 }
  0x5a   : > { %p9829_p10 = pnand %p9828_p6, %p9822_p5 }
  0x5c   : > { %9832 = shalt.err (!%p9829_p10)
}
  0x5d   : > { %s11471_s14 = smov 128   ;;  %231 = sbr.rel (%p9984_p8) target bundleno = 1675 (0x68b), region = 40 }
  0x5e   : > { %9664 = dma.hbm_to_vmem [thread:$0]  (!%p10080_p11), %s10087_s11, 6912, %s10089_s12, %s10091_s13, %s11471_s14, %s11471_s14, %s9908_s16  }
  0x64   : > { %s10125_s17 = sand.u32 1, %s9895_s19   ;;  %p11472_p4 = scmp.ne.s32.totalorder %s11464_s24, 0 }
  0x65   : > { %s9641_s6 = smul.u32 432, %s10125_s17  ;;  %s234_s9 = scalar_lea.sflag [#allocation4], %s10125_s17 }
  0x67   : > { %s10129_s10 = scalar_lea.vmem [#allocation3], %s9641_s6 }
  0x68   : > { %9878 = dma.done.wait (%p11472_p4), %s234_s9, 6912  }
  0x69   : > { %9880 = vsyncadd (%p11472_p4), %s234_s9, 4294960384  ;;  %p11473_p5 = scmp.eq.s32.totalorder %s9965_s22, 0 }
  0x6b   : > { %9882 = dma.done.wait (%p11473_p5), [#allocation7], 36864   ;;  %p11474_p8 = pmov %p11473_p5 }
  0x6c   : > { %v386_v0 = vld [vmem:[#allocation6 + $0x80] sm:$0xff]  ;;  %v387_v1 = vld [vmem:[#allocation6 + $0x88] sm:$0xff]  ;;  %v388_v2 = vld [vmem:[#allocation6 + $0x90] sm:$0xff]  ;;  %s6046_s11 = sshll.u32 %s10125_s17, 8  ;;  %s6246_s13 = sshll.u32 %s9965_s22, 12 }
  0x6d   : > { %9884 = vsyncadd (%p11474_p8), [#allocation7], 4294930432  ;;  %v8551_v3 = vpack.c.bf16 %v387_v1, %v386_v0  ;;  %v389_v4 = vld [vmem:[#allocation6 + $0x98] sm:$0xff]  ;;  %v390_v6 = vld [vmem:[#allocation6 + $0xa0] sm:$0xff]  ;;  %s11237_s12 = scalar_lea.vmem [#allocation9], %s6046_s11  ;;  %s11332_s15 = scalar_lea.hbm %s11385_s5, %s6246_s13 }
  0x6e   : > { %v8555_v5 = vpack.c.bf16 %v389_v4, %v388_v2  ;;  %v391_v7 = vld [vmem:[#allocation6 + $0xa8] sm:$0xff]  ;;  %v392_v10 = vld [vmem:[#allocation6 + $0xb0] sm:$0xff]  ;;  %v393_v11 = vld [vmem:[#allocation6 + $0xb8] sm:$0xff]  ;;  %s5945_s30 = sshll.u32 %s11237_s12, 4  ;;  %s5932_s22 = scalar_lea.sflag [#allocation5], %s10125_s17  ;;  %s11334_s30 = int_to_ptr.vmem [resolvable:$true] %s5945_s30 }
  0x6f   : > { %8552 = vmatprep.subr.bf16.mxu0 %v8551_v3  ;;  %v8559_v8 = vpack.c.bf16 %v391_v7, %v390_v6  ;;  %v353_v9 = vld [vmem:[%s10129_s10 + $0x1] sm:$0xff]  ;;  %v8563_v12 = vpack.c.bf16 %v393_v11, %v392_v10  ;;  %v354_v30 = vld [vmem:[%s10129_s10 + $0x9] sm:$0xff]  ;;  %v10142_v31 = vld [vmem:[%s10129_s10 + $0x19] sm:$0xff]  ;;  %s9833_s14 = scalar_lea.vmem %s11334_s30, 4096  ;;  %p11621_p0 = scmp.ne.s32.totalorder %s11469_s23, 0 }
  0x70   : > { %8554 = vmatpush3.bf16.msra.mxu0 %v8551_v3  ;;  %7143 = vmatprep.mubr.f32.mxu0 %v353_v9  ;;  %v394_v13 = vld [vmem:[#allocation6 + $0xc0] sm:$0xff]  ;;  %v395_v14 = vld [vmem:[#allocation6 + $0xc8] sm:$0xff]  ;;  %v396_v16 = vld [vmem:[#allocation6 + $0xd0] sm:$0xff]  ;;  %p9834_p11 = scmp.ne.s32.totalorder %s11334_s30, %s9833_s14  ;;  %s9911_s6 = smov [#allocation9]  }
  0x71   : > { %8556 = vmatprep.subr.bf16.mxu0 %v8555_v5  ;;  %v8567_v15 = vpack.c.bf16 %v395_v14, %v394_v13  ;;  %v397_v17 = vld [vmem:[#allocation6 + $0xd8] sm:$0xff]  ;;  %v398_v19 = vld [vmem:[#allocation6 + $0xe0] sm:$0xff]  ;;  %v399_v20 = vld [vmem:[#allocation6 + $0xe8] sm:$0xff]  ;;  %s9837_s9 = sshll.u32 %s9911_s6, 4  ;;  %s9838_s9 = int_to_ptr.vmem [resolvable:$false] %s9837_s9 }
  0x72   : > { %v8571_v18 = vpack.c.bf16 %v397_v17, %v396_v16  ;;  %v8575_v21 = vpack.c.bf16 %v399_v20, %v398_v19  ;;  %v400_v22 = vld [vmem:[#allocation6 + $0xf0] sm:$0xff]  ;;  %v401_v23 = vld [vmem:[#allocation6 + $0xf8] sm:$0xff]  ;;  %v337_v25 = vld [vmem:[#allocation6] sm:$0xff]  ;;  %p9835_p2 = pnand %p9834_p11, %p11621_p0  ;;  %p9840_p7 = scmp.lt.s32.totalorder %s11334_s30, %s9838_s9 }
  0x73   : > { %v8579_v24 = vpack.c.bf16 %v401_v23, %v400_v22  ;;  %v338_v26 = vld [vmem:[#allocation6 + $0x8] sm:$0xff]  ;;  %v339_v28 = vld [vmem:[#allocation6 + $0x10] sm:$0xff]  ;;  %v340_v29 = vld [vmem:[#allocation6 + $0x18] sm:$0xff] }
  0x74   : > { %8558 = vmatpush3.bf16.msra.mxu0 %v8555_v5  ;;  %v8583_v27 = vpack.c.bf16 %v338_v26, %v337_v25  ;;  %v8587_v32 = vpack.c.bf16 %v340_v29, %v339_v28  ;;  %v341_v33 = vld [vmem:[#allocation6 + $0x20] sm:$0xff]  ;;  %v342_v34 = vld [vmem:[#allocation6 + $0x28] sm:$0xff]  ;;  %v343_v38 = vld [vmem:[#allocation6 + $0x30] sm:$0xff]  ;;  %p9836_p3 = pneg %p9835_p2 }
  0x75   : > { %8560 = vmatprep.subr.bf16.mxu0 %v8559_v8  ;;  %v10146_v35 = vld [vmem:[%s10129_s10 + $0x21] sm:$0xff]  ;;  %v10149_v36 = vld [vmem:[%s10129_s10 + $0x31] sm:$0xff]  ;;  %v8591_v37 = vpack.c.bf16 %v342_v34, %v341_v33  ;;  %v10154_v40 = vld [vmem:[%s10129_s10 + $0x39] sm:$0xff] }
  0x76   : > { %v344_v39 = vld [vmem:[#allocation6 + $0x38] sm:$0xff]  ;;  %v345_v43 = vld [vmem:[#allocation6 + $0x40] sm:$0xff]  ;;  %v346_v44 = vld [vmem:[#allocation6 + $0x48] sm:$0xff] }
  0x77   : > { %v10157_v41 = vld [vmem:[%s10129_s10 + $0x49] sm:$0xff]  ;;  %v8595_v42 = vpack.c.bf16 %v344_v39, %v343_v38  ;;  %v10162_v45 = vld [vmem:[%s10129_s10 + $0x51] sm:$0xff]  ;;  %v10165_v46 = vld [vmem:[%s10129_s10 + $0x61] sm:$0xff]  ;;  %v8599_v47 = vpack.c.bf16 %v346_v44, %v345_v43 }
  0x78   : > { %8562 = vmatpush3.bf16.msra.mxu0 %v8559_v8  ;;  %v347_v48 = vld [vmem:[#allocation6 + $0x50] sm:$0xff]  ;;  %v348_v49 = vld [vmem:[#allocation6 + $0x58] sm:$0xff]  ;;  %v349_v53 = vld [vmem:[#allocation6 + $0x60] sm:$0xff] }
  0x79   : > { %8564 = vmatprep.subr.bf16.mxu0 %v8563_v12  ;;  %v10170_v50 = vld [vmem:[%s10129_s10 + $0x69] sm:$0xff]  ;;  %v10173_v51 = vld [vmem:[%s10129_s10 + $0x79] sm:$0xff]  ;;  %v8603_v52 = vpack.c.bf16 %v348_v49, %v347_v48  ;;  %v10178_v55 = vld [vmem:[%s10129_s10 + $0x81] sm:$0xff] }
  0x7a   : > { %v350_v54 = vld [vmem:[#allocation6 + $0x68] sm:$0xff]  ;;  %v351_v58 = vld [vmem:[#allocation6 + $0x70] sm:$0xff]  ;;  %v352_v59 = vld [vmem:[#allocation6 + $0x78] sm:$0xff] }
  0x7b   : > { %v10181_v56 = vld [vmem:[%s10129_s10 + $0x91] sm:$0xff]  ;;  %v8607_v57 = vpack.c.bf16 %v350_v54, %v349_v53  ;;  %v10186_v60 = vld [vmem:[%s10129_s10 + $0x99] sm:$0xff]  ;;  %v10189_v61 = vld [vmem:[%s10129_s10 + $0xa9] sm:$0xff]  ;;  %v8611_v62 = vpack.c.bf16 %v352_v59, %v351_v58 }
  0x7c   : > { %8566 = vmatpush3.bf16.msra.mxu0 %v8563_v12  ;;  %v885_v63 = vld [vmem:[#allocation6 + $0x100] sm:$0xff]  ;;  %v886_v0 = vld [vmem:[#allocation6 + $0x108] sm:$0xff]  ;;  %v887_v20 = vld [vmem:[#allocation6 + $0x110] sm:$0xff] }
  0x7d   : > { %8568 = vmatprep.subr.bf16.mxu0 %v8567_v15  ;;  %v10194_v1 = vld [vmem:[%s10129_s10 + $0xb1] sm:$0xff]  ;;  %v10197_v2 = vld [vmem:[%s10129_s10 + $0xc1] sm:$0xff]  ;;  %v8615_v3 = vpack.c.bf16 %v886_v0, %v885_v63  ;;  %v10202_v4 = vld [vmem:[%s10129_s10 + $0xc9] sm:$0xff] }
  0x7e   : > { %v10205_v5 = vld [vmem:[%s10129_s10 + $0xd9] sm:$0xff]  ;;  %v10210_v6 = vld [vmem:[%s10129_s10 + $0xe1] sm:$0xff]  ;;  %v10213_v7 = vld [vmem:[%s10129_s10 + $0xf1] sm:$0xff] }
  0x7f   : > { %v10218_v8 = vld [vmem:[%s10129_s10 + $0xf9] sm:$0xff]  ;;  %v10221_v9 = vld [vmem:[%s10129_s10 + $0x109] sm:$0xff]  ;;  %v10226_v10 = vld [vmem:[%s10129_s10 + $0x111] sm:$0xff] }
  0x80   : > { %8570 = vmatpush3.bf16.msra.mxu0 %v8567_v15  ;;  %11475 = vst [vmem:[#allocation13_spill] sm:$0xff] %v10226_v10  ;;  %v10229_v11 = vld [vmem:[%s10129_s10 + $0x121] sm:$0xff]  ;;  %v10234_v12 = vld [vmem:[%s10129_s10 + $0x129] sm:$0xff]  ;;  %v10237_v13 = vld [vmem:[%s10129_s10 + $0x139] sm:$0xff] }
  0x81   : > { %8572 = vmatprep.subr.bf16.mxu0 %v8571_v18  ;;  %11476 = vst [vmem:[#allocation14_spill] sm:$0xff] %v10229_v11  ;;  %11477 = vst [vmem:[#allocation15_spill] sm:$0xff] %v10234_v12  ;;  %v10242_v14 = vld [vmem:[%s10129_s10 + $0x141] sm:$0xff]  ;;  %v10245_v15 = vld [vmem:[%s10129_s10 + $0x151] sm:$0xff] }
  0x82   : > { %11478 = vst [vmem:[#allocation16_spill] sm:$0xff] %v10237_v13  ;;  %11479 = vst [vmem:[#allocation17_spill] sm:$0xff] %v10242_v14  ;;  %v10250_v16 = vld [vmem:[%s10129_s10 + $0x159] sm:$0xff]  ;;  %v10253_v17 = vld [vmem:[%s10129_s10 + $0x169] sm:$0xff] }
  0x83   : > { %11480 = vst [vmem:[#allocation18_spill] sm:$0xff] %v10245_v15  ;;  %11481 = vst [vmem:[#allocation19_spill] sm:$0xff] %v10250_v16  ;;  %v305_v19 = vld [vmem:[%s10129_s10] sm:$0xff]  ;;  %v306_v22 = vld [vmem:[%s10129_s10 + $0x8] sm:$0xff] }
  0x84   : > { %8574 = vmatpush3.bf16.msra.mxu0 %v8571_v18  ;;  %11482 = vst [vmem:[#allocation20_spill] sm:$0xff] %v10253_v17  ;;  %v10258_v18 = vld [vmem:[%s10129_s10 + $0x171] sm:$0xff]  ;;  %v10279_v34 = vld [vmem:[%s10129_s10 + $0x48] sm:$0xff]  ;;  %v10287_v43 = vld [vmem:[%s10129_s10 + $0x60] sm:$0xff] }
  0x85   : > { %8576 = vmatprep.subr.bf16.mxu0 %v8575_v21  ;;  %11483 = vst [vmem:[#allocation21_spill] sm:$0xff] %v10258_v18  ;;  %v10264_v23 = vld [vmem:[%s10129_s10 + $0x18] sm:$0xff]  ;;  %v889_v25 = vld [vmem:[#allocation6 + $0x120] sm:$0xff]  ;;  %v10292_v49 = vld [vmem:[%s10129_s10 + $0x68] sm:$0xff] }
  0x86   : > { %v890_v26 = vld [vmem:[#allocation6 + $0x128] sm:$0xff]  ;;  %v10271_v28 = vld [vmem:[%s10129_s10 + $0x30] sm:$0xff]  ;;  %v896_v48 = vld [vmem:[#allocation6 + $0x158] sm:$0xff] }
  0x87   : > { %v8623_v29 = vpack.c.bf16 %v890_v26, %v889_v25  ;;  %v10276_v33 = vld [vmem:[%s10129_s10 + $0x38] sm:$0xff]  ;;  %v893_v38 = vld [vmem:[#allocation6 + $0x140] sm:$0xff]  ;;  %v899_v63 = vld [vmem:[#allocation6 + $0x170] sm:$0xff] }
  0x88   : > { %8578 = vmatpush3.bf16.msra.mxu0 %v8575_v21  ;;  %v888_v21 = vld [vmem:[#allocation6 + $0x118] sm:$0xff]  ;;  %v894_v39 = vld [vmem:[#allocation6 + $0x148] sm:$0xff]  ;;  %v897_v54 = vld [vmem:[#allocation6 + $0x160] sm:$0xff] }
  0x89   : > { %8580 = vmatprep.subr.bf16.mxu0 %v8579_v24  ;;  %v8631_v44 = vpack.c.bf16 %v894_v39, %v893_v38  ;;  %v10300_v58 = vld [vmem:[%s10129_s10 + $0x80] sm:$0xff]  ;;  %v10303_v59 = vld [vmem:[%s10129_s10 + $0x90] sm:$0xff]  ;;  %v900_v0 = vld [vmem:[#allocation6 + $0x178] sm:$0xff] }
  0x8a   : > { %v10319_v25 = vld [vmem:[%s10129_s10 + $0xc0] sm:$0xff]  ;;  %v10340_v38 = vld [vmem:[%s10129_s10 + $0xf8] sm:$0xff]  ;;  %v10343_v39 = vld [vmem:[%s10129_s10 + $0x108] sm:$0xff] }
  0x8c   : > { %8582 = vmatpush3.bf16.msra.mxu0 %v8579_v24  ;;  %v8619_v24 = vpack.c.bf16 %v888_v21, %v887_v20  ;;  %v8643_v20 = vpack.c.bf16 %v900_v0, %v899_v63  ;;  %v1191_v21 = vld [vmem:[#allocation6 + $0x180] sm:$0xff]  ;;  %v10375_v63 = vld [vmem:[%s10129_s10 + $0x168] sm:$0xff] }
  0x8d   : > { %8584 = vmatprep.subr.bf16.mxu0 %v8583_v27  ;;  %v10380_v0 = vld [vmem:[%s10129_s10 + $0x170] sm:$0xff] }
  0x8f   : > { %7144 = vmatmul.mubr.f32.vlgmr.msra.gmra.mrb[0].mxu0 %v354_v30  ;;  %v891_v30 = vld [vmem:[#allocation6 + $0x130] sm:$0xff] }
  0x90   : > { %8586 = vmatpush3.bf16.msra.mxu0 %v8583_v27  ;;  %7146 = vmatprep.mubr.f32.mxu0 %v10142_v31  ;;  %v10268_v27 = vld [vmem:[%s10129_s10 + $0x20] sm:$0xff] }
  0x91   : > { %8588 = vmatprep.subr.bf16.mxu0 %v8587_v32 }
  0x93   : > { %7147 = vmatmul.mubr.f32.gmra.mrb[2].mxu0 %v10146_v35 }
  0x94   : > { %7149 = vmatprep.mubr.f32.mxu0 %v10149_v36  ;;  %8590 = vmatpush3.bf16.msra.mxu0 %v8587_v32  ;;  %v892_v32 = vld [vmem:[#allocation6 + $0x138] sm:$0xff] }
  0x95   : > { %8592 = vmatprep.subr.bf16.mxu0 %v8591_v37 }
  0x97   : > { %7150 = vmatmul.mubr.f32.gmra.mrb[4].mxu0 %v10154_v40 }
  0x98   : > { %7152 = vmatprep.mubr.f32.mxu0 %v10157_v41  ;;  %8594 = vmatpush3.bf16.msra.mxu0 %v8591_v37  ;;  %v8627_v37 = vpack.c.bf16 %v892_v32, %v891_v30  ;;  %v10327_v30 = vld [vmem:[%s10129_s10 + $0xd8] sm:$0xff]  ;;  %v10332_v32 = vld [vmem:[%s10129_s10 + $0xe0] sm:$0xff] }
  0x99   : > { %8596 = vmatprep.subr.bf16.mxu0 %v8595_v42 }
  0x9b   : > { %7153 = vmatmul.mubr.f32.gmra.mrb[6].mxu0 %v10162_v45 }
  0x9c   : > { %7155 = vmatprep.mubr.f32.mxu0 %v10165_v46  ;;  %8598 = vmatpush3.bf16.msra.mxu0 %v8595_v42  ;;  %v10284_v42 = vld [vmem:[%s10129_s10 + $0x50] sm:$0xff] }
  0x9d   : > { %8600 = vmatprep.subr.bf16.mxu0 %v8599_v47 }
  0x9f   : > { %7156 = vmatmul.mubr.f32.gmra.mrb[8].mxu0 %v10170_v50 }
  0xa0   : > { %7158 = vmatprep.mubr.f32.mxu0 %v10173_v51  ;;  %8602 = vmatpush3.bf16.msra.mxu0 %v8599_v47  ;;  %v895_v47 = vld [vmem:[#allocation6 + $0x150] sm:$0xff] }
  0xa1   : > { %8604 = vmatprep.subr.bf16.mxu0 %v8603_v52  ;;  %v8635_v53 = vpack.c.bf16 %v896_v48, %v895_v47  ;;  %v10351_v47 = vld [vmem:[%s10129_s10 + $0x120] sm:$0xff]  ;;  %v10356_v48 = vld [vmem:[%s10129_s10 + $0x128] sm:$0xff] }
  0xa3   : > { %7159 = vmatmul.mubr.f32.gmra.mrb[10].mxu0 %v10178_v55 }
  0xa4   : > { %7161 = vmatprep.mubr.f32.mxu0 %v10181_v56  ;;  %8606 = vmatpush3.bf16.msra.mxu0 %v8603_v52  ;;  %v10295_v52 = vld [vmem:[%s10129_s10 + $0x78] sm:$0xff] }
  0xa5   : > { %8608 = vmatprep.subr.bf16.mxu0 %v8607_v57 }
  0xa7   : > { %7162 = vmatmul.mubr.f32.gmra.mrb[12].mxu0 %v10186_v60 }
  0xa8   : > { %7164 = vmatprep.mubr.f32.mxu0 %v10189_v61  ;;  %8610 = vmatpush3.bf16.msra.mxu0 %v8607_v57  ;;  %v898_v57 = vld [vmem:[#allocation6 + $0x168] sm:$0xff] }
  0xa9   : > { %8612 = vmatprep.subr.bf16.mxu0 %v8611_v62 }
  0xab   : > { %7165 = vmatmul.mubr.f32.gmra.mrb[14].mxu0 %v10194_v1 }
  0xac   : > { %7167 = vmatprep.mubr.f32.mxu0 %v10197_v2  ;;  %8614 = vmatpush3.bf16.msra.mxu0 %v8611_v62  ;;  %v8639_v62 = vpack.c.bf16 %v898_v57, %v897_v54  ;;  %v10364_v54 = vld [vmem:[%s10129_s10 + $0x140] sm:$0xff]  ;;  %v10367_v57 = vld [vmem:[%s10129_s10 + $0x150] sm:$0xff] }
  0xad   : > { %8616 = vmatprep.subr.bf16.mxu0 %v8615_v3 }
  0xaf   : > { %7168 = vmatmul.mubr.f32.gmra.mrb[16].mxu0 %v10202_v4 }
  0xb0   : > { %7170 = vmatprep.mubr.f32.mxu0 %v10205_v5 }
  0xb3   : > { %7171 = vmatmul.mubr.f32.gmra.mrb[18].mxu0 %v10210_v6 }
  0xb4   : > { %7173 = vmatprep.mubr.f32.mxu0 %v10213_v7 }
  0xb7   : > { %7174 = vmatmul.mubr.f32.gmra.mrb[20].mxu0 %v10218_v8 }
  0xb8   : > { %7176 = vmatprep.mubr.f32.mxu0 %v10221_v9 }
  0xbb   : > { %7177 = vmatmul.mubr.f32.gmra.mrb[22].mxu0 %v10226_v10  ;;  %v1198_v10 = vld [vmem:[#allocation6 + $0x1b8] sm:$0xff] }
  0xbc   : > { %7179 = vmatprep.mubr.f32.mxu0 %v10229_v11 }
  0xbf   : > { %7180 = vmatmul.mubr.f32.gmra.mrb[24].mxu0 %v10234_v12  ;;  %v10393_v12 = vld [vmem:[%s10129_s10 + $0x32] sm:$0xff] }
  0xc0   : > { %7182 = vmatprep.mubr.f32.mxu0 %v10237_v13  ;;  %v10390_v13 = vld [vmem:[%s10129_s10 + $0x22] sm:$0xff]  ;;  %11486 = vst [vmem:[#allocation24_spill] sm:$0xff] %v10393_v12 }
  0xc1   : > { %11485 = vst [vmem:[#allocation23_spill] sm:$0xff] %v10390_v13 }
  0xc3   : > { %7183 = vmatmul.mubr.f32.gmra.mrb[26].mxu0 %v10242_v14  ;;  %v1196_v14 = vld [vmem:[#allocation6 + $0x1a8] sm:$0xff] }
  0xc4   : > { %7185 = vmatprep.mubr.f32.mxu0 %v10245_v15  ;;  %v1195_v15 = vld [vmem:[#allocation6 + $0x1a0] sm:$0xff] }
  0xc5   : > { %v8655_v11 = vpack.c.bf16 %v1196_v14, %v1195_v15  ;;  %v10406_v14 = vld [vmem:[%s10129_s10 + $0x52] sm:$0xff]  ;;  %v10409_v15 = vld [vmem:[%s10129_s10 + $0x62] sm:$0xff] }
  0xc6   : > { %11489 = vst [vmem:[#allocation27_spill] sm:$0xff] %v10406_v14  ;;  %11490 = vst [vmem:[#allocation28_spill] sm:$0xff] %v10409_v15 }
  0xc7   : > { %7186 = vmatmul.mubr.f32.gmra.mrb[28].mxu0 %v10250_v16 }
  0xc8   : > { %7188 = vmatprep.mubr.f32.mxu0 %v10253_v17  ;;  %v10386_v17 = vld [vmem:[%s10129_s10 + $0x1a] sm:$0xff] }
  0xc9   : > { %11484 = vst [vmem:[#allocation22_spill] sm:$0xff] %v10386_v17 }
  0xcb   : > { %7189 = vmatmul.mubr.f32.gmra.mrb[30].mxu0 %v10258_v18  ;;  %v853_v18 = vld [vmem:[%s10129_s10 + $0xa] sm:$0xff] }
  0xcc   : > { %7223 = vmatprep.mubr.f32.mxu0 %v305_v19  ;;  %v10311_v19 = vld [vmem:[%s10129_s10 + $0xa8] sm:$0xff] }
  0xcf   : > { %7224 = vmatmul.mubr.f32.vlgmr.msra.gmra.mrb[0].mxu0 %v306_v22  ;;  %v1192_v22 = vld [vmem:[#allocation6 + $0x188] sm:$0xff] }
  0xd0   : > { %8618 = vmatpush3.bf16.msra.mxu0 %v8615_v3  ;;  %7226 = vmatprep.mubr.f32.mxu0 %v10264_v23  ;;  %v10308_v3 = vld [vmem:[%s10129_s10 + $0x98] sm:$0xff]  ;;  %v8647_v26 = vpack.c.bf16 %v1192_v22, %v1191_v21  ;;  %v1193_v21 = vld [vmem:[#allocation6 + $0x190] sm:$0xff] }
  0xd1   : > { %8620 = vmatprep.subr.bf16.mxu0 %v8619_v24  ;;  %v1194_v22 = vld [vmem:[#allocation6 + $0x198] sm:$0xff] }
  0xd2   : > { %v8651_v16 = vpack.c.bf16 %v1194_v22, %v1193_v21  ;;  %v10398_v21 = vld [vmem:[%s10129_s10 + $0x3a] sm:$0xff] }
  0xd3   : > { %7227 = vmatmul.mubr.f32.gmra.mrb[2].mxu0 %v10268_v27  ;;  %11487 = vst [vmem:[#allocation25_spill] sm:$0xff] %v10398_v21  ;;  %v1199_v22 = vld [vmem:[#allocation6 + $0x1c0] sm:$0xff] }
  0xd4   : > { %7229 = vmatprep.mubr.f32.mxu0 %v10271_v28  ;;  %8622 = vmatpush3.bf16.msra.mxu0 %v8619_v24  ;;  %v10316_v24 = vld [vmem:[%s10129_s10 + $0xb0] sm:$0xff] }
  0xd5   : > { %8624 = vmatprep.subr.bf16.mxu0 %v8623_v29 }
  0xd7   : > { %7230 = vmatmul.mubr.f32.gmra.mrb[4].mxu0 %v10276_v33 }
  0xd8   : > { %7232 = vmatprep.mubr.f32.mxu0 %v10279_v34  ;;  %8626 = vmatpush3.bf16.msra.mxu0 %v8623_v29  ;;  %v10324_v29 = vld [vmem:[%s10129_s10 + $0xc8] sm:$0xff] }
  0xd9   : > { %8628 = vmatprep.subr.bf16.mxu0 %v8627_v37 }
  0xdb   : > { %7233 = vmatmul.mubr.f32.gmra.mrb[6].mxu0 %v10284_v42 }
  0xdc   : > { %7235 = vmatprep.mubr.f32.mxu0 %v10287_v43  ;;  %8630 = vmatpush3.bf16.msra.mxu0 %v8627_v37  ;;  %v10335_v37 = vld [vmem:[%s10129_s10 + $0xf0] sm:$0xff] }
  0xdd   : > { %8632 = vmatprep.subr.bf16.mxu0 %v8631_v44 }
  0xdf   : > { %7236 = vmatmul.mubr.f32.gmra.mrb[8].mxu0 %v10292_v49 }
  0xe0   : > { %7238 = vmatprep.mubr.f32.mxu0 %v10295_v52  ;;  %8634 = vmatpush3.bf16.msra.mxu0 %v8631_v44  ;;  %v10348_v44 = vld [vmem:[%s10129_s10 + $0x110] sm:$0xff] }
  0xe1   : > { %8636 = vmatprep.subr.bf16.mxu0 %v8635_v53 }
  0xe3   : > { %7239 = vmatmul.mubr.f32.gmra.mrb[10].mxu0 %v10300_v58 }
  0xe4   : > { %7241 = vmatprep.mubr.f32.mxu0 %v10303_v59  ;;  %8638 = vmatpush3.bf16.msra.mxu0 %v8635_v53  ;;  %v10359_v53 = vld [vmem:[%s10129_s10 + $0x138] sm:$0xff] }
  0xe5   : > { %8640 = vmatprep.subr.bf16.mxu0 %v8639_v62 }
  0xe7   : > { %7242 = vmatmul.mubr.f32.gmra.mrb[12].mxu0 %v10308_v3 }
  0xe8   : > { %7244 = vmatprep.mubr.f32.mxu0 %v10311_v19  ;;  %8642 = vmatpush3.bf16.msra.mxu0 %v8639_v62  ;;  %v10372_v62 = vld [vmem:[%s10129_s10 + $0x158] sm:$0xff] }
  0xe9   : > { %8644 = vmatprep.subr.bf16.mxu0 %v8643_v20 }
  0xeb   : > { %7245 = vmatmul.mubr.f32.gmra.mrb[14].mxu0 %v10316_v24 }
  0xec   : > { %7247 = vmatprep.mubr.f32.mxu0 %v10319_v25  ;;  %8646 = vmatpush3.bf16.msra.mxu0 %v8643_v20  ;;  %v852_v20 = vld [vmem:[%s10129_s10 + $0x2] sm:$0xff] }
  0xed   : > { %8648 = vmatprep.subr.bf16.mxu0 %v8647_v26 }
  0xef   : > { %7248 = vmatmul.mubr.f32.gmra.mrb[16].mxu0 %v10324_v29 }
  0xf0   : > { %7250 = vmatprep.mubr.f32.mxu0 %v10327_v30 }
  0xf3   : > { %7251 = vmatmul.mubr.f32.gmra.mrb[18].mxu0 %v10332_v32 }
  0xf4   : > { %7253 = vmatprep.mubr.f32.mxu0 %v10335_v37 }
  0xf7   : > { %7254 = vmatmul.mubr.f32.gmra.mrb[20].mxu0 %v10340_v38 }
  0xf8   : > { %7256 = vmatprep.mubr.f32.mxu0 %v10343_v39 }
  0xfb   : > { %7257 = vmatmul.mubr.f32.gmra.mrb[22].mxu0 %v10348_v44 }
  0xfc   : > { %7259 = vmatprep.mubr.f32.mxu0 %v10351_v47 }
  0xff   : > { %7260 = vmatmul.mubr.f32.gmra.mrb[24].mxu0 %v10356_v48 }
 0x100   : > { %7262 = vmatprep.mubr.f32.mxu0 %v10359_v53 }
 0x103   : > { %7263 = vmatmul.mubr.f32.gmra.mrb[26].mxu0 %v10364_v54 }
 0x104   : > { %7265 = vmatprep.mubr.f32.mxu0 %v10367_v57 }
 0x107   : > { %7266 = vmatmul.mubr.f32.gmra.mrb[28].mxu0 %v10372_v62 }
 0x108   : > { %7268 = vmatprep.mubr.f32.mxu0 %v10375_v63 }
 0x10b   : > { %7269 = vmatmul.mubr.f32.gmra.mrb[30].mxu0 %v10380_v0 }
 0x10c   : > { %7303 = vmatprep.mubr.f32.mxu0 %v852_v20  ;;  %v1197_v20 = vld [vmem:[#allocation6 + $0x1b0] sm:$0xff] }
 0x10f   : > { %7304 = vmatmul.mubr.f32.vlgmr.msra.gmra.mrb[0].mxu0 %v853_v18  ;;  %v10401_v18 = vld [vmem:[%s10129_s10 + $0x4a] sm:$0xff] }
 0x110   : > { %8650 = vmatpush3.bf16.msra.mxu0 %v8647_v26  ;;  %7306 = vmatprep.mubr.f32.mxu0 %v10386_v17  ;;  %11488 = vst [vmem:[#allocation26_spill] sm:$0xff] %v10401_v18  ;;  %v8659_v26 = vpack.c.bf16 %v1198_v10, %v1197_v20  ;;  %v1200_v17 = vld [vmem:[#allocation6 + $0x1c8] sm:$0xff] }
 0x111   : > { %8652 = vmatprep.subr.bf16.mxu0 %v8651_v16  ;;  %v10414_v10 = vld [vmem:[%s10129_s10 + $0x6a] sm:$0xff]  ;;  %v10417_v20 = vld [vmem:[%s10129_s10 + $0x7a] sm:$0xff] }
 0x112   : > { %11491 = vst [vmem:[#allocation29_spill] sm:$0xff] %v10414_v10  ;;  %11492 = vst [vmem:[#allocation30_spill] sm:$0xff] %v10417_v20 }
 0x113   : > { %7307 = vmatmul.mubr.f32.gmra.mrb[2].mxu0 %v10390_v13  ;;  %v1202_v13 = vld [vmem:[#allocation6 + $0x1d8] sm:$0xff] }
 0x114   : > { %7309 = vmatprep.mubr.f32.mxu0 %v10393_v12  ;;  %8654 = vmatpush3.bf16.msra.mxu0 %v8651_v16  ;;  %v8663_v16 = vpack.c.bf16 %v1200_v17, %v1199_v22  ;;  %v1201_v12 = vld [vmem:[#allocation6 + $0x1d0] sm:$0xff] }
 0x115   : > { %8656 = vmatprep.subr.bf16.mxu0 %v8655_v11  ;;  %v10422_v17 = vld [vmem:[%s10129_s10 + $0x82] sm:$0xff]  ;;  %v10425_v22 = vld [vmem:[%s10129_s10 + $0x92] sm:$0xff] }
 0x117   : > { %7310 = vmatmul.mubr.f32.gmra.mrb[4].mxu0 %v10398_v21  ;;  %v1204_v21 = vld [vmem:[#allocation6 + $0x1e8] sm:$0xff] }
 0x118   : > { %7312 = vmatprep.mubr.f32.mxu0 %v10401_v18  ;;  %8658 = vmatpush3.bf16.msra.mxu0 %v8655_v11  ;;  %v8667_v11 = vpack.c.bf16 %v1202_v13, %v1201_v12  ;;  %v1203_v18 = vld [vmem:[#allocation6 + $0x1e0] sm:$0xff] }
 0x119   : > { %8660 = vmatprep.subr.bf16.mxu0 %v8659_v26  ;;  %v10430_v12 = vld [vmem:[%s10129_s10 + $0x9a] sm:$0xff]  ;;  %v10433_v13 = vld [vmem:[%s10129_s10 + $0xaa] sm:$0xff] }
 0x11a   : > { %11493 = vst [vmem:[#allocation31_spill] sm:$0xff] %v10433_v13 }
 0x11b   : > { %7313 = vmatmul.mubr.f32.gmra.mrb[6].mxu0 %v10406_v14  ;;  %v1206_v14 = vld [vmem:[#allocation6 + $0x1f8] sm:$0xff] }
 0x11c   : > { %7315 = vmatprep.mubr.f32.mxu0 %v10409_v15  ;;  %8662 = vmatpush3.bf16.msra.mxu0 %v8659_v26  ;;  %v8671_v26 = vpack.c.bf16 %v1204_v21, %v1203_v18  ;;  %v1205_v15 = vld [vmem:[#allocation6 + $0x1f0] sm:$0xff] }
 0x11d   : > { %8664 = vmatprep.subr.bf16.mxu0 %v8663_v16  ;;  %v10438_v21 = vld [vmem:[%s10129_s10 + $0xb2] sm:$0xff]  ;;  %v10441_v18 = vld [vmem:[%s10129_s10 + $0xc2] sm:$0xff] }
 0x11e   : > { %11494 = vst [vmem:[#allocation32_spill] sm:$0xff] %v10438_v21  ;;  %11495 = vst [vmem:[#allocation33_spill] sm:$0xff] %v10441_v18 }
 0x11f   : > { %7316 = vmatmul.mubr.f32.gmra.mrb[8].mxu0 %v10414_v10  ;;  %v1466_v10 = vld [vmem:[#allocation6 + $0x208] sm:$0xff] }
 0x120   : > { %7318 = vmatprep.mubr.f32.mxu0 %v10417_v20  ;;  %8666 = vmatpush3.bf16.msra.mxu0 %v8663_v16  ;;  %v8675_v16 = vpack.c.bf16 %v1206_v14, %v1205_v15  ;;  %v1465_v20 = vld [vmem:[#allocation6 + $0x200] sm:$0xff] }
 0x121   : > { %8668 = vmatprep.subr.bf16.mxu0 %v8667_v11  ;;  %v10446_v14 = vld [vmem:[%s10129_s10 + $0xca] sm:$0xff]  ;;  %v10449_v15 = vld [vmem:[%s10129_s10 + $0xda] sm:$0xff] }
 0x122   : > { %11496 = vst [vmem:[#allocation34_spill] sm:$0xff] %v10446_v14  ;;  %11497 = vst [vmem:[#allocation35_spill] sm:$0xff] %v10449_v15 }
 0x123   : > { %7319 = vmatmul.mubr.f32.gmra.mrb[10].mxu0 %v10422_v17 }
 0x124   : > { %7321 = vmatprep.mubr.f32.mxu0 %v10425_v22  ;;  %8670 = vmatpush3.bf16.msra.mxu0 %v8667_v11  ;;  %v8679_v11 = vpack.c.bf16 %v1466_v10, %v1465_v20  ;;  %v10457_v10 = vld [vmem:[%s10129_s10 + $0xf2] sm:$0xff]  ;;  %v10462_v20 = vld [vmem:[%s10129_s10 + $0xfa] sm:$0xff] }
 0x125   : > { %8672 = vmatprep.subr.bf16.mxu0 %v8671_v26  ;;  %11499 = vst [vmem:[#allocation37_spill] sm:$0xff] %v10457_v10  ;;  %11500 = vst [vmem:[#allocation38_spill] sm:$0xff] %v10462_v20 }
 0x127   : > { %7322 = vmatmul.mubr.f32.gmra.mrb[12].mxu0 %v10430_v12 }
 0x128   : > { %7324 = vmatprep.mubr.f32.mxu0 %v10433_v13  ;;  %8674 = vmatpush3.bf16.msra.mxu0 %v8671_v26  ;;  %v10454_v26 = vld [vmem:[%s10129_s10 + $0xe2] sm:$0xff] }
 0x129   : > { %8676 = vmatprep.subr.bf16.mxu0 %v8675_v16  ;;  %11498 = vst [vmem:[#allocation36_spill] sm:$0xff] %v10454_v26  ;;  %v1470_v13 = vld [vmem:[#allocation6 + $0x228] sm:$0xff] }
 0x12b   : > { %7325 = vmatmul.mubr.f32.gmra.mrb[14].mxu0 %v10438_v21 }
 0x12c   : > { %7327 = vmatprep.mubr.f32.mxu0 %v10441_v18  ;;  %8678 = vmatpush3.bf16.msra.mxu0 %v8675_v16  ;;  %v10465_v16 = vld [vmem:[%s10129_s10 + $0x10a] sm:$0xff]  ;;  %v10494_v18 = vld [vmem:[%s10129_s10 + $0x15a] sm:$0xff] }
 0x12d   : > { %8680 = vmatprep.subr.bf16.mxu0 %v8679_v11  ;;  %11501 = vst [vmem:[#allocation39_spill] sm:$0xff] %v10465_v16  ;;  %11508 = vst [vmem:[#allocation46_spill] sm:$0xff] %v10494_v18 }
 0x12f   : > { %7328 = vmatmul.mubr.f32.gmra.mrb[16].mxu0 %v10446_v14  ;;  %v10473_v14 = vld [vmem:[%s10129_s10 + $0x122] sm:$0xff] }
 0x130   : > { %7330 = vmatprep.mubr.f32.mxu0 %v10449_v15  ;;  %v10470_v15 = vld [vmem:[%s10129_s10 + $0x112] sm:$0xff]  ;;  %11503 = vst [vmem:[#allocation41_spill] sm:$0xff] %v10473_v14 }
 0x131   : > { %11502 = vst [vmem:[#allocation40_spill] sm:$0xff] %v10470_v15 }
 0x133   : > { %7331 = vmatmul.mubr.f32.gmra.mrb[18].mxu0 %v10454_v26  ;;  %v10481_v26 = vld [vmem:[%s10129_s10 + $0x13a] sm:$0xff] }
 0x134   : > { %7333 = vmatprep.mubr.f32.mxu0 %v10457_v10  ;;  %v10478_v10 = vld [vmem:[%s10129_s10 + $0x12a] sm:$0xff]  ;;  %11505 = vst [vmem:[#allocation43_spill] sm:$0xff] %v10481_v26 }
 0x135   : > { %11504 = vst [vmem:[#allocation42_spill] sm:$0xff] %v10478_v10 }
 0x137   : > { %7334 = vmatmul.mubr.f32.gmra.mrb[20].mxu0 %v10462_v20  ;;  %v10486_v20 = vld [vmem:[%s10129_s10 + $0x142] sm:$0xff] }
 0x138   : > { %7336 = vmatprep.mubr.f32.mxu0 %v10465_v16  ;;  %11506 = vst [vmem:[#allocation44_spill] sm:$0xff] %v10486_v20  ;;  %v10489_v16 = vld [vmem:[%s10129_s10 + $0x152] sm:$0xff] }
 0x139   : > { %11507 = vst [vmem:[#allocation45_spill] sm:$0xff] %v10489_v16 }
 0x13b   : > { %7337 = vmatmul.mubr.f32.gmra.mrb[22].mxu0 %v10470_v15  ;;  %v10497_v15 = vld [vmem:[%s10129_s10 + $0x16a] sm:$0xff] }
 0x13c   : > { %7339 = vmatprep.mubr.f32.mxu0 %v10473_v14  ;;  %11509 = vst [vmem:[#allocation47_spill] sm:$0xff] %v10497_v15  ;;  %v10502_v14 = vld [vmem:[%s10129_s10 + $0x172] sm:$0xff] }
 0x13d   : > { %11510 = vst [vmem:[#allocation48_spill] sm:$0xff] %v10502_v14 }
 0x13f   : > { %7340 = vmatmul.mubr.f32.gmra.mrb[24].mxu0 %v10478_v10  ;;  %v1467_v10 = vld [vmem:[#allocation6 + $0x210] sm:$0xff] }
 0x140   : > { %7342 = vmatprep.mubr.f32.mxu0 %v10481_v26  ;;  %v1468_v26 = vld [vmem:[#allocation6 + $0x218] sm:$0xff] }
 0x141   : > { %v8683_v21 = vpack.c.bf16 %v1468_v26, %v1467_v10  ;;  %v1474_v26 = vld [vmem:[#allocation6 + $0x248] sm:$0xff]  ;;  %v1477_v10 = vld [vmem:[#allocation6 + $0x260] sm:$0xff] }
 0x143   : > { %7343 = vmatmul.mubr.f32.gmra.mrb[26].mxu0 %v10486_v20  ;;  %v1469_v20 = vld [vmem:[#allocation6 + $0x220] sm:$0xff] }
 0x144   : > { %7345 = vmatprep.mubr.f32.mxu0 %v10489_v16  ;;  %v1471_v16 = vld [vmem:[#allocation6 + $0x230] sm:$0xff] }
 0x147   : > { %7346 = vmatmul.mubr.f32.gmra.mrb[28].mxu0 %v10494_v18  ;;  %v8687_v18 = vpack.c.bf16 %v1470_v13, %v1469_v20  ;;  %v1476_v13 = vld [vmem:[#allocation6 + $0x258] sm:$0xff]  ;;  %v1479_v20 = vld [vmem:[#allocation6 + $0x270] sm:$0xff] }
 0x148   : > { %7348 = vmatprep.mubr.f32.mxu0 %v10497_v15  ;;  %v1472_v15 = vld [vmem:[#allocation6 + $0x238] sm:$0xff] }
 0x14b   : > { %7349 = vmatmul.mubr.f32.gmra.mrb[30].mxu0 %v10502_v14  ;;  %v8691_v14 = vpack.c.bf16 %v1472_v15, %v1471_v16  ;;  %v1478_v15 = vld [vmem:[#allocation6 + $0x268] sm:$0xff]  ;;  %v1480_v16 = vld [vmem:[#allocation6 + $0x278] sm:$0xff] }
 0x14c   : > { %7383 = vmatprep.mubr.f32.mxu0 %v10264_v23  ;;  %v1473_v23 = vld [vmem:[#allocation6 + $0x240] sm:$0xff] }
 0x14f   : > { %7384 = vmatmul.mubr.f32.vlgmr.msra.gmra.mrb[0].mxu0 %v10268_v27  ;;  %v8695_v27 = vpack.c.bf16 %v1474_v26, %v1473_v23  ;;  %v1771_v23 = vld [vmem:[#allocation6 + $0x280] sm:$0xff]  ;;  %v1772_v26 = vld [vmem:[#allocation6 + $0x288] sm:$0xff] }
 0x150   : > { %8682 = vmatpush3.bf16.msra.mxu0 %v8679_v11  ;;  %7386 = vmatprep.mubr.f32.mxu0 %v10271_v28  ;;  %v1475_v11 = vld [vmem:[#allocation6 + $0x250] sm:$0xff] }
 0x151   : > { %8684 = vmatprep.subr.bf16.mxu0 %v8683_v21 }
 0x153   : > { %7387 = vmatmul.mubr.f32.gmra.mrb[2].mxu0 %v10276_v33 }
 0x154   : > { %7389 = vmatprep.mubr.f32.mxu0 %v10279_v34  ;;  %8686 = vmatpush3.bf16.msra.mxu0 %v8683_v21  ;;  %v8699_v21 = vpack.c.bf16 %v1476_v13, %v1475_v11  ;;  %v10535_v11 = vld [vmem:[%s10129_s10 + $0x180] sm:$0xff]  ;;  %v10540_v13 = vld [vmem:[%s10129_s10 + $0x188] sm:$0xff] }
 0x155   : > { %8688 = vmatprep.subr.bf16.mxu0 %v8687_v18 }
 0x157   : > { %7390 = vmatmul.mubr.f32.gmra.mrb[4].mxu0 %v10284_v42 }
 0x158   : > { %7392 = vmatprep.mubr.f32.mxu0 %v10287_v43  ;;  %8690 = vmatpush3.bf16.msra.mxu0 %v8687_v18  ;;  %v8703_v18 = vpack.c.bf16 %v1478_v15, %v1477_v10  ;;  %v1774_v10 = vld [vmem:[#allocation6 + $0x298] sm:$0xff] }
 0x159   : > { %8692 = vmatprep.subr.bf16.mxu0 %v8691_v14 }
 0x15b   : > { %7393 = vmatmul.mubr.f32.gmra.mrb[6].mxu0 %v10292_v49 }
 0x15c   : > { %7395 = vmatprep.mubr.f32.mxu0 %v10295_v52  ;;  %8694 = vmatpush3.bf16.msra.mxu0 %v8691_v14  ;;  %v8707_v14 = vpack.c.bf16 %v1480_v16, %v1479_v20  ;;  %v1776_v20 = vld [vmem:[#allocation6 + $0x2a8] sm:$0xff] }
 0x15d   : > { %8696 = vmatprep.subr.bf16.mxu0 %v8695_v27 }
 0x15f   : > { %7396 = vmatmul.mubr.f32.gmra.mrb[8].mxu0 %v10300_v58 }
 0x160   : > { %7398 = vmatprep.mubr.f32.mxu0 %v10303_v59  ;;  %8698 = vmatpush3.bf16.msra.mxu0 %v8695_v27  ;;  %v8711_v27 = vpack.c.bf16 %v1772_v26, %v1771_v23  ;;  %v1778_v23 = vld [vmem:[#allocation6 + $0x2b8] sm:$0xff] }
 0x161   : > { %8700 = vmatprep.subr.bf16.mxu0 %v8699_v21 }
 0x163   : > { %7399 = vmatmul.mubr.f32.gmra.mrb[10].mxu0 %v10308_v3 }
 0x164   : > { %7401 = vmatprep.mubr.f32.mxu0 %v10311_v19  ;;  %8702 = vmatpush3.bf16.msra.mxu0 %v8699_v21  ;;  %v1773_v21 = vld [vmem:[#allocation6 + $0x290] sm:$0xff] }
 0x165   : > { %8704 = vmatprep.subr.bf16.mxu0 %v8703_v18  ;;  %v8715_v15 = vpack.c.bf16 %v1774_v10, %v1773_v21  ;;  %v1780_v21 = vld [vmem:[#allocation6 + $0x2c8] sm:$0xff] }
 0x166   : > { %v1784_v10 = vld [vmem:[#allocation6 + $0x2e8] sm:$0xff] }
 0x167   : > { %7402 = vmatmul.mubr.f32.gmra.mrb[12].mxu0 %v10316_v24 }
 0x168   : > { %7404 = vmatprep.mubr.f32.mxu0 %v10319_v25  ;;  %8706 = vmatpush3.bf16.msra.mxu0 %v8703_v18  ;;  %v1775_v18 = vld [vmem:[#allocation6 + $0x2a0] sm:$0xff] }
 0x169   : > { %8708 = vmatprep.subr.bf16.mxu0 %v8707_v14  ;;  %v8719_v16 = vpack.c.bf16 %v1776_v20, %v1775_v18  ;;  %v2079_v18 = vld [vmem:[#allocation6 + $0x308] sm:$0xff]  ;;  %v2080_v20 = vld [vmem:[#allocation6 + $0x310] sm:$0xff] }
 0x16b   : > { %7405 = vmatmul.mubr.f32.gmra.mrb[14].mxu0 %v10324_v29 }
 0x16c   : > { %7407 = vmatprep.mubr.f32.mxu0 %v10327_v30  ;;  %8710 = vmatpush3.bf16.msra.mxu0 %v8707_v14  ;;  %v1777_v14 = vld [vmem:[#allocation6 + $0x2b0] sm:$0xff] }
 0x16d   : > { %8712 = vmatprep.subr.bf16.mxu0 %v8711_v27  ;;  %v8723_v26 = vpack.c.bf16 %v1778_v23, %v1777_v14  ;;  %v11520_v14 = vld [vmem:[#allocation22_spill] sm:$0xff] }
 0x16f   : > { %7408 = vmatmul.mubr.f32.gmra.mrb[16].mxu0 %v10332_v32 }
 0x170   : > { %7410 = vmatprep.mubr.f32.mxu0 %v10335_v37 }
 0x173   : > { %7411 = vmatmul.mubr.f32.gmra.mrb[18].mxu0 %v10340_v38 }
 0x174   : > { %7413 = vmatprep.mubr.f32.mxu0 %v10343_v39 }
 0x177   : > { %7414 = vmatmul.mubr.f32.gmra.mrb[20].mxu0 %v10348_v44 }
 0x178   : > { %7416 = vmatprep.mubr.f32.mxu0 %v10351_v47 }
 0x17b   : > { %7417 = vmatmul.mubr.f32.gmra.mrb[22].mxu0 %v10356_v48 }
 0x17c   : > { %7419 = vmatprep.mubr.f32.mxu0 %v10359_v53 }
 0x17f   : > { %7420 = vmatmul.mubr.f32.gmra.mrb[24].mxu0 %v10364_v54 }
 0x180   : > { %7422 = vmatprep.mubr.f32.mxu0 %v10367_v57 }
 0x183   : > { %7423 = vmatmul.mubr.f32.gmra.mrb[26].mxu0 %v10372_v62 }
 0x184   : > { %7425 = vmatprep.mubr.f32.mxu0 %v10375_v63 }
 0x187   : > { %7426 = vmatmul.mubr.f32.gmra.mrb[28].mxu0 %v10380_v0 }
 0x188   : > { %7428 = vmatprep.mubr.f32.mxu0 %v10535_v11 }
 0x18b   : > { %7429 = vmatmul.mubr.f32.gmra.mrb[30].mxu0 %v10540_v13 }
 0x18c   : > { %7463 = vmatprep.mubr.f32.mxu0 %v10142_v31  ;;  %v1779_v31 = vld [vmem:[#allocation6 + $0x2c0] sm:$0xff] }
 0x18f   : > { %7464 = vmatmul.mubr.f32.vlgmr.msra.gmra.mrb[0].mxu0 %v10146_v35  ;;  %v8727_v35 = vpack.c.bf16 %v1780_v21, %v1779_v31  ;;  %v2083_v31 = vld [vmem:[#allocation6 + $0x328] sm:$0xff]  ;;  %v11521_v21 = vld [vmem:[#allocation23_spill] sm:$0xff] }
 0x190   : > { %8714 = vmatpush3.bf16.msra.mxu0 %v8711_v27  ;;  %7466 = vmatprep.mubr.f32.mxu0 %v10149_v36  ;;  %v1781_v36 = vld [vmem:[#allocation6 + $0x2d0] sm:$0xff]  ;;  %v1782_v27 = vld [vmem:[#allocation6 + $0x2d8] sm:$0xff] }
 0x191   : > { %8716 = vmatprep.subr.bf16.mxu0 %v8715_v15 }
 0x193   : > { %7467 = vmatmul.mubr.f32.gmra.mrb[2].mxu0 %v10154_v40  ;;  %v8731_v40 = vpack.c.bf16 %v1782_v27, %v1781_v36  ;;  %v2084_v27 = vld [vmem:[#allocation6 + $0x330] sm:$0xff] }
 0x194   : > { %7469 = vmatprep.mubr.f32.mxu0 %v10157_v41  ;;  %8718 = vmatpush3.bf16.msra.mxu0 %v8715_v15  ;;  %v1783_v41 = vld [vmem:[#allocation6 + $0x2e0] sm:$0xff]  ;;  %v1786_v15 = vld [vmem:[#allocation6 + $0x2f8] sm:$0xff] }
 0x195   : > { %8720 = vmatprep.subr.bf16.mxu0 %v8719_v16 }
 0x197   : > { %7470 = vmatmul.mubr.f32.gmra.mrb[4].mxu0 %v10162_v45  ;;  %v8735_v45 = vpack.c.bf16 %v1784_v10, %v1783_v41  ;;  %v11523_v41 = vld [vmem:[#allocation25_spill] sm:$0xff]  ;;  %v11524_v10 = vld [vmem:[#allocation26_spill] sm:$0xff] }
 0x198   : > { %7472 = vmatprep.mubr.f32.mxu0 %v10165_v46  ;;  %8722 = vmatpush3.bf16.msra.mxu0 %v8719_v16  ;;  %v1785_v46 = vld [vmem:[#allocation6 + $0x2f0] sm:$0xff]  ;;  %v2081_v16 = vld [vmem:[#allocation6 + $0x318] sm:$0xff] }
 0x199   : > { %8724 = vmatprep.subr.bf16.mxu0 %v8723_v26  ;;  %v8747_v23 = vpack.c.bf16 %v2081_v16, %v2080_v20  ;;  %v11529_v20 = vld [vmem:[#allocation31_spill] sm:$0xff] }
 0x19b   : > { %7473 = vmatmul.mubr.f32.gmra.mrb[6].mxu0 %v10170_v50  ;;  %v8739_v50 = vpack.c.bf16 %v1786_v15, %v1785_v46  ;;  %v2086_v46 = vld [vmem:[#allocation6 + $0x340] sm:$0xff]  ;;  %v2087_v15 = vld [vmem:[#allocation6 + $0x348] sm:$0xff] }
 0x19c   : > { %7475 = vmatprep.mubr.f32.mxu0 %v10173_v51  ;;  %8726 = vmatpush3.bf16.msra.mxu0 %v8723_v26  ;;  %v2078_v51 = vld [vmem:[#allocation6 + $0x300] sm:$0xff] }
 0x19d   : > { %8728 = vmatprep.subr.bf16.mxu0 %v8727_v35  ;;  %v2082_v26 = vld [vmem:[#allocation6 + $0x320] sm:$0xff] }
 0x19e   : > { %v8751_v36 = vpack.c.bf16 %v2083_v31, %v2082_v26  ;;  %v11530_v26 = vld [vmem:[#allocation32_spill] sm:$0xff]  ;;  %v11531_v31 = vld [vmem:[#allocation33_spill] sm:$0xff] }
 0x19f   : > { %7476 = vmatmul.mubr.f32.gmra.mrb[8].mxu0 %v10178_v55  ;;  %v8743_v55 = vpack.c.bf16 %v2079_v18, %v2078_v51  ;;  %v11526_v51 = vld [vmem:[#allocation28_spill] sm:$0xff]  ;;  %v8759_v18 = vpack.c.bf16 %v2087_v15, %v2086_v46  ;;  %v11543_v15 = vld [vmem:[#allocation45_spill] sm:$0xff] }
 0x1a0   : > { %7478 = vmatprep.mubr.f32.mxu0 %v10181_v56  ;;  %8730 = vmatpush3.bf16.msra.mxu0 %v8727_v35  ;;  %v11511_v56 = vld [vmem:[#allocation13_spill] sm:$0xff]  ;;  %v11522_v35 = vld [vmem:[#allocation24_spill] sm:$0xff] }
 0x1a1   : > { %8732 = vmatprep.subr.bf16.mxu0 %v8731_v40  ;;  %v11542_v46 = vld [vmem:[#allocation44_spill] sm:$0xff] }
 0x1a3   : > { %7479 = vmatmul.mubr.f32.gmra.mrb[10].mxu0 %v10186_v60  ;;  %v11512_v60 = vld [vmem:[#allocation14_spill] sm:$0xff] }
 0x1a4   : > { %7481 = vmatprep.mubr.f32.mxu0 %v10189_v61  ;;  %8734 = vmatpush3.bf16.msra.mxu0 %v8731_v40  ;;  %v11513_v61 = vld [vmem:[#allocation15_spill] sm:$0xff]  ;;  %v2085_v40 = vld [vmem:[#allocation6 + $0x338] sm:$0xff] }
 0x1a5   : > { %8736 = vmatprep.subr.bf16.mxu0 %v8735_v45 }
 0x1a7   : > { %7482 = vmatmul.mubr.f32.gmra.mrb[12].mxu0 %v10194_v1  ;;  %v11514_v1 = vld [vmem:[#allocation16_spill] sm:$0xff] }
 0x1a8   : > { %7484 = vmatprep.mubr.f32.mxu0 %v10197_v2  ;;  %8738 = vmatpush3.bf16.msra.mxu0 %v8735_v45  ;;  %v11515_v2 = vld [vmem:[#allocation17_spill] sm:$0xff]  ;;  %v8755_v45 = vpack.c.bf16 %v2085_v40, %v2084_v27  ;;  %v11537_v27 = vld [vmem:[#allocation39_spill] sm:$0xff]  ;;  %v11538_v40 = vld [vmem:[#allocation40_spill] sm:$0xff] }
 0x1a9   : > { %8740 = vmatprep.subr.bf16.mxu0 %v8739_v50 }
 0x1ab   : > { %7485 = vmatmul.mubr.f32.gmra.mrb[14].mxu0 %v10202_v4  ;;  %v11516_v4 = vld [vmem:[#allocation18_spill] sm:$0xff] }
 0x1ac   : > { %7487 = vmatprep.mubr.f32.mxu0 %v10205_v5  ;;  %8742 = vmatpush3.bf16.msra.mxu0 %v8739_v50  ;;  %v11517_v5 = vld [vmem:[#allocation19_spill] sm:$0xff] }
 0x1ad   : > { %8744 = vmatprep.subr.bf16.mxu0 %v8743_v55  ;;  %v11525_v50 = vld [vmem:[#allocation27_spill] sm:$0xff] }
 0x1af   : > { %7488 = vmatmul.mubr.f32.gmra.mrb[16].mxu0 %v10210_v6  ;;  %v11518_v6 = vld [vmem:[#allocation20_spill] sm:$0xff] }
 0x1b0   : > { %7490 = vmatprep.mubr.f32.mxu0 %v10213_v7  ;;  %v10573_v7 = vld [vmem:[%s10129_s10 + $0x181] sm:$0xff] }
 0x1b3   : > { %7491 = vmatmul.mubr.f32.gmra.mrb[18].mxu0 %v10218_v8  ;;  %v11519_v8 = vld [vmem:[#allocation21_spill] sm:$0xff] }
 0x1b4   : > { %7493 = vmatprep.mubr.f32.mxu0 %v10221_v9  ;;  %v10578_v9 = vld [vmem:[%s10129_s10 + $0x189] sm:$0xff] }
 0x1b7   : > { %7494 = vmatmul.mubr.f32.gmra.mrb[20].mxu0 %v11511_v56  ;;  %v2089_v56 = vld [vmem:[#allocation6 + $0x358] sm:$0xff] }
 0x1b8   : > { %7496 = vmatprep.mubr.f32.mxu0 %v11512_v60  ;;  %v11527_v60 = vld [vmem:[#allocation29_spill] sm:$0xff] }
 0x1bb   : > { %7497 = vmatmul.mubr.f32.gmra.mrb[22].mxu0 %v11513_v61  ;;  %v11528_v61 = vld [vmem:[#allocation30_spill] sm:$0xff] }
 0x1bc   : > { %7499 = vmatprep.mubr.f32.mxu0 %v11514_v1 }
 0x1bf   : > { %7500 = vmatmul.mubr.f32.gmra.mrb[24].mxu0 %v11515_v2  ;;  %v2090_v2 = vld [vmem:[#allocation6 + $0x360] sm:$0xff] }
 0x1c0   : > { %7502 = vmatprep.mubr.f32.mxu0 %v11516_v4  ;;  %v2091_v4 = vld [vmem:[#allocation6 + $0x368] sm:$0xff] }
 0x1c3   : > { %7503 = vmatmul.mubr.f32.gmra.mrb[26].mxu0 %v11517_v5  ;;  %v8767_v5 = vpack.c.bf16 %v2091_v4, %v2090_v2  ;;  %v2388_v2 = vld [vmem:[#allocation6 + $0x3a0] sm:$0xff]  ;;  %v2389_v4 = vld [vmem:[#allocation6 + $0x3a8] sm:$0xff] }
 0x1c4   : > { %7505 = vmatprep.mubr.f32.mxu0 %v11518_v6  ;;  %v2092_v6 = vld [vmem:[#allocation6 + $0x370] sm:$0xff] }
 0x1c7   : > { %7506 = vmatmul.mubr.f32.gmra.mrb[28].mxu0 %v11519_v8  ;;  %v2093_v8 = vld [vmem:[#allocation6 + $0x378] sm:$0xff] }
 0x1c8   : > { %7508 = vmatprep.mubr.f32.mxu0 %v10573_v7  ;;  %v8771_v16 = vpack.c.bf16 %v2093_v8, %v2092_v6  ;;  %v2390_v6 = vld [vmem:[#allocation6 + $0x3b0] sm:$0xff]  ;;  %v2391_v8 = vld [vmem:[#allocation6 + $0x3b8] sm:$0xff] }
 0x1cb   : > { %7509 = vmatmul.mubr.f32.gmra.mrb[30].mxu0 %v10578_v9 }
 0x1cc   : > { %7543 = vmatprep.mubr.f32.mxu0 %v11520_v14  ;;  %v2384_v14 = vld [vmem:[#allocation6 + $0x380] sm:$0xff] }
 0x1cf   : > { %7544 = vmatmul.mubr.f32.vlgmr.msra.gmra.mrb[0].mxu0 %v11521_v21  ;;  %v11533_v21 = vld [vmem:[#allocation35_spill] sm:$0xff] }
 0x1d0   : > { %8746 = vmatpush3.bf16.msra.mxu0 %v8743_v55  ;;  %7546 = vmatprep.mubr.f32.mxu0 %v11522_v35  ;;  %v2088_v55 = vld [vmem:[#allocation6 + $0x350] sm:$0xff]  ;;  %v11535_v35 = vld [vmem:[#allocation37_spill] sm:$0xff] }
 0x1d1   : > { %8748 = vmatprep.subr.bf16.mxu0 %v8747_v23  ;;  %v8763_v1 = vpack.c.bf16 %v2089_v56, %v2088_v55  ;;  %v11546_v55 = vld [vmem:[#allocation48_spill] sm:$0xff] }
 0x1d2   : > { %v10616_v56 = vld [vmem:[%s10129_s10 + $0x18a] sm:$0xff] }
 0x1d3   : > { %7547 = vmatmul.mubr.f32.gmra.mrb[2].mxu0 %v11523_v41  ;;  %v11539_v41 = vld [vmem:[#allocation41_spill] sm:$0xff] }
 0x1d4   : > { %7549 = vmatprep.mubr.f32.mxu0 %v11524_v10  ;;  %8750 = vmatpush3.bf16.msra.mxu0 %v8747_v23  ;;  %v2385_v23 = vld [vmem:[#allocation6 + $0x388] sm:$0xff] }
 0x1d5   : > { %8752 = vmatprep.subr.bf16.mxu0 %v8751_v36  ;;  %v11540_v10 = vld [vmem:[#allocation42_spill] sm:$0xff] }
 0x1d7   : > { %7550 = vmatmul.mubr.f32.gmra.mrb[4].mxu0 %v11525_v50  ;;  %v11544_v50 = vld [vmem:[#allocation46_spill] sm:$0xff] }
 0x1d8   : > { %7552 = vmatprep.mubr.f32.mxu0 %v11526_v51  ;;  %8754 = vmatpush3.bf16.msra.mxu0 %v8751_v36  ;;  %v11536_v36 = vld [vmem:[#allocation38_spill] sm:$0xff]  ;;  %v11545_v51 = vld [vmem:[#allocation47_spill] sm:$0xff] }
 0x1d9   : > { %8756 = vmatprep.subr.bf16.mxu0 %v8755_v45 }
 0x1db   : > { %7553 = vmatmul.mubr.f32.gmra.mrb[6].mxu0 %v11527_v60  ;;  %v2386_v60 = vld [vmem:[#allocation6 + $0x390] sm:$0xff] }
 0x1dc   : > { %7555 = vmatprep.mubr.f32.mxu0 %v11528_v61  ;;  %8758 = vmatpush3.bf16.msra.mxu0 %v8755_v45  ;;  %v11541_v45 = vld [vmem:[#allocation43_spill] sm:$0xff]  ;;  %v2387_v61 = vld [vmem:[#allocation6 + $0x398] sm:$0xff] }
 0x1dd   : > { %8760 = vmatprep.subr.bf16.mxu0 %v8759_v18 }
 0x1df   : > { %7556 = vmatmul.mubr.f32.gmra.mrb[8].mxu0 %v10422_v17  ;;  %v8775_v17 = vpack.c.bf16 %v2385_v23, %v2384_v14  ;;  %v2395_v14 = vld [vmem:[#allocation6 + $0x3d8] sm:$0xff]  ;;  %v2397_v23 = vld [vmem:[#allocation6 + $0x3e8] sm:$0xff] }
 0x1e0   : > { %7558 = vmatprep.mubr.f32.mxu0 %v10425_v22  ;;  %8762 = vmatpush3.bf16.msra.mxu0 %v8759_v18  ;;  %v11532_v22 = vld [vmem:[#allocation34_spill] sm:$0xff] }
 0x1e1   : > { %8764 = vmatprep.subr.bf16.mxu0 %v8763_v1  ;;  %v10611_v18 = vld [vmem:[%s10129_s10 + $0x182] sm:$0xff] }
 0x1e3   : > { %7559 = vmatmul.mubr.f32.gmra.mrb[10].mxu0 %v10430_v12  ;;  %v11534_v12 = vld [vmem:[#allocation36_spill] sm:$0xff] }
 0x1e4   : > { %7561 = vmatprep.mubr.f32.mxu0 %v11529_v20  ;;  %8766 = vmatpush3.bf16.msra.mxu0 %v8763_v1  ;;  %v8779_v1 = vpack.c.bf16 %v2387_v61, %v2386_v60  ;;  %v8787_v20 = vpack.c.bf16 %v2391_v8, %v2390_v6  ;;  %v2700_v61 = vld [vmem:[#allocation6 + $0x450] sm:$0xff] }
 0x1e5   : > { %8768 = vmatprep.subr.bf16.mxu0 %v8767_v5  ;;  %v6184_v6 = vld [vmem:[%s10129_s10 + $0x99] sm:$0xff]  ;;  %v6185_v8 = vld [vmem:[%s10129_s10 + $0xa9] sm:$0xff] }
 0x1e7   : > { %7562 = vmatmul.mubr.f32.gmra.mrb[12].mxu0 %v11530_v26  ;;  %v2399_v26 = vld [vmem:[#allocation6 + $0x3f8] sm:$0xff] }
 0x1e8   : > { %7564 = vmatprep.mubr.f32.mxu0 %v11531_v31  ;;  %8770 = vmatpush3.bf16.msra.mxu0 %v8767_v5  ;;  %v8783_v5 = vpack.c.bf16 %v2389_v4, %v2388_v2  ;;  %v2691_v31 = vld [vmem:[#allocation6 + $0x408] sm:$0xff]  ;;  %v2701_v2 = vld [vmem:[#allocation6 + $0x458] sm:$0xff]  ;;  %v3197_v4 = vld [vmem:[#allocation8 + $0xd0] sm:$0xff] }
 0x1e9   : > { %8772 = vmatprep.subr.bf16.mxu0 %v8771_v16 }
 0x1eb   : > { %7565 = vmatmul.mubr.f32.gmra.mrb[14].mxu0 %v11532_v22  ;;  %v2696_v22 = vld [vmem:[#allocation6 + $0x430] sm:$0xff] }
 0x1ec   : > { %7567 = vmatprep.mubr.f32.mxu0 %v11533_v21  ;;  %8774 = vmatpush3.bf16.msra.mxu0 %v8771_v16  ;;  %v2393_v16 = vld [vmem:[#allocation6 + $0x3c8] sm:$0xff] }
 0x1ed   : > { %8776 = vmatprep.subr.bf16.mxu0 %v8775_v17 }
 0x1ef   : > { %7568 = vmatmul.mubr.f32.gmra.mrb[16].mxu0 %v11534_v12  ;;  %v2697_v12 = vld [vmem:[#allocation6 + $0x438] sm:$0xff] }
 0x1f0   : > { %7570 = vmatprep.mubr.f32.mxu0 %v11535_v35  ;;  %v3193_v35 = vld [vmem:[#allocation8 + $0xb0] sm:$0xff] }
 0x1f3   : > { %7571 = vmatmul.mubr.f32.gmra.mrb[18].mxu0 %v11536_v36  ;;  %v3194_v36 = vld [vmem:[#allocation8 + $0xb8] sm:$0xff] }
 0x1f4   : > { %7573 = vmatprep.mubr.f32.mxu0 %v11537_v27  ;;  %v6180_v27 = vld [vmem:[%s10129_s10 + $0x69] sm:$0xff] }
 0x1f7   : > { %7574 = vmatmul.mubr.f32.gmra.mrb[20].mxu0 %v11538_v40  ;;  %v6181_v40 = vld [vmem:[%s10129_s10 + $0x79] sm:$0xff] }
 0x1f8   : > { %7576 = vmatprep.mubr.f32.mxu0 %v11539_v41  ;;  %v8819_v41 = vpack.c.bf16 %v2697_v12, %v2696_v22  ;;  %v6219_v22 = vld [vmem:[%s10129_s10 + $0xc2] sm:$0xff]  ;;  %v6221_v12 = vld [vmem:[%s10129_s10 + $0xda] sm:$0xff] }
 0x1fb   : > { %7577 = vmatmul.mubr.f32.gmra.mrb[22].mxu0 %v11540_v10  ;;  %v2698_v10 = vld [vmem:[#allocation6 + $0x440] sm:$0xff] }
 0x1fc   : > { %7579 = vmatprep.mubr.f32.mxu0 %v11541_v45  ;;  %v8851_v45 = vpack.c.bf16 %v3194_v36, %v3193_v35  ;;  %v6222_v35 = vld [vmem:[%s10129_s10 + $0xe2] sm:$0xff]  ;;  %v6223_v36 = vld [vmem:[%s10129_s10 + $0xf2] sm:$0xff] }
 0x1ff   : > { %7580 = vmatmul.mubr.f32.gmra.mrb[24].mxu0 %v11542_v46  ;;  %v2699_v46 = vld [vmem:[#allocation6 + $0x448] sm:$0xff] }
 0x200   : > { %7582 = vmatprep.mubr.f32.mxu0 %v11543_v15  ;;  %v3195_v15 = vld [vmem:[#allocation8 + $0xc0] sm:$0xff]  ;;  %v8823_v60 = vpack.c.bf16 %v2699_v46, %v2698_v10 }
 0x201   : > { %v6227_v10 = vld [vmem:[%s10129_s10 + $0x122] sm:$0xff]  ;;  %v6229_v46 = vld [vmem:[%s10129_s10 + $0x13a] sm:$0xff] }
 0x203   : > { %7583 = vmatmul.mubr.f32.gmra.mrb[26].mxu0 %v11544_v50  ;;  %v3196_v50 = vld [vmem:[#allocation8 + $0xc8] sm:$0xff] }
 0x204   : > { %7585 = vmatprep.mubr.f32.mxu0 %v11545_v51  ;;  %v6182_v51 = vld [vmem:[%s10129_s10 + $0x81] sm:$0xff] }
 0x207   : > { %7586 = vmatmul.mubr.f32.gmra.mrb[28].mxu0 %v11546_v55  ;;  %v6183_v55 = vld [vmem:[%s10129_s10 + $0x91] sm:$0xff] }
 0x208   : > { %7588 = vmatprep.mubr.f32.mxu0 %v10611_v18 }
 0x20b   : > { %7589 = vmatmul.mubr.f32.gmra.mrb[30].mxu0 %v10616_v56 }
 0x20c   : > { %7623 = vmatprep.mubr.f32.mxu0 %v10271_v28  ;;  %v2392_v28 = vld [vmem:[#allocation6 + $0x3c0] sm:$0xff] }
 0x20f   : > { %7624 = vmatmul.mubr.f32.vlgmr.msra.gmra.mrb[0].mxu0 %v10276_v33  ;;  %v8791_v33 = vpack.c.bf16 %v2393_v16, %v2392_v28  ;;  %v2702_v16 = vld [vmem:[#allocation6 + $0x460] sm:$0xff] }
 0x210   : > { %8778 = vmatpush3.bf16.msra.mxu0 %v8775_v17  ;;  %7626 = vmatprep.mubr.f32.mxu0 %v10279_v34  ;;  %v2394_v34 = vld [vmem:[#allocation6 + $0x3d0] sm:$0xff] }
 0x211   : > { %8780 = vmatprep.subr.bf16.mxu0 %v8779_v1 }
 0x213   : > { %7627 = vmatmul.mubr.f32.gmra.mrb[2].mxu0 %v10284_v42  ;;  %v8795_v42 = vpack.c.bf16 %v2395_v14, %v2394_v34  ;;  %v6186_v34 = vld [vmem:[%s10129_s10 + $0xb1] sm:$0xff]  ;;  %v6187_v14 = vld [vmem:[%s10129_s10 + $0xc1] sm:$0xff] }
 0x214   : > { %7629 = vmatprep.mubr.f32.mxu0 %v10287_v43  ;;  %8782 = vmatpush3.bf16.msra.mxu0 %v8779_v1  ;;  %v2396_v43 = vld [vmem:[#allocation6 + $0x3e0] sm:$0xff]  ;;  %v8855_v1 = vpack.c.bf16 %v3196_v50, %v3195_v15 }
 0x215   : > { %8784 = vmatprep.subr.bf16.mxu0 %v8783_v5  ;;  %v6230_v15 = vld [vmem:[%s10129_s10 + $0x142] sm:$0xff]  ;;  %v6231_v50 = vld [vmem:[%s10129_s10 + $0x152] sm:$0xff] }
 0x217   : > { %7630 = vmatmul.mubr.f32.gmra.mrb[4].mxu0 %v10292_v49  ;;  %v8799_v49 = vpack.c.bf16 %v2397_v23, %v2396_v43  ;;  %v2704_v43 = vld [vmem:[#allocation6 + $0x470] sm:$0xff]  ;;  %v2705_v23 = vld [vmem:[#allocation6 + $0x478] sm:$0xff] }
 0x218   : > { %7632 = vmatprep.mubr.f32.mxu0 %v10295_v52  ;;  %8786 = vmatpush3.bf16.msra.mxu0 %v8783_v5  ;;  %v2398_v52 = vld [vmem:[#allocation6 + $0x3f0] sm:$0xff]  ;;  %v3198_v5 = vld [vmem:[#allocation8 + $0xd8] sm:$0xff] }
 0x219   : > { %8788 = vmatprep.subr.bf16.mxu0 %v8787_v20  ;;  %v8859_v28 = vpack.c.bf16 %v3198_v5, %v3197_v4  ;;  %v3200_v4 = vld [vmem:[#allocation8 + $0xe8] sm:$0xff] }
 0x21b   : > { %7633 = vmatmul.mubr.f32.gmra.mrb[6].mxu0 %v10300_v58  ;;  %v8803_v58 = vpack.c.bf16 %v2399_v26, %v2398_v52  ;;  %v6189_v52 = vld [vmem:[%s10129_s10 + $0xd9] sm:$0xff]  ;;  %v8835_v26 = vpack.c.bf16 %v2705_v23, %v2704_v43 }
 0x21c   : > { %7635 = vmatprep.mubr.f32.mxu0 %v10303_v59  ;;  %8790 = vmatpush3.bf16.msra.mxu0 %v8787_v20  ;;  %v2690_v59 = vld [vmem:[#allocation6 + $0x400] sm:$0xff]  ;;  %v8827_v20 = vpack.c.bf16 %v2701_v2, %v2700_v61 }
 0x21d   : > { %8792 = vmatprep.subr.bf16.mxu0 %v8791_v33  ;;  %v6237_v61 = vld [vmem:[%s10129_s10 + $0x19a] sm:$0xff] }
 0x21e   : > { %v3199_v2 = vld [vmem:[#allocation8 + $0xe0] sm:$0xff] }
 0x21f   : > { %7636 = vmatmul.mubr.f32.gmra.mrb[8].mxu0 %v10308_v3  ;;  %v8807_v3 = vpack.c.bf16 %v2691_v31, %v2690_v59  ;;  %v6191_v59 = vld [vmem:[%s10129_s10 + $0xf1] sm:$0xff]  ;;  %v6192_v31 = vld [vmem:[%s10129_s10 + $0xf9] sm:$0xff]  ;;  %v8863_v5 = vpack.c.bf16 %v3200_v4, %v3199_v2 }
 0x220   : > { %7638 = vmatprep.mubr.f32.mxu0 %v10311_v19  ;;  %8794 = vmatpush3.bf16.msra.mxu0 %v8791_v33  ;;  %v6173_v19 = vld [vmem:[%s10129_s10 + $0x198] sm:$0xff]  ;;  %v3142_v23 = vld [vmem:[#allocation8 + $0x20] sm:$0xff] }
 0x221   : > { %8796 = vmatprep.subr.bf16.mxu0 %v8795_v42  ;;  %v2703_v33 = vld [vmem:[#allocation6 + $0x468] sm:$0xff] }
 0x223   : > { %7639 = vmatmul.mubr.f32.gmra.mrb[10].mxu0 %v10316_v24  ;;  %v6174_v24 = vld [vmem:[%s10129_s10 + $0x1a0] sm:$0xff] }
 0x224   : > { %7641 = vmatprep.mubr.f32.mxu0 %v10319_v25  ;;  %8798 = vmatpush3.bf16.msra.mxu0 %v8795_v42  ;;  %v6175_v25 = vld [vmem:[%s10129_s10 + $0x31] sm:$0xff]  ;;  %v8831_v42 = vpack.c.bf16 %v2703_v33, %v2702_v16 }
 0x225   : > { %8800 = vmatprep.subr.bf16.mxu0 %v8799_v49  ;;  %v3138_v16 = vld [vmem:[#allocation8] sm:$0xff]  ;;  %v3139_v33 = vld [vmem:[#allocation8 + $0x8] sm:$0xff] }
 0x227   : > { %7642 = vmatmul.mubr.f32.gmra.mrb[12].mxu0 %v10324_v29  ;;  %v2692_v29 = vld [vmem:[#allocation6 + $0x410] sm:$0xff] }
 0x228   : > { %7644 = vmatprep.mubr.f32.mxu0 %v10327_v30  ;;  %8802 = vmatpush3.bf16.msra.mxu0 %v8799_v49  ;;  %v2693_v30 = vld [vmem:[#allocation6 + $0x418] sm:$0xff] }
 0x229   : > { %8804 = vmatprep.subr.bf16.mxu0 %v8803_v58  ;;  %v6188_v49 = vld [vmem:[%s10129_s10 + $0xc9] sm:$0xff] }
 0x22b   : > { %7645 = vmatmul.mubr.f32.gmra.mrb[14].mxu0 %v10332_v32  ;;  %v3187_v32 = vld [vmem:[#allocation8 + $0x80] sm:$0xff] }
 0x22c   : > { %7647 = vmatprep.mubr.f32.mxu0 %v10335_v37  ;;  %8806 = vmatpush3.bf16.msra.mxu0 %v8803_v58  ;;  %v3188_v37 = vld [vmem:[#allocation8 + $0x88] sm:$0xff] }
 0x22d   : > { %8808 = vmatprep.subr.bf16.mxu0 %v8807_v3  ;;  %v6190_v58 = vld [vmem:[%s10129_s10 + $0xe1] sm:$0xff] }
 0x22f   : > { %7648 = vmatmul.mubr.f32.gmra.mrb[16].mxu0 %v10340_v38  ;;  %v3189_v38 = vld [vmem:[#allocation8 + $0x90] sm:$0xff] }
 0x230   : > { %7650 = vmatprep.mubr.f32.mxu0 %v10343_v39  ;;  %v6176_v39 = vld [vmem:[%s10129_s10 + $0x39] sm:$0xff] }
 0x233   : > { %7651 = vmatmul.mubr.f32.gmra.mrb[18].mxu0 %v10348_v44  ;;  %v8839_v44 = vpack.c.bf16 %v3188_v37, %v3187_v32  ;;  %v6199_v32 = vld [vmem:[%s10129_s10 + $0x151] sm:$0xff]  ;;  %v6200_v37 = vld [vmem:[%s10129_s10 + $0x159] sm:$0xff] }
 0x234   : > { %7653 = vmatprep.mubr.f32.mxu0 %v10351_v47  ;;  %v3190_v47 = vld [vmem:[#allocation8 + $0x98] sm:$0xff] }
 0x235   : > { %8840 = vmatprep.subr.bf16.mxu1 %v8839_v44 }
 0x236   : > { %8842 = vmatpush3.bf16.msra.mxu1 %v8839_v44  ;;  %v6205_v44 = vld [vmem:[%s10129_s10 + $0x199] sm:$0xff] }
 0x237   : > { %7654 = vmatmul.mubr.f32.gmra.mrb[20].mxu0 %v10356_v48  ;;  %v6177_v48 = vld [vmem:[%s10129_s10 + $0x49] sm:$0xff] }
 0x238   : > { %7656 = vmatprep.mubr.f32.mxu0 %v10359_v53  ;;  %v8811_v53 = vpack.c.bf16 %v2693_v30, %v2692_v29  ;;  %v6197_v29 = vld [vmem:[%s10129_s10 + $0x139] sm:$0xff]  ;;  %v6198_v30 = vld [vmem:[%s10129_s10 + $0x141] sm:$0xff] }
 0x23b   : > { %7657 = vmatmul.mubr.f32.gmra.mrb[22].mxu0 %v10364_v54  ;;  %v2694_v54 = vld [vmem:[#allocation6 + $0x420] sm:$0xff] }
 0x23c   : > { %7659 = vmatprep.mubr.f32.mxu0 %v10367_v57  ;;  %v8843_v57 = vpack.c.bf16 %v3190_v47, %v3189_v38  ;;  %v6201_v38 = vld [vmem:[%s10129_s10 + $0x169] sm:$0xff]  ;;  %v6206_v47 = vld [vmem:[%s10129_s10 + $0x1a1] sm:$0xff] }
 0x23e   : > { %8844 = vmatprep.subr.bf16.mxu1 %v8843_v57 }
 0x23f   : > { %7660 = vmatmul.mubr.f32.gmra.mrb[24].mxu0 %v10372_v62  ;;  %v2695_v62 = vld [vmem:[#allocation6 + $0x428] sm:$0xff]  ;;  %8846 = vmatpush3.bf16.msra.mxu1 %v8843_v57 }
 0x240   : > { %7662 = vmatprep.mubr.f32.mxu0 %v10375_v63  ;;  %v3191_v63 = vld [vmem:[#allocation8 + $0xa0] sm:$0xff]  ;;  %v8815_v17 = vpack.c.bf16 %v2695_v62, %v2694_v54 }
 0x241   : > { %v6209_v54 = vld [vmem:[%s10129_s10 + $0x4a] sm:$0xff]  ;;  %v6210_v57 = vld [vmem:[%s10129_s10 + $0x52] sm:$0xff]  ;;  %v6213_v62 = vld [vmem:[%s10129_s10 + $0x7a] sm:$0xff] }
 0x243   : > { %7663 = vmatmul.mubr.f32.gmra.mrb[26].mxu0 %v10380_v0  ;;  %v3192_v0 = vld [vmem:[#allocation8 + $0xa8] sm:$0xff] }
 0x244   : > { %7665 = vmatprep.mubr.f32.mxu0 %v10535_v11  ;;  %v6178_v11 = vld [vmem:[%s10129_s10 + $0x51] sm:$0xff]  ;;  %v8847_v21 = vpack.c.bf16 %v3192_v0, %v3191_v63  ;;  %v6214_v63 = vld [vmem:[%s10129_s10 + $0x82] sm:$0xff] }
 0x245   : > { %v6215_v0 = vld [vmem:[%s10129_s10 + $0x92] sm:$0xff] }
 0x246   : > { %8848 = vmatprep.subr.bf16.mxu1 %v8847_v21 }
 0x247   : > { %7666 = vmatmul.mubr.f32.gmra.mrb[28].mxu0 %v10540_v13  ;;  %v6179_v13 = vld [vmem:[%s10129_s10 + $0x61] sm:$0xff]  ;;  %8850 = vmatpush3.bf16.msra.mxu1 %v8847_v21  ;;  %v6220_v21 = vld [vmem:[%s10129_s10 + $0xca] sm:$0xff] }
 0x248   : > { %7668 = vmatprep.mubr.f32.mxu0 %v6173_v19  ;;  %8852 = vmatprep.subr.bf16.mxu1 %v8851_v45  ;;  %v6194_v19 = vld [vmem:[%s10129_s10 + $0x111] sm:$0xff] }
 0x24b   : > { %7669 = vmatmul.mubr.f32.gmra.mrb[30].mxu0 %v6174_v24  ;;  %8854 = vmatpush3.bf16.msra.mxu1 %v8851_v45  ;;  %v6195_v24 = vld [vmem:[%s10129_s10 + $0x121] sm:$0xff]  ;;  %v6228_v45 = vld [vmem:[%s10129_s10 + $0x12a] sm:$0xff] }
 0x24c   : > { %7703 = vmatprep.mubr.f32.mxu0 %v6175_v25  ;;  %8856 = vmatprep.subr.bf16.mxu1 %v8855_v1  ;;  %v6196_v25 = vld [vmem:[%s10129_s10 + $0x129] sm:$0xff] }
 0x24f   : > { %7704 = vmatmul.mubr.f32.vlgmr.msra.gmra.mrb[0].mxu0 %v6176_v39  ;;  %8858 = vmatpush3.bf16.msra.mxu1 %v8855_v1  ;;  %v6202_v39 = vld [vmem:[%s10129_s10 + $0x171] sm:$0xff]  ;;  %v6238_v1 = vld [vmem:[%s10129_s10 + $0x1a2] sm:$0xff] }
 0x250   : > { %8810 = vmatpush3.bf16.msra.mxu0 %v8807_v3  ;;  %7706 = vmatprep.mubr.f32.mxu0 %v6177_v48  ;;  %v6193_v3 = vld [vmem:[%s10129_s10 + $0x109] sm:$0xff]  ;;  %v6207_v48 = vld [vmem:[%s10129_s10 + $0x32] sm:$0xff] }
 0x251   : > { %8812 = vmatprep.subr.bf16.mxu0 %v8811_v53  ;;  %8860 = vmatprep.subr.bf16.mxu1 %v8859_v28 }
 0x253   : > { %7707 = vmatmul.mubr.f32.gmra.mrb[2].mxu0 %v6178_v11  ;;  %8862 = vmatpush3.bf16.msra.mxu1 %v8859_v28  ;;  %v6216_v11 = vld [vmem:[%s10129_s10 + $0x9a] sm:$0xff] }
 0x254   : > { %7709 = vmatprep.mubr.f32.mxu0 %v6179_v13  ;;  %8814 = vmatpush3.bf16.msra.mxu0 %v8811_v53  ;;  %v6208_v53 = vld [vmem:[%s10129_s10 + $0x3a] sm:$0xff]  ;;  %v6217_v13 = vld [vmem:[%s10129_s10 + $0xaa] sm:$0xff] }
 0x255   : > { %8816 = vmatprep.subr.bf16.mxu0 %v8815_v17  ;;  %8864 = vmatprep.subr.bf16.mxu1 %v8863_v5 }
 0x257   : > { %7710 = vmatmul.mubr.f32.gmra.mrb[4].mxu0 %v6180_v27  ;;  %v6224_v27 = vld [vmem:[%s10129_s10 + $0xfa] sm:$0xff]  ;;  %8866 = vmatpush3.bf16.msra.mxu1 %v8863_v5 }
 0x258   : > { %7712 = vmatprep.mubr.f32.mxu0 %v6181_v40  ;;  %8818 = vmatpush3.bf16.msra.mxu0 %v8815_v17  ;;  %v6218_v17 = vld [vmem:[%s10129_s10 + $0xb2] sm:$0xff]  ;;  %v6225_v40 = vld [vmem:[%s10129_s10 + $0x10a] sm:$0xff] }
 0x259   : > { %8820 = vmatprep.subr.bf16.mxu0 %v8819_v41 }
 0x25b   : > { %7713 = vmatmul.mubr.f32.gmra.mrb[6].mxu0 %v6182_v51  ;;  %v6232_v51 = vld [vmem:[%s10129_s10 + $0x15a] sm:$0xff] }
 0x25c   : > { %7715 = vmatprep.mubr.f32.mxu0 %v6183_v55  ;;  %8822 = vmatpush3.bf16.msra.mxu0 %v8819_v41  ;;  %v6226_v41 = vld [vmem:[%s10129_s10 + $0x112] sm:$0xff]  ;;  %v6233_v55 = vld [vmem:[%s10129_s10 + $0x16a] sm:$0xff] }
 0x25d   : > { %8824 = vmatprep.subr.bf16.mxu0 %v8823_v60 }
 0x25f   : > { %7716 = vmatmul.mubr.f32.gmra.mrb[8].mxu0 %v6184_v6  ;;  %v9910_v6 = vmov 0.0  }
 0x260   : > { %7718 = vmatprep.mubr.f32.mxu0 %v6185_v8  ;;  %8826 = vmatpush3.bf16.msra.mxu0 %v8823_v60  ;;  %v6234_v60 = vld [vmem:[%s10129_s10 + $0x172] sm:$0xff]  ;;  %3034 = vst [vmem:[#allocation2] sm:$0xff] %v9910_v6  ;;  %3035 = vst [vmem:[#allocation2 + $0x8] sm:$0xff] %v9910_v6 }
 0x261   : > { %8828 = vmatprep.subr.bf16.mxu0 %v8827_v20  ;;  %3036 = vst [vmem:[#allocation2 + $0x10] sm:$0xff] %v9910_v6  ;;  %3038 = vst [vmem:[#allocation2 + $0x198] sm:$0xff] %v9910_v6 }
 0x262   : > { %3039 = vst [vmem:[#allocation2 + $0x1a0] sm:$0xff] %v9910_v6  ;;  %3040 = vst [vmem:[#allocation2 + $0x1a8] sm:$0xff] %v9910_v6 }
 0x263   : > { %7719 = vmatmul.mubr.f32.gmra.mrb[10].mxu0 %v6186_v34  ;;  %3042 = vst [vmem:[#allocation2 + $0x18] sm:$0x1] %v9910_v6  ;;  %3043 = vst [vmem:[#allocation2 + $0x30] sm:$0x1] %v9910_v6  ;;  %v8871_v34 = vpack.c.bf16 %v3139_v33, %v3138_v16 }
 0x264   : > { %7721 = vmatprep.mubr.f32.mxu0 %v6187_v14  ;;  %8830 = vmatpush3.bf16.msra.mxu0 %v8827_v20  ;;  %3044 = vst [vmem:[#allocation2 + $0x48] sm:$0x1] %v9910_v6  ;;  %3045 = vst [vmem:[#allocation2 + $0x60] sm:$0x1] %v9910_v6  ;;  %v3140_v14 = vld [vmem:[#allocation8 + $0x10] sm:$0xff] }
 0x265   : > { %8832 = vmatprep.subr.bf16.mxu0 %v8831_v42  ;;  %3046 = vst [vmem:[#allocation2 + $0x78] sm:$0x1] %v9910_v6  ;;  %3047 = vst [vmem:[#allocation2 + $0x90] sm:$0x1] %v9910_v6 }
 0x266   : > { %3048 = vst [vmem:[#allocation2 + $0xa8] sm:$0x1] %v9910_v6  ;;  %3049 = vst [vmem:[#allocation2 + $0xc0] sm:$0x1] %v9910_v6 }
 0x267   : > { %7722 = vmatmul.mubr.f32.gmra.mrb[12].mxu0 %v6188_v49  ;;  %3050 = vst [vmem:[#allocation2 + $0xd8] sm:$0x1] %v9910_v6  ;;  %3051 = vst [vmem:[#allocation2 + $0xf0] sm:$0x1] %v9910_v6  ;;  %v3154_v20 = vld [vmem:[#allocation2 + $0x1] sm:$0xff]  ;;  %v3143_v49 = vld [vmem:[#allocation8 + $0x28] sm:$0xff] }
 0x268   : > { %7724 = vmatprep.mubr.f32.mxu0 %v6189_v52  ;;  %8834 = vmatpush3.bf16.msra.mxu0 %v8831_v42  ;;  %3052 = vst [vmem:[#allocation2 + $0x108] sm:$0x1] %v9910_v6  ;;  %3053 = vst [vmem:[#allocation2 + $0x120] sm:$0x1] %v9910_v6  ;;  %v3155_v28 = vld [vmem:[#allocation2 + $0x9] sm:$0xff]  ;;  %v8879_v52 = vpack.c.bf16 %v3143_v49, %v3142_v23 }
 0x269   : > { %8836 = vmatprep.subr.bf16.mxu0 %v8835_v26  ;;  %3054 = vst [vmem:[#allocation2 + $0x138] sm:$0x1] %v9910_v6  ;;  %3055 = vst [vmem:[#allocation2 + $0x150] sm:$0x1] %v9910_v6  ;;  %7863 = vmatprep.mubr.f32.mxu1 %v3154_v20  ;;  %v3141_v42 = vld [vmem:[#allocation8 + $0x18] sm:$0xff] }
 0x26a   : > { %3056 = vst [vmem:[#allocation2 + $0x168] sm:$0x1] %v9910_v6  ;;  %3057 = vst [vmem:[#allocation2 + $0x180] sm:$0x1] %v9910_v6  ;;  %v8875_v43 = vpack.c.bf16 %v3141_v42, %v3140_v14 }
 0x26b   : > { %7725 = vmatmul.mubr.f32.gmra.mrb[14].mxu0 %v6190_v58  ;;  %3058 = vst [vmem:[#allocation2 + $0x29] sm:$0x1] %v9910_v6  ;;  %3059 = vst [vmem:[#allocation2 + $0x41] sm:$0x1] %v9910_v6  ;;  %v3145_v58 = vld [vmem:[#allocation8 + $0x38] sm:$0xff] }
 0x26c   : > { %7727 = vmatprep.mubr.f32.mxu0 %v6191_v59  ;;  %8838 = vmatpush3.bf16.msra.mxu0 %v8835_v26  ;;  %3060 = vst [vmem:[#allocation2 + $0x59] sm:$0x1] %v9910_v6  ;;  %3061 = vst [vmem:[#allocation2 + $0x71] sm:$0x1] %v9910_v6  ;;  %v3144_v26 = vld [vmem:[#allocation8 + $0x30] sm:$0xff] }
 0x26d   : > { %3062 = vst [vmem:[#allocation2 + $0x89] sm:$0x1] %v9910_v6  ;;  %3063 = vst [vmem:[#allocation2 + $0xa1] sm:$0x1] %v9910_v6  ;;  %v8883_v59 = vpack.c.bf16 %v3145_v58, %v3144_v26 }
 0x26e   : > { %3064 = vst [vmem:[#allocation2 + $0xb9] sm:$0x1] %v9910_v6  ;;  %3065 = vst [vmem:[#allocation2 + $0xd1] sm:$0x1] %v9910_v6 }
 0x26f   : > { %7728 = vmatmul.mubr.f32.gmra.mrb[16].mxu0 %v6192_v31  ;;  %3066 = vst [vmem:[#allocation2 + $0xe9] sm:$0x1] %v9910_v6  ;;  %3067 = vst [vmem:[#allocation2 + $0x101] sm:$0x1] %v9910_v6  ;;  %v3146_v31 = vld [vmem:[#allocation8 + $0x40] sm:$0xff] }
 0x270   : > { %7730 = vmatprep.mubr.f32.mxu0 %v6193_v3  ;;  %3068 = vst [vmem:[#allocation2 + $0x119] sm:$0x1] %v9910_v6  ;;  %3069 = vst [vmem:[#allocation2 + $0x131] sm:$0x1] %v9910_v6  ;;  %v3147_v3 = vld [vmem:[#allocation8 + $0x48] sm:$0xff] }
 0x271   : > { %3070 = vst [vmem:[#allocation2 + $0x149] sm:$0x1] %v9910_v6  ;;  %3071 = vst [vmem:[#allocation2 + $0x161] sm:$0x1] %v9910_v6 }
 0x272   : > { %3072 = vst [vmem:[#allocation2 + $0x179] sm:$0x1] %v9910_v6  ;;  %3073 = vst [vmem:[#allocation2 + $0x191] sm:$0x1] %v9910_v6 }
 0x273   : > { %7731 = vmatmul.mubr.f32.gmra.mrb[18].mxu0 %v6194_v19  ;;  %v8887_v19 = vpack.c.bf16 %v3147_v3, %v3146_v31 }
 0x274   : > { %7733 = vmatprep.mubr.f32.mxu0 %v6195_v24  ;;  %v3148_v24 = vld [vmem:[#allocation8 + $0x50] sm:$0xff] }
 0x277   : > { %7734 = vmatmul.mubr.f32.gmra.mrb[20].mxu0 %v6196_v25  ;;  %v3149_v25 = vld [vmem:[#allocation8 + $0x58] sm:$0xff] }
 0x278   : > { %7736 = vmatprep.mubr.f32.mxu0 %v6197_v29  ;;  %v8891_v29 = vpack.c.bf16 %v3149_v25, %v3148_v24 }
 0x27b   : > { %7737 = vmatmul.mubr.f32.gmra.mrb[22].mxu0 %v6198_v30  ;;  %v3150_v30 = vld [vmem:[#allocation8 + $0x60] sm:$0xff] }
 0x27c   : > { %7739 = vmatprep.mubr.f32.mxu0 %v6199_v32  ;;  %v3151_v32 = vld [vmem:[#allocation8 + $0x68] sm:$0xff] }
 0x27f   : > { %7740 = vmatmul.mubr.f32.gmra.mrb[24].mxu0 %v6200_v37  ;;  %v8895_v37 = vpack.c.bf16 %v3151_v32, %v3150_v30 }
 0x280   : > { %7742 = vmatprep.mubr.f32.mxu0 %v6201_v38  ;;  %v3152_v38 = vld [vmem:[#allocation8 + $0x70] sm:$0xff] }
 0x283   : > { %7743 = vmatmul.mubr.f32.gmra.mrb[26].mxu0 %v6202_v39  ;;  %v3153_v39 = vld [vmem:[#allocation8 + $0x78] sm:$0xff] }
 0x284   : > { %7745 = vmatprep.mubr.f32.mxu0 %v10573_v7  ;;  %v6211_v7 = vld [vmem:[%s10129_s10 + $0x62] sm:$0xff] }
 0x287   : > { %7746 = vmatmul.mubr.f32.gmra.mrb[28].mxu0 %v10578_v9  ;;  %v6212_v9 = vld [vmem:[%s10129_s10 + $0x6a] sm:$0xff] }
 0x288   : > { %7748 = vmatprep.mubr.f32.mxu0 %v6205_v44  ;;  %v8899_v44 = vpack.c.bf16 %v3153_v39, %v3152_v38 }
 0x28b   : > { %7749 = vmatmul.mubr.f32.gmra.mrb[30].mxu0 %v6206_v47  ;;  %v3686_v47 = vld [vmem:[#allocation8 + $0x100] sm:$0xff] }
 0x28c   : > { %7783 = vmatprep.mubr.f32.mxu0 %v6207_v48  ;;  %v3687_v48 = vld [vmem:[#allocation8 + $0x108] sm:$0xff] }
 0x28f   : > { %7784 = vmatmul.mubr.f32.vlgmr.msra.gmra.mrb[0].mxu0 %v6208_v53  ;;  %v10753_v53 = vpack.c.bf16 %v3687_v48, %v3686_v47 }
 0x290   : > { %7786 = vmatprep.mubr.f32.mxu0 %v6209_v54  ;;  %v10759_v54 = vld [vmem:[%s11383_s3] ss:$0 sm:$0xff] }
 0x293   : > { %7787 = vmatmul.mubr.f32.gmra.mrb[2].mxu0 %v6210_v57 }
 0x294   : > { %7789 = vmatprep.mubr.f32.mxu0 %v6211_v7 }
 0x297   : > { %7790 = vmatmul.mubr.f32.gmra.mrb[4].mxu0 %v6212_v9 }
 0x298   : > { %7792 = vmatprep.mubr.f32.mxu0 %v6213_v62 }
 0x29b   : > { %7793 = vmatmul.mubr.f32.gmra.mrb[6].mxu0 %v6214_v63 }
 0x29c   : > { %7795 = vmatprep.mubr.f32.mxu0 %v6215_v0 }
 0x29f   : > { %7796 = vmatmul.mubr.f32.gmra.mrb[8].mxu0 %v6216_v11 }
 0x2a0   : > { %7798 = vmatprep.mubr.f32.mxu0 %v6217_v13 }
 0x2a3   : > { %7799 = vmatmul.mubr.f32.gmra.mrb[10].mxu0 %v6218_v17 }
 0x2a4   : > { %7801 = vmatprep.mubr.f32.mxu0 %v6219_v22 }
 0x2a7   : > { %7802 = vmatmul.mubr.f32.gmra.mrb[12].mxu0 %v6220_v21 }
 0x2a8   : > { %7804 = vmatprep.mubr.f32.mxu0 %v6221_v12 }
 0x2ab   : > { %7805 = vmatmul.mubr.f32.gmra.mrb[14].mxu0 %v6222_v35 }
 0x2ac   : > { %7807 = vmatprep.mubr.f32.mxu0 %v6223_v36 }
 0x2af   : > { %7808 = vmatmul.mubr.f32.gmra.mrb[16].mxu0 %v6224_v27 }
 0x2b0   : > { %7810 = vmatprep.mubr.f32.mxu0 %v6225_v40 }
 0x2b3   : > { %7811 = vmatmul.mubr.f32.gmra.mrb[18].mxu0 %v6226_v41 }
 0x2b4   : > { %7813 = vmatprep.mubr.f32.mxu0 %v6227_v10 }
 0x2b7   : > { %7814 = vmatmul.mubr.f32.gmra.mrb[20].mxu0 %v6228_v45 }
 0x2b8   : > { %7816 = vmatprep.mubr.f32.mxu0 %v6229_v46 }
 0x2bb   : > { %7817 = vmatmul.mubr.f32.gmra.mrb[22].mxu0 %v6230_v15 }
 0x2bc   : > { %7819 = vmatprep.mubr.f32.mxu0 %v6231_v50 }
 0x2bf   : > { %7820 = vmatmul.mubr.f32.gmra.mrb[24].mxu0 %v6232_v51 }
 0x2c0   : > { %7822 = vmatprep.mubr.f32.mxu0 %v6233_v55 }
 0x2c3   : > { %7823 = vmatmul.mubr.f32.gmra.mrb[26].mxu0 %v6234_v60 }
 0x2c4   : > { %7825 = vmatprep.mubr.f32.mxu0 %v10611_v18  ;;  %v3201_v18 = vld [vmem:[#allocation8 + $0xf0] sm:$0xff] }
 0x2c7   : > { %7826 = vmatmul.mubr.f32.gmra.mrb[28].mxu0 %v10616_v56  ;;  %v3202_v56 = vld [vmem:[#allocation8 + $0xf8] sm:$0xff] }
 0x2c8   : > { %7828 = vmatprep.mubr.f32.mxu0 %v6237_v61  ;;  %v8867_v8 = vpack.c.bf16 %v3202_v56, %v3201_v18 }
 0x2ca   : > { %8868 = vmatprep.subr.bf16.mxu1 %v8867_v8 }
 0x2cb   : > { %7829 = vmatmul.mubr.f32.gmra.mrb[30].mxu0 %v6238_v1  ;;  %8870 = vmatpush3.bf16.msra.mxu1 %v8867_v8 }
 0x2cc   : > { %8872 = vmatprep.subr.bf16.mxu1 %v8871_v34 }
 0x2ce   : > { %7864 = vmatmul.mubr.f32.vlgmr.msra.gmra.mrb[0].mxu1 %v3155_v28 }
 0x2cf   : > { %8874 = vmatpush3.bf16.msra.mxu1 %v8871_v34 }
 0x2d0   : > { %8876 = vmatprep.subr.bf16.mxu1 %v8875_v43 }
 0x2d3   : > { %8878 = vmatpush3.bf16.msra.mxu1 %v8875_v43 }
 0x2d4   : > { %8880 = vmatprep.subr.bf16.mxu1 %v8879_v52 }
 0x2d7   : > { %8882 = vmatpush3.bf16.msra.mxu1 %v8879_v52 }
 0x2d8   : > { %8884 = vmatprep.subr.bf16.mxu1 %v8883_v59 }
 0x2db   : > { %8886 = vmatpush3.bf16.msra.mxu1 %v8883_v59 }
 0x2dc   : > { %8888 = vmatprep.subr.bf16.mxu1 %v8887_v19 }
 0x2df   : > { %8890 = vmatpush3.bf16.msra.mxu1 %v8887_v19 }
 0x2e0   : > { %8892 = vmatprep.subr.bf16.mxu1 %v8891_v29 }
 0x2e3   : > { %8894 = vmatpush3.bf16.msra.mxu1 %v8891_v29 }
 0x2e4   : > { %8896 = vmatprep.subr.bf16.mxu1 %v8895_v37 }
 0x2e7   : > { %8898 = vmatpush3.bf16.msra.mxu1 %v8895_v37 }
 0x2e8   : > { %8900 = vmatprep.subr.bf16.mxu1 %v8899_v44 }
 0x2eb   : > { %8902 = vmatpush3.bf16.msra.mxu1 %v8899_v44 }
 0x2ec   : > { %8904 = vmatprep.subr.bf16.mxu1 %v10753_v53 }
 0x362   : > { %v7785_v57 = vpop.f32.mrb[0].mxu0 }
 0x363   : > { %v2971_v7 = vadd.f32 %v7785_v57, %v10759_v54  ;;  %v2772_v9 = vpop.f32.mrb[1].mxu0 }
 0x364   : > { %v2970_v62 = vadd.f32 %v10759_v54, %v2772_v9 }
 0x365   : > { %v3003_v63 = vmax.f32 %v2971_v7, 0.0 }
 0x366   : > { %v3002_v0 = vmax.f32 %v2970_v62, 0.0  ;;  %v7788_v11 = vpop.f32.mrb[2].mxu0 }
 0x367   : > { %3075 = vst [vmem:[#allocation2 + $0x21] sm:$0xff] %v3003_v63  ;;  %v2973_v13 = vadd.f32 %v7788_v11, %v10759_v54  ;;  %v2782_v17 = vpop.f32.mrb[3].mxu0 }
 0x368   : > { %3074 = vst [vmem:[#allocation2 + $0x19] sm:$0xff] %v3002_v0  ;;  %v2972_v22 = vadd.f32 %v10759_v54, %v2782_v17  ;;  %7866 = vmatprep.mubr.f32.mxu1 %v3002_v0 }
 0x369   : > { %v3005_v21 = vmax.f32 %v2973_v13, 0.0  ;;  %7867 = vmatmul.mubr.f32.gmra.mrb[2].mxu1 %v3003_v63 }
 0x36a   : > { %v3004_v12 = vmax.f32 %v2972_v22, 0.0  ;;  %v7791_v35 = vpop.f32.mrb[4].mxu0 }
 0x36b   : > { %3077 = vst [vmem:[#allocation2 + $0x39] sm:$0xff] %v3005_v21  ;;  %v2975_v36 = vadd.f32 %v7791_v35, %v10759_v54  ;;  %v2792_v27 = vpop.f32.mrb[5].mxu0 }
 0x36c   : > { %3076 = vst [vmem:[#allocation2 + $0x31] sm:$0xff] %v3004_v12  ;;  %v2974_v40 = vadd.f32 %v10759_v54, %v2792_v27  ;;  %7869 = vmatprep.mubr.f32.mxu1 %v3004_v12 }
 0x36d   : > { %v3007_v41 = vmax.f32 %v2975_v36, 0.0  ;;  %7870 = vmatmul.mubr.f32.gmra.mrb[4].mxu1 %v3005_v21 }
 0x36e   : > { %v3006_v10 = vmax.f32 %v2974_v40, 0.0  ;;  %v7794_v45 = vpop.f32.mrb[6].mxu0 }
 0x36f   : > { %3079 = vst [vmem:[#allocation2 + $0x51] sm:$0xff] %v3007_v41  ;;  %v2977_v46 = vadd.f32 %v7794_v45, %v10759_v54  ;;  %v2802_v15 = vpop.f32.mrb[7].mxu0 }
 0x370   : > { %3078 = vst [vmem:[#allocation2 + $0x49] sm:$0xff] %v3006_v10  ;;  %v2976_v50 = vadd.f32 %v10759_v54, %v2802_v15  ;;  %7872 = vmatprep.mubr.f32.mxu1 %v3006_v10 }
 0x371   : > { %v3009_v51 = vmax.f32 %v2977_v46, 0.0  ;;  %7873 = vmatmul.mubr.f32.gmra.mrb[6].mxu1 %v3007_v41 }
 0x372   : > { %v3008_v55 = vmax.f32 %v2976_v50, 0.0  ;;  %v7797_v60 = vpop.f32.mrb[8].mxu0 }
 0x373   : > { %3081 = vst [vmem:[#allocation2 + $0x69] sm:$0xff] %v3009_v51  ;;  %v2979_v61 = vadd.f32 %v7797_v60, %v10759_v54  ;;  %v2812_v1 = vpop.f32.mrb[9].mxu0 }
 0x374   : > { %3080 = vst [vmem:[#allocation2 + $0x61] sm:$0xff] %v3008_v55  ;;  %v2978_v2 = vadd.f32 %v10759_v54, %v2812_v1  ;;  %7875 = vmatprep.mubr.f32.mxu1 %v3008_v55 }
 0x375   : > { %v3011_v4 = vmax.f32 %v2979_v61, 0.0  ;;  %7876 = vmatmul.mubr.f32.gmra.mrb[8].mxu1 %v3009_v51 }
 0x376   : > { %v3010_v5 = vmax.f32 %v2978_v2, 0.0  ;;  %v7800_v18 = vpop.f32.mrb[10].mxu0 }
 0x377   : > { %3083 = vst [vmem:[#allocation2 + $0x81] sm:$0xff] %v3011_v4  ;;  %v2981_v56 = vadd.f32 %v7800_v18, %v10759_v54  ;;  %v2822_v8 = vpop.f32.mrb[11].mxu0 }
 0x378   : > { %3082 = vst [vmem:[#allocation2 + $0x79] sm:$0xff] %v3010_v5  ;;  %v2980_v20 = vadd.f32 %v10759_v54, %v2822_v8  ;;  %7878 = vmatprep.mubr.f32.mxu1 %v3010_v5 }
 0x379   : > { %v3013_v28 = vmax.f32 %v2981_v56, 0.0  ;;  %7879 = vmatmul.mubr.f32.gmra.mrb[10].mxu1 %v3011_v4 }
 0x37a   : > { %v10773_v16 = vmax.f32 %v2980_v20, 0.0  ;;  %v7803_v33 = vpop.f32.mrb[12].mxu0  ;;  %v3688_v20 = vld [vmem:[#allocation8 + $0x110] sm:$0xff] }
 0x37b   : > { %3085 = vst [vmem:[#allocation2 + $0x99] sm:$0xff] %v3013_v28  ;;  %v2983_v34 = vadd.f32 %v7803_v33, %v10759_v54  ;;  %v2832_v14 = vpop.f32.mrb[13].mxu0 }
 0x37c   : > { %3084 = vst [vmem:[#allocation2 + $0x91] sm:$0xff] %v10773_v16  ;;  %v2982_v42 = vadd.f32 %v10759_v54, %v2832_v14  ;;  %7881 = vmatprep.mubr.f32.mxu1 %v10773_v16 }
 0x37d   : > { %v10779_v43 = vmax.f32 %v2983_v34, 0.0  ;;  %7882 = vmatmul.mubr.f32.gmra.mrb[12].mxu1 %v3013_v28  ;;  %v3689_v28 = vld [vmem:[#allocation8 + $0x118] sm:$0xff] }
 0x37e   : > { %v10781_v23 = vmax.f32 %v2982_v42, 0.0  ;;  %v7806_v49 = vpop.f32.mrb[14].mxu0  ;;  %v8907_v14 = vpack.c.bf16 %v3689_v28, %v3688_v20  ;;  %v3691_v42 = vld [vmem:[#allocation8 + $0x128] sm:$0xff] }
 0x37f   : > { %3087 = vst [vmem:[#allocation2 + $0xb1] sm:$0xff] %v10779_v43  ;;  %v2985_v52 = vadd.f32 %v7806_v49, %v10759_v54  ;;  %v2842_v26 = vpop.f32.mrb[15].mxu0  ;;  %v10881_v49 = vld [vmem:[#allocation2 + $0x18] sm:$0xff] }
 0x380   : > { %3086 = vst [vmem:[#allocation2 + $0xa9] sm:$0xff] %v10781_v23  ;;  %v2984_v58 = vadd.f32 %v10759_v54, %v2842_v26  ;;  %7884 = vmatprep.mubr.f32.mxu1 %v10781_v23  ;;  %v10885_v26 = vld [vmem:[#allocation2 + $0x20] sm:$0xff] }
 0x381   : > { %v10788_v59 = vmax.f32 %v2985_v52, 0.0  ;;  %7885 = vmatmul.mubr.f32.gmra.mrb[14].mxu1 %v10779_v43 }
 0x382   : > { %v10791_v31 = vmax.f32 %v2984_v58, 0.0  ;;  %v7809_v3 = vpop.f32.mrb[16].mxu0  ;;  %v3692_v58 = vld [vmem:[#allocation8 + $0x130] sm:$0xff] }
 0x383   : > { %3089 = vst [vmem:[#allocation2 + $0xc9] sm:$0xff] %v10788_v59  ;;  %v2987_v19 = vadd.f32 %v7809_v3, %v10759_v54  ;;  %v2852_v24 = vpop.f32.mrb[17].mxu0  ;;  %v3693_v3 = vld [vmem:[#allocation8 + $0x138] sm:$0xff] }
 0x384   : > { %3088 = vst [vmem:[#allocation2 + $0xc1] sm:$0xff] %v10791_v31  ;;  %v2986_v25 = vadd.f32 %v10759_v54, %v2852_v24  ;;  %7887 = vmatprep.mubr.f32.mxu1 %v10791_v31  ;;  %v10891_v24 = vld [vmem:[#allocation2 + $0x38] sm:$0xff] }
 0x385   : > { %v10798_v29 = vmax.f32 %v2987_v19, 0.0  ;;  %7888 = vmatmul.mubr.f32.gmra.mrb[16].mxu1 %v10788_v59  ;;  %v10888_v19 = vld [vmem:[#allocation2 + $0x30] sm:$0xff] }
 0x386   : > { %v10801_v30 = vmax.f32 %v2986_v25, 0.0  ;;  %v7812_v32 = vpop.f32.mrb[18].mxu0  ;;  %v3694_v25 = vld [vmem:[#allocation8 + $0x140] sm:$0xff] }
 0x387   : > { %3091 = vst [vmem:[#allocation2 + $0xe1] sm:$0xff] %v10798_v29  ;;  %v2989_v37 = vadd.f32 %v7812_v32, %v10759_v54  ;;  %v2862_v38 = vpop.f32.mrb[19].mxu0  ;;  %v3695_v32 = vld [vmem:[#allocation8 + $0x148] sm:$0xff] }
 0x388   : > { %3090 = vst [vmem:[#allocation2 + $0xd9] sm:$0xff] %v10801_v30  ;;  %v2988_v39 = vadd.f32 %v10759_v54, %v2862_v38  ;;  %7890 = vmatprep.mubr.f32.mxu1 %v10801_v30  ;;  %v10897_v38 = vld [vmem:[#allocation2 + $0x50] sm:$0xff] }
 0x389   : > { %v10808_v44 = vmax.f32 %v2989_v37, 0.0  ;;  %7891 = vmatmul.mubr.f32.gmra.mrb[18].mxu1 %v10798_v29  ;;  %v8919_v37 = vpack.c.bf16 %v3695_v32, %v3694_v25 }
 0x38a   : > { %v10811_v47 = vmax.f32 %v2988_v39, 0.0  ;;  %v7815_v48 = vpop.f32.mrb[20].mxu0  ;;  %v3696_v39 = vld [vmem:[#allocation8 + $0x150] sm:$0xff] }
 0x38b   : > { %3093 = vst [vmem:[#allocation2 + $0xf9] sm:$0xff] %v10808_v44  ;;  %v2991_v57 = vadd.f32 %v7815_v48, %v10759_v54  ;;  %v2872_v7 = vpop.f32.mrb[21].mxu0  ;;  %v3697_v48 = vld [vmem:[#allocation8 + $0x158] sm:$0xff] }
 0x38c   : > { %3092 = vst [vmem:[#allocation2 + $0xf1] sm:$0xff] %v10811_v47  ;;  %v2990_v9 = vadd.f32 %v10759_v54, %v2872_v7  ;;  %7893 = vmatprep.mubr.f32.mxu1 %v10811_v47  ;;  %v8923_v7 = vpack.c.bf16 %v3697_v48, %v3696_v39  ;;  %v3653_v39 = vld [vmem:[#allocation2 + $0x2] sm:$0xff] }
 0x38d   : > { %v10818_v62 = vmax.f32 %v2991_v57, 0.0  ;;  %7894 = vmatmul.mubr.f32.gmra.mrb[20].mxu1 %v10808_v44  ;;  %v10900_v57 = vld [vmem:[#allocation2 + $0x60] sm:$0xff] }
 0x38e   : > { %v10821_v63 = vmax.f32 %v2990_v9, 0.0  ;;  %v7818_v0 = vpop.f32.mrb[22].mxu0  ;;  %v10903_v9 = vld [vmem:[#allocation2 + $0x68] sm:$0xff] }
 0x38f   : > { %3095 = vst [vmem:[#allocation2 + $0x111] sm:$0xff] %v10818_v62  ;;  %v2993_v11 = vadd.f32 %v7818_v0, %v10759_v54  ;;  %v2882_v13 = vpop.f32.mrb[23].mxu0  ;;  %v3698_v0 = vld [vmem:[#allocation8 + $0x160] sm:$0xff]  ;;  %v10933_v20 = vld [vmem:[#allocation2 + $0xe0] sm:$0xff] }
 0x390   : > { %3094 = vst [vmem:[#allocation2 + $0x109] sm:$0xff] %v10821_v63  ;;  %v2992_v17 = vadd.f32 %v10759_v54, %v2882_v13  ;;  %7896 = vmatprep.mubr.f32.mxu1 %v10821_v63  ;;  %v10906_v13 = vld [vmem:[#allocation2 + $0x78] sm:$0xff] }
 0x391   : > { %v10828_v22 = vmax.f32 %v2993_v11, 0.0  ;;  %7897 = vmatmul.mubr.f32.gmra.mrb[22].mxu1 %v10818_v62  ;;  %v3699_v11 = vld [vmem:[#allocation8 + $0x168] sm:$0xff] }
 0x392   : > { %v10831_v21 = vmax.f32 %v2992_v17, 0.0  ;;  %v7821_v12 = vpop.f32.mrb[24].mxu0  ;;  %v8927_v17 = vpack.c.bf16 %v3699_v11, %v3698_v0  ;;  %v3995_v0 = vld [vmem:[#allocation8 + $0x198] sm:$0xff] }
 0x393   : > { %3097 = vst [vmem:[#allocation2 + $0x129] sm:$0xff] %v10828_v22  ;;  %v2995_v35 = vadd.f32 %v7821_v12, %v10759_v54  ;;  %v2892_v36 = vpop.f32.mrb[25].mxu0  ;;  %v10909_v12 = vld [vmem:[#allocation2 + $0x80] sm:$0xff]  ;;  %v10936_v28 = vld [vmem:[#allocation2 + $0xf0] sm:$0xff] }
 0x394   : > { %3096 = vst [vmem:[#allocation2 + $0x121] sm:$0xff] %v10831_v21  ;;  %v2994_v27 = vadd.f32 %v10759_v54, %v2892_v36  ;;  %7899 = vmatprep.mubr.f32.mxu1 %v10831_v21  ;;  %v3701_v36 = vld [vmem:[#allocation8 + $0x178] sm:$0xff] }
 0x395   : > { %v10838_v40 = vmax.f32 %v2995_v35, 0.0  ;;  %7900 = vmatmul.mubr.f32.gmra.mrb[24].mxu1 %v10828_v22  ;;  %v3700_v35 = vld [vmem:[#allocation8 + $0x170] sm:$0xff]  ;;  %v3654_v11 = vld [vmem:[#allocation2 + $0xa] sm:$0xff] }
 0x396   : > { %v10841_v41 = vmax.f32 %v2994_v27, 0.0  ;;  %v7824_v10 = vpop.f32.mrb[26].mxu0  ;;  %v10912_v27 = vld [vmem:[#allocation2 + $0x90] sm:$0xff] }
 0x397   : > { %3099 = vst [vmem:[#allocation2 + $0x141] sm:$0xff] %v10838_v40  ;;  %v2997_v45 = vadd.f32 %v7824_v10, %v10759_v54  ;;  %v2902_v46 = vpop.f32.mrb[27].mxu0  ;;  %v8931_v10 = vpack.c.bf16 %v3701_v36, %v3700_v35  ;;  %v3996_v35 = vld [vmem:[#allocation8 + $0x1a0] sm:$0xff]  ;;  %v3997_v36 = vld [vmem:[#allocation8 + $0x1a8] sm:$0xff] }
 0x398   : > { %3098 = vst [vmem:[#allocation2 + $0x139] sm:$0xff] %v10841_v41  ;;  %v2996_v15 = vadd.f32 %v10759_v54, %v2902_v46  ;;  %7902 = vmatprep.mubr.f32.mxu1 %v10841_v41  ;;  %v3992_v46 = vld [vmem:[#allocation8 + $0x180] sm:$0xff] }
 0x399   : > { %v10848_v50 = vmax.f32 %v2997_v45, 0.0  ;;  %7903 = vmatmul.mubr.f32.gmra.mrb[26].mxu1 %v10838_v40  ;;  %v10915_v45 = vld [vmem:[#allocation2 + $0x98] sm:$0xff] }
 0x39a   : > { %v10851_v51 = vmax.f32 %v2996_v15, 0.0  ;;  %v7827_v55 = vpop.f32.mrb[28].mxu0  ;;  %v3993_v15 = vld [vmem:[#allocation8 + $0x188] sm:$0xff] }
 0x39b   : > { %3101 = vst [vmem:[#allocation2 + $0x159] sm:$0xff] %v10848_v50  ;;  %v2999_v60 = vadd.f32 %v7827_v55, %v10759_v54  ;;  %v2912_v61 = vpop.f32.mrb[29].mxu0  ;;  %v10918_v55 = vld [vmem:[#allocation2 + $0xa8] sm:$0xff] }
 0x39c   : > { %3100 = vst [vmem:[#allocation2 + $0x151] sm:$0xff] %v10851_v51  ;;  %v2998_v1 = vadd.f32 %v10759_v54, %v2912_v61  ;;  %7905 = vmatprep.mubr.f32.mxu1 %v10851_v51  ;;  %v10921_v61 = vld [vmem:[#allocation2 + $0xb0] sm:$0xff] }
 0x39d   : > { %v10858_v2 = vmax.f32 %v2999_v60, 0.0  ;;  %7906 = vmatmul.mubr.f32.gmra.mrb[28].mxu1 %v10848_v50  ;;  %v8935_v60 = vpack.c.bf16 %v3993_v15, %v3992_v46  ;;  %v8943_v46 = vpack.c.bf16 %v3997_v36, %v3996_v35  ;;  %v10975_v15 = vld [vmem:[#allocation2 + $0x22] sm:$0xff]  ;;  %v10987_v36 = vld [vmem:[#allocation2 + $0x52] sm:$0xff] }
 0x39e   : > { %v10861_v4 = vmax.f32 %v2998_v1, 0.0  ;;  %v7830_v5 = vpop.f32.mrb[30].mxu0  ;;  %v10924_v1 = vld [vmem:[#allocation2 + $0xc0] sm:$0xff]  ;;  %11550 = vst [vmem:[#allocation16_spill] sm:$0xff] %v10975_v15  ;;  %11554 = vst [vmem:[#allocation20_spill] sm:$0xff] %v10987_v36 }
 0x39f   : > { %3103 = vst [vmem:[#allocation2 + $0x171] sm:$0xff] %v10858_v2  ;;  %v10865_v18 = vadd.f32 %v7830_v5, %v10759_v54  ;;  %v2922_v56 = vpop.f32.mrb[31].mxu0  ;;  %v10927_v5 = vld [vmem:[#allocation2 + $0xc8] sm:$0xff] }
 0x3a0   : > { %3102 = vst [vmem:[#allocation2 + $0x169] sm:$0xff] %v10861_v4  ;;  %v10869_v8 = vadd.f32 %v10759_v54, %v2922_v56  ;;  %7908 = vmatprep.mubr.f32.mxu1 %v10861_v4  ;;  %v3690_v54 = vld [vmem:[#allocation8 + $0x120] sm:$0xff]  ;;  %v10930_v56 = vld [vmem:[#allocation2 + $0xd8] sm:$0xff] }
 0x3a1   : > { %11547 = vst [vmem:[#allocation13_spill] sm:$0xff] %v10865_v18  ;;  %v11426_v33 = vmax.f32 %v10865_v18, 0.0  ;;  %7909 = vmatmul.mubr.f32.gmra.mrb[30].mxu1 %v10858_v2  ;;  %v8911_v52 = vpack.c.bf16 %v3691_v42, %v3690_v54  ;;  %v10942_v54 = vld [vmem:[#allocation2 + $0x108] sm:$0xff]  ;;  %v10945_v42 = vld [vmem:[#allocation2 + $0x110] sm:$0xff] }
 0x3a2   : > { %v11427_v34 = vmax.f32 %v10869_v8, 0.0  ;;  %7943 = vmatprep.mubr.f32.mxu1 %v9910_v6  ;;  %v10978_v18 = vld [vmem:[#allocation2 + $0x32] sm:$0xff] }
 0x3a3   : > { %3105 = vst [vmem:[#allocation2 + $0x189] sm:$0xff] %v11426_v33  ;;  %v10960_v25 = vld [vmem:[#allocation2 + $0x150] sm:$0xff]  ;;  %v10963_v32 = vld [vmem:[#allocation2 + $0x158] sm:$0xff]  ;;  %v3998_v33 = vld [vmem:[#allocation8 + $0x1b0] sm:$0xff] }
 0x3a4   : > { %3104 = vst [vmem:[#allocation2 + $0x181] sm:$0xff] %v11427_v34  ;;  %v3999_v34 = vld [vmem:[#allocation8 + $0x1b8] sm:$0xff]  ;;  %11551 = vst [vmem:[#allocation17_spill] sm:$0xff] %v10978_v18 }
 0x3a5   : > { %7944 = vmatmul.mubr.f32.vlgmr.msra.gmra.mrb[0].mxu1 %v9910_v6  ;;  %v8915_v6 = vpack.c.bf16 %v3693_v3, %v3692_v58  ;;  %v10951_v58 = vld [vmem:[#allocation2 + $0x128] sm:$0xff]  ;;  %v10954_v3 = vld [vmem:[#allocation2 + $0x138] sm:$0xff] }
 0x3a6   : > { %7946 = vmatprep.mubr.f32.mxu1 %v10881_v49  ;;  %8906 = vmatpush3.bf16.msra.mxu1 %v10753_v53  ;;  %v10894_v53 = vld [vmem:[#allocation2 + $0x48] sm:$0xff] }
 0x3a7   : > { %8908 = vmatprep.subr.bf16.mxu1 %v8907_v14  ;;  %v10969_v48 = vld [vmem:[#allocation2 + $0x170] sm:$0xff] }
 0x3a8   : > { %11549 = vst [vmem:[#allocation15_spill] sm:$0xff] %v10969_v48 }
 0x3a9   : > { %7947 = vmatmul.mubr.f32.gmra.mrb[2].mxu1 %v10885_v26 }
 0x3aa   : > { %7949 = vmatprep.mubr.f32.mxu1 %v10888_v19  ;;  %8910 = vmatpush3.bf16.msra.mxu1 %v8907_v14  ;;  %v10939_v14 = vld [vmem:[#allocation2 + $0xf8] sm:$0xff] }
 0x3ab   : > { %8912 = vmatprep.subr.bf16.mxu1 %v8911_v52 }
 0x3ad   : > { %7950 = vmatmul.mubr.f32.gmra.mrb[4].mxu1 %v10891_v24 }
 0x3ae   : > { %7952 = vmatprep.mubr.f32.mxu1 %v10894_v53  ;;  %8914 = vmatpush3.bf16.msra.mxu1 %v8911_v52  ;;  %v10948_v52 = vld [vmem:[#allocation2 + $0x120] sm:$0xff] }
 0x3af   : > { %8916 = vmatprep.subr.bf16.mxu1 %v8915_v6 }
 0x3b1   : > { %7953 = vmatmul.mubr.f32.gmra.mrb[6].mxu1 %v10897_v38 }
 0x3b2   : > { %7955 = vmatprep.mubr.f32.mxu1 %v10900_v57  ;;  %8918 = vmatpush3.bf16.msra.mxu1 %v8915_v6  ;;  %v10957_v6 = vld [vmem:[#allocation2 + $0x140] sm:$0xff] }
 0x3b3   : > { %8920 = vmatprep.subr.bf16.mxu1 %v8919_v37 }
 0x3b5   : > { %7956 = vmatmul.mubr.f32.gmra.mrb[8].mxu1 %v10903_v9 }
 0x3b6   : > { %7958 = vmatprep.mubr.f32.mxu1 %v10906_v13  ;;  %8922 = vmatpush3.bf16.msra.mxu1 %v8919_v37  ;;  %v10966_v37 = vld [vmem:[#allocation2 + $0x168] sm:$0xff] }
 0x3b7   : > { %8924 = vmatprep.subr.bf16.mxu1 %v8923_v7  ;;  %11548 = vst [vmem:[#allocation14_spill] sm:$0xff] %v10966_v37 }
 0x3b9   : > { %7959 = vmatmul.mubr.f32.gmra.mrb[10].mxu1 %v10909_v12 }
 0x3ba   : > { %7961 = vmatprep.mubr.f32.mxu1 %v10912_v27  ;;  %8926 = vmatpush3.bf16.msra.mxu1 %v8923_v7  ;;  %v3994_v7 = vld [vmem:[#allocation8 + $0x190] sm:$0xff] }
 0x3bb   : > { %8928 = vmatprep.subr.bf16.mxu1 %v8927_v17 }
 0x3bd   : > { %7962 = vmatmul.mubr.f32.gmra.mrb[12].mxu1 %v10915_v45 }
 0x3be   : > { %7964 = vmatprep.mubr.f32.mxu1 %v10918_v55  ;;  %8930 = vmatpush3.bf16.msra.mxu1 %v8927_v17  ;;  %v8939_v17 = vpack.c.bf16 %v3995_v0, %v3994_v7  ;;  %v10981_v7 = vld [vmem:[#allocation2 + $0x3a] sm:$0xff]  ;;  %v4000_v0 = vld [vmem:[#allocation8 + $0x1c0] sm:$0xff] }
 0x3bf   : > { %8932 = vmatprep.subr.bf16.mxu1 %v8931_v10  ;;  %11552 = vst [vmem:[#allocation18_spill] sm:$0xff] %v10981_v7 }
 0x3c1   : > { %7965 = vmatmul.mubr.f32.gmra.mrb[14].mxu1 %v10921_v61 }
 0x3c2   : > { %7967 = vmatprep.mubr.f32.mxu1 %v10924_v1  ;;  %8934 = vmatpush3.bf16.msra.mxu1 %v8931_v10  ;;  %v10972_v10 = vld [vmem:[#allocation2 + $0x1a] sm:$0xff] }
 0x3c3   : > { %8936 = vmatprep.subr.bf16.mxu1 %v8935_v60 }
 0x3c5   : > { %7968 = vmatmul.mubr.f32.gmra.mrb[16].mxu1 %v10927_v5 }
 0x3c6   : > { %7970 = vmatprep.mubr.f32.mxu1 %v10930_v56 }
 0x3c9   : > { %7971 = vmatmul.mubr.f32.gmra.mrb[18].mxu1 %v10933_v20 }
 0x3ca   : > { %7973 = vmatprep.mubr.f32.mxu1 %v10936_v28 }
 0x3cd   : > { %7974 = vmatmul.mubr.f32.gmra.mrb[20].mxu1 %v10939_v14 }
 0x3ce   : > { %7976 = vmatprep.mubr.f32.mxu1 %v10942_v54 }
 0x3d1   : > { %7977 = vmatmul.mubr.f32.gmra.mrb[22].mxu1 %v10945_v42 }
 0x3d2   : > { %7979 = vmatprep.mubr.f32.mxu1 %v10948_v52 }
 0x3d5   : > { %7980 = vmatmul.mubr.f32.gmra.mrb[24].mxu1 %v10951_v58 }
 0x3d6   : > { %7982 = vmatprep.mubr.f32.mxu1 %v10954_v3 }
 0x3d9   : > { %7983 = vmatmul.mubr.f32.gmra.mrb[26].mxu1 %v10957_v6 }
 0x3da   : > { %7985 = vmatprep.mubr.f32.mxu1 %v10960_v25 }
 0x3dd   : > { %7986 = vmatmul.mubr.f32.gmra.mrb[28].mxu1 %v10963_v32 }
 0x3de   : > { %7988 = vmatprep.mubr.f32.mxu1 %v10966_v37 }
 0x3e1   : > { %7989 = vmatmul.mubr.f32.gmra.mrb[30].mxu1 %v10969_v48 }
 0x3e2   : > { %8023 = vmatprep.mubr.f32.mxu1 %v3653_v39  ;;  %v8947_v39 = vpack.c.bf16 %v3999_v34, %v3998_v33  ;;  %v10990_v33 = vld [vmem:[#allocation2 + $0x62] sm:$0xff] }
 0x3e3   : > { %11555 = vst [vmem:[#allocation21_spill] sm:$0xff] %v10990_v33 }
 0x3e5   : > { %8024 = vmatmul.mubr.f32.vlgmr.msra.gmra.mrb[0].mxu1 %v3654_v11  ;;  %v4001_v11 = vld [vmem:[#allocation8 + $0x1c8] sm:$0xff] }
 0x3e6   : > { %8026 = vmatprep.mubr.f32.mxu1 %v10972_v10  ;;  %8938 = vmatpush3.bf16.msra.mxu1 %v8935_v60  ;;  %v10984_v60 = vld [vmem:[#allocation2 + $0x4a] sm:$0xff]  ;;  %v8951_v35 = vpack.c.bf16 %v4001_v11, %v4000_v0  ;;  %v10999_v11 = vld [vmem:[#allocation2 + $0x82] sm:$0xff] }
 0x3e7   : > { %8940 = vmatprep.subr.bf16.mxu1 %v8939_v17  ;;  %11553 = vst [vmem:[#allocation19_spill] sm:$0xff] %v10984_v60 }
 0x3e9   : > { %8027 = vmatmul.mubr.f32.gmra.mrb[2].mxu1 %v10975_v15  ;;  %v4002_v15 = vld [vmem:[#allocation8 + $0x1d0] sm:$0xff] }
 0x3ea   : > { %8029 = vmatprep.mubr.f32.mxu1 %v10978_v18  ;;  %8942 = vmatpush3.bf16.msra.mxu1 %v8939_v17  ;;  %v4003_v18 = vld [vmem:[#allocation8 + $0x1d8] sm:$0xff] }
 0x3eb   : > { %8944 = vmatprep.subr.bf16.mxu1 %v8943_v46  ;;  %v8955_v34 = vpack.c.bf16 %v4003_v18, %v4002_v15  ;;  %v10993_v17 = vld [vmem:[#allocation2 + $0x6a] sm:$0xff]  ;;  %v11002_v18 = vld [vmem:[#allocation2 + $0x92] sm:$0xff] }
 0x3ec   : > { %11556 = vst [vmem:[#allocation22_spill] sm:$0xff] %v10993_v17 }
 0x3ed   : > { %8030 = vmatmul.mubr.f32.gmra.mrb[4].mxu1 %v10981_v7  ;;  %v4004_v7 = vld [vmem:[#allocation8 + $0x1e0] sm:$0xff] }
 0x3ee   : > { %8032 = vmatprep.mubr.f32.mxu1 %v10984_v60  ;;  %8946 = vmatpush3.bf16.msra.mxu1 %v8943_v46  ;;  %v4005_v60 = vld [vmem:[#allocation8 + $0x1e8] sm:$0xff] }
 0x3ef   : > { %8948 = vmatprep.subr.bf16.mxu1 %v8947_v39  ;;  %v10996_v46 = vld [vmem:[#allocation2 + $0x7a] sm:$0xff]  ;;  %v8959_v0 = vpack.c.bf16 %v4005_v60, %v4004_v7  ;;  %v11008_v7 = vld [vmem:[#allocation2 + $0xaa] sm:$0xff] }
 0x3f0   : > { %11557 = vst [vmem:[#allocation23_spill] sm:$0xff] %v10996_v46  ;;  %11558 = vst [vmem:[#allocation24_spill] sm:$0xff] %v11008_v7 }
 0x3f1   : > { %8033 = vmatmul.mubr.f32.gmra.mrb[6].mxu1 %v10987_v36  ;;  %v4006_v36 = vld [vmem:[#allocation8 + $0x1f0] sm:$0xff] }
 0x3f2   : > { %8035 = vmatprep.mubr.f32.mxu1 %v10990_v33  ;;  %8950 = vmatpush3.bf16.msra.mxu1 %v8947_v39  ;;  %v4007_v33 = vld [vmem:[#allocation8 + $0x1f8] sm:$0xff]  ;;  %v11005_v39 = vld [vmem:[#allocation2 + $0x9a] sm:$0xff] }
 0x3f3   : > { %8952 = vmatprep.subr.bf16.mxu1 %v8951_v35  ;;  %v8963_v15 = vpack.c.bf16 %v4007_v33, %v4006_v36  ;;  %v11017_v36 = vld [vmem:[#allocation2 + $0xca] sm:$0xff]  ;;  %v11020_v33 = vld [vmem:[#allocation2 + $0xda] sm:$0xff] }
 0x3f4   : > { %11561 = vst [vmem:[#allocation27_spill] sm:$0xff] %v11017_v36  ;;  %11562 = vst [vmem:[#allocation28_spill] sm:$0xff] %v11020_v33 }
 0x3f5   : > { %8036 = vmatmul.mubr.f32.gmra.mrb[8].mxu1 %v10993_v17  ;;  %v4298_v17 = vld [vmem:[#allocation8 + $0x200] sm:$0xff] }
 0x3f6   : > { %8038 = vmatprep.mubr.f32.mxu1 %v10996_v46  ;;  %8954 = vmatpush3.bf16.msra.mxu1 %v8951_v35  ;;  %v4299_v46 = vld [vmem:[#allocation8 + $0x208] sm:$0xff] }
 0x3f7   : > { %8956 = vmatprep.subr.bf16.mxu1 %v8955_v34  ;;  %v8967_v60 = vpack.c.bf16 %v4299_v46, %v4298_v17  ;;  %v11011_v35 = vld [vmem:[#allocation2 + $0xb2] sm:$0xff]  ;;  %v11029_v46 = vld [vmem:[#allocation2 + $0xfa] sm:$0xff] }
 0x3f8   : > { %11559 = vst [vmem:[#allocation25_spill] sm:$0xff] %v11011_v35  ;;  %v11026_v17 = vld [vmem:[#allocation2 + $0xf2] sm:$0xff]  ;;  %11565 = vst [vmem:[#allocation31_spill] sm:$0xff] %v11029_v46 }
 0x3f9   : > { %8039 = vmatmul.mubr.f32.gmra.mrb[10].mxu1 %v10999_v11  ;;  %11564 = vst [vmem:[#allocation30_spill] sm:$0xff] %v11026_v17 }
 0x3fa   : > { %8041 = vmatprep.mubr.f32.mxu1 %v11002_v18  ;;  %8958 = vmatpush3.bf16.msra.mxu1 %v8955_v34  ;;  %v11014_v34 = vld [vmem:[#allocation2 + $0xc2] sm:$0xff] }
 0x3fb   : > { %8960 = vmatprep.subr.bf16.mxu1 %v8959_v0  ;;  %11560 = vst [vmem:[#allocation26_spill] sm:$0xff] %v11014_v34 }
 0x3fd   : > { %8042 = vmatmul.mubr.f32.gmra.mrb[12].mxu1 %v11005_v39 }
 0x3fe   : > { %8044 = vmatprep.mubr.f32.mxu1 %v11008_v7  ;;  %8962 = vmatpush3.bf16.msra.mxu1 %v8959_v0  ;;  %v11023_v0 = vld [vmem:[#allocation2 + $0xe2] sm:$0xff]  ;;  %v4303_v7 = vld [vmem:[#allocation8 + $0x228] sm:$0xff] }
 0x3ff   : > { %8964 = vmatprep.subr.bf16.mxu1 %v8963_v15  ;;  %11563 = vst [vmem:[#allocation29_spill] sm:$0xff] %v11023_v0 }
 0x401   : > { %8045 = vmatmul.mubr.f32.gmra.mrb[14].mxu1 %v11011_v35  ;;  %v4302_v35 = vld [vmem:[#allocation8 + $0x220] sm:$0xff] }
 0x402   : > { %8047 = vmatprep.mubr.f32.mxu1 %v11014_v34  ;;  %8966 = vmatpush3.bf16.msra.mxu1 %v8963_v15  ;;  %v11032_v15 = vld [vmem:[#allocation2 + $0x10a] sm:$0xff]  ;;  %v4300_v34 = vld [vmem:[#allocation8 + $0x210] sm:$0xff] }
 0x403   : > { %8968 = vmatprep.subr.bf16.mxu1 %v8967_v60  ;;  %11566 = vst [vmem:[#allocation32_spill] sm:$0xff] %v11032_v15 }
 0x405   : > { %8048 = vmatmul.mubr.f32.gmra.mrb[16].mxu1 %v11017_v36  ;;  %v11035_v36 = vld [vmem:[#allocation2 + $0x112] sm:$0xff] }
 0x406   : > { %8050 = vmatprep.mubr.f32.mxu1 %v11020_v33  ;;  %11567 = vst [vmem:[#allocation33_spill] sm:$0xff] %v11035_v36  ;;  %v11038_v33 = vld [vmem:[#allocation2 + $0x122] sm:$0xff] }
 0x407   : > { %11568 = vst [vmem:[#allocation34_spill] sm:$0xff] %v11038_v33 }
 0x409   : > { %8051 = vmatmul.mubr.f32.gmra.mrb[18].mxu1 %v11023_v0  ;;  %v11041_v0 = vld [vmem:[#allocation2 + $0x12a] sm:$0xff] }
 0x40a   : > { %8053 = vmatprep.mubr.f32.mxu1 %v11026_v17  ;;  %11569 = vst [vmem:[#allocation35_spill] sm:$0xff] %v11041_v0  ;;  %v11044_v17 = vld [vmem:[#allocation2 + $0x13a] sm:$0xff] }
 0x40b   : > { %11570 = vst [vmem:[#allocation36_spill] sm:$0xff] %v11044_v17 }
 0x40d   : > { %8054 = vmatmul.mubr.f32.gmra.mrb[20].mxu1 %v11029_v46  ;;  %v11047_v46 = vld [vmem:[#allocation2 + $0x142] sm:$0xff] }
 0x40e   : > { %8056 = vmatprep.mubr.f32.mxu1 %v11032_v15  ;;  %11571 = vst [vmem:[#allocation37_spill] sm:$0xff] %v11047_v46  ;;  %v11050_v15 = vld [vmem:[#allocation2 + $0x152] sm:$0xff] }
 0x40f   : > { %11572 = vst [vmem:[#allocation38_spill] sm:$0xff] %v11050_v15 }
 0x411   : > { %8057 = vmatmul.mubr.f32.gmra.mrb[22].mxu1 %v11035_v36  ;;  %v11053_v36 = vld [vmem:[#allocation2 + $0x15a] sm:$0xff] }
 0x412   : > { %8059 = vmatprep.mubr.f32.mxu1 %v11038_v33  ;;  %11573 = vst [vmem:[#allocation39_spill] sm:$0xff] %v11053_v36  ;;  %v11056_v33 = vld [vmem:[#allocation2 + $0x16a] sm:$0xff] }
 0x413   : > { %11574 = vst [vmem:[#allocation40_spill] sm:$0xff] %v11056_v33 }
 0x415   : > { %8060 = vmatmul.mubr.f32.gmra.mrb[24].mxu1 %v11041_v0  ;;  %v11059_v0 = vld [vmem:[#allocation2 + $0x172] sm:$0xff] }
 0x416   : > { %8062 = vmatprep.mubr.f32.mxu1 %v11044_v17  ;;  %11575 = vst [vmem:[#allocation41_spill] sm:$0xff] %v11059_v0  ;;  %v4301_v17 = vld [vmem:[#allocation8 + $0x218] sm:$0xff] }
 0x419   : > { %8063 = vmatmul.mubr.f32.gmra.mrb[26].mxu1 %v11047_v46  ;;  %v8971_v46 = vpack.c.bf16 %v4301_v17, %v4300_v34  ;;  %v4307_v34 = vld [vmem:[#allocation8 + $0x248] sm:$0xff]  ;;  %v4310_v17 = vld [vmem:[#allocation8 + $0x260] sm:$0xff] }
 0x41a   : > { %8065 = vmatprep.mubr.f32.mxu1 %v11050_v15  ;;  %v4304_v15 = vld [vmem:[#allocation8 + $0x230] sm:$0xff] }
 0x41d   : > { %8066 = vmatmul.mubr.f32.gmra.mrb[28].mxu1 %v11053_v36  ;;  %v8975_v36 = vpack.c.bf16 %v4303_v7, %v4302_v35  ;;  %v4309_v7 = vld [vmem:[#allocation8 + $0x258] sm:$0xff] }
 0x41e   : > { %8068 = vmatprep.mubr.f32.mxu1 %v11056_v33  ;;  %v4305_v33 = vld [vmem:[#allocation8 + $0x238] sm:$0xff] }
 0x421   : > { %8069 = vmatmul.mubr.f32.gmra.mrb[30].mxu1 %v11059_v0  ;;  %v8979_v0 = vpack.c.bf16 %v4305_v33, %v4304_v15  ;;  %v4311_v33 = vld [vmem:[#allocation8 + $0x268] sm:$0xff]  ;;  %v4313_v15 = vld [vmem:[#allocation8 + $0x278] sm:$0xff] }
 0x422   : > { %8103 = vmatprep.mubr.f32.mxu1 %v10881_v49  ;;  %v4306_v49 = vld [vmem:[#allocation8 + $0x240] sm:$0xff] }
 0x425   : > { %8104 = vmatmul.mubr.f32.vlgmr.msra.gmra.mrb[0].mxu1 %v10885_v26  ;;  %v8983_v26 = vpack.c.bf16 %v4307_v34, %v4306_v49  ;;  %v4604_v49 = vld [vmem:[#allocation8 + $0x280] sm:$0xff]  ;;  %v4605_v34 = vld [vmem:[#allocation8 + $0x288] sm:$0xff] }
 0x426   : > { %8106 = vmatprep.mubr.f32.mxu1 %v10888_v19  ;;  %8970 = vmatpush3.bf16.msra.mxu1 %v8967_v60  ;;  %v4308_v60 = vld [vmem:[#allocation8 + $0x250] sm:$0xff] }
 0x427   : > { %8972 = vmatprep.subr.bf16.mxu1 %v8971_v46  ;;  %v8987_v35 = vpack.c.bf16 %v4309_v7, %v4308_v60  ;;  %v11092_v60 = vld [vmem:[#allocation2 + $0x180] sm:$0xff]  ;;  %v11095_v7 = vld [vmem:[#allocation2 + $0x188] sm:$0xff] }
 0x428   : > { %11576 = vst [vmem:[#allocation42_spill] sm:$0xff] %v11092_v60  ;;  %11577 = vst [vmem:[#allocation43_spill] sm:$0xff] %v11095_v7 }
 0x429   : > { %8107 = vmatmul.mubr.f32.gmra.mrb[2].mxu1 %v10891_v24 }
 0x42a   : > { %8109 = vmatprep.mubr.f32.mxu1 %v10894_v53  ;;  %8974 = vmatpush3.bf16.msra.mxu1 %v8971_v46  ;;  %v4312_v46 = vld [vmem:[#allocation8 + $0x270] sm:$0xff] }
 0x42b   : > { %8976 = vmatprep.subr.bf16.mxu1 %v8975_v36 }
 0x42d   : > { %8110 = vmatmul.mubr.f32.gmra.mrb[4].mxu1 %v10897_v38 }
 0x42e   : > { %8112 = vmatprep.mubr.f32.mxu1 %v10900_v57  ;;  %8978 = vmatpush3.bf16.msra.mxu1 %v8975_v36  ;;  %v8991_v36 = vpack.c.bf16 %v4311_v33, %v4310_v17  ;;  %v4607_v17 = vld [vmem:[#allocation8 + $0x298] sm:$0xff]  ;;  %v4265_v33 = vld [vmem:[#allocation2 + $0x19] sm:$0xff] }
 0x42f   : > { %8980 = vmatprep.subr.bf16.mxu1 %v8979_v0 }
 0x431   : > { %8113 = vmatmul.mubr.f32.gmra.mrb[6].mxu1 %v10903_v9 }
 0x432   : > { %8115 = vmatprep.mubr.f32.mxu1 %v10906_v13  ;;  %8982 = vmatpush3.bf16.msra.mxu1 %v8979_v0  ;;  %v8995_v0 = vpack.c.bf16 %v4313_v15, %v4312_v46  ;;  %v4266_v46 = vld [vmem:[#allocation2 + $0x21] sm:$0xff]  ;;  %v4608_v15 = vld [vmem:[#allocation8 + $0x2a0] sm:$0xff] }
 0x433   : > { %8984 = vmatprep.subr.bf16.mxu1 %v8983_v26 }
 0x435   : > { %8116 = vmatmul.mubr.f32.gmra.mrb[8].mxu1 %v10909_v12 }
 0x436   : > { %8118 = vmatprep.mubr.f32.mxu1 %v10912_v27  ;;  %8986 = vmatpush3.bf16.msra.mxu1 %v8983_v26  ;;  %v8999_v26 = vpack.c.bf16 %v4605_v34, %v4604_v49  ;;  %v11098_v49 = vld [vmem:[#allocation2 + $0x31] sm:$0xff] }
 0x437   : > { %8988 = vmatprep.subr.bf16.mxu1 %v8987_v35 }
 0x439   : > { %8119 = vmatmul.mubr.f32.gmra.mrb[10].mxu1 %v10915_v45 }
 0x43a   : > { %8121 = vmatprep.mubr.f32.mxu1 %v10918_v55  ;;  %8990 = vmatpush3.bf16.msra.mxu1 %v8987_v35  ;;  %v4606_v35 = vld [vmem:[#allocation8 + $0x290] sm:$0xff] }
 0x43b   : > { %8992 = vmatprep.subr.bf16.mxu1 %v8991_v36 }
 0x43d   : > { %8122 = vmatmul.mubr.f32.gmra.mrb[12].mxu1 %v10921_v61 }
 0x43e   : > { %8124 = vmatprep.mubr.f32.mxu1 %v10924_v1  ;;  %8994 = vmatpush3.bf16.msra.mxu1 %v8991_v36  ;;  %v9003_v36 = vpack.c.bf16 %v4607_v17, %v4606_v35  ;;  %v11107_v17 = vld [vmem:[#allocation2 + $0x51] sm:$0xff] }
 0x43f   : > { %8996 = vmatprep.subr.bf16.mxu1 %v8995_v0  ;;  %11580 = vst [vmem:[#allocation46_spill] sm:$0xff] %v11107_v17 }
 0x441   : > { %8125 = vmatmul.mubr.f32.gmra.mrb[14].mxu1 %v10927_v5 }
 0x442   : > { %8127 = vmatprep.mubr.f32.mxu1 %v10930_v56  ;;  %8998 = vmatpush3.bf16.msra.mxu1 %v8995_v0  ;;  %v4609_v0 = vld [vmem:[#allocation8 + $0x2a8] sm:$0xff] }
 0x443   : > { %9000 = vmatprep.subr.bf16.mxu1 %v8999_v26  ;;  %v9007_v34 = vpack.c.bf16 %v4609_v0, %v4608_v15  ;;  %v11113_v0 = vld [vmem:[#allocation2 + $0x69] sm:$0xff] }
 0x444   : > { %11582 = vst [vmem:[#allocation48_spill] sm:$0xff] %v11113_v0 }
 0x445   : > { %8128 = vmatmul.mubr.f32.gmra.mrb[16].mxu1 %v10933_v20 }
 0x446   : > { %8130 = vmatprep.mubr.f32.mxu1 %v10936_v28 }
 0x449   : > { %8131 = vmatmul.mubr.f32.gmra.mrb[18].mxu1 %v10939_v14 }
 0x44a   : > { %8133 = vmatprep.mubr.f32.mxu1 %v10942_v54 }
 0x44d   : > { %8134 = vmatmul.mubr.f32.gmra.mrb[20].mxu1 %v10945_v42 }
 0x44e   : > { %8136 = vmatprep.mubr.f32.mxu1 %v10948_v52 }
 0x451   : > { %8137 = vmatmul.mubr.f32.gmra.mrb[22].mxu1 %v10951_v58 }
 0x452   : > { %8139 = vmatprep.mubr.f32.mxu1 %v10954_v3 }
 0x455   : > { %8140 = vmatmul.mubr.f32.gmra.mrb[24].mxu1 %v10957_v6 }
 0x456   : > { %8142 = vmatprep.mubr.f32.mxu1 %v10960_v25 }
 0x459   : > { %8143 = vmatmul.mubr.f32.gmra.mrb[26].mxu1 %v10963_v32 }
 0x45a   : > { %8145 = vmatprep.mubr.f32.mxu1 %v10966_v37  ;;  %v4611_v37 = vld [vmem:[#allocation8 + $0x2b8] sm:$0xff] }
 0x45d   : > { %8146 = vmatmul.mubr.f32.gmra.mrb[28].mxu1 %v10969_v48  ;;  %v4610_v48 = vld [vmem:[#allocation8 + $0x2b0] sm:$0xff] }
 0x45e   : > { %8148 = vmatprep.mubr.f32.mxu1 %v11092_v60  ;;  %v11101_v60 = vld [vmem:[#allocation2 + $0x39] sm:$0xff]  ;;  %v9011_v35 = vpack.c.bf16 %v4611_v37, %v4610_v48 }
 0x45f   : > { %11578 = vst [vmem:[#allocation44_spill] sm:$0xff] %v11101_v60  ;;  %v11116_v37 = vld [vmem:[#allocation2 + $0x79] sm:$0xff] }
 0x461   : > { %8149 = vmatmul.mubr.f32.gmra.mrb[30].mxu1 %v11095_v7  ;;  %v11104_v7 = vld [vmem:[#allocation2 + $0x49] sm:$0xff] }
 0x462   : > { %8183 = vmatprep.mubr.f32.mxu1 %v4265_v33  ;;  %11579 = vst [vmem:[#allocation45_spill] sm:$0xff] %v11104_v7  ;;  %v4612_v33 = vld [vmem:[#allocation8 + $0x2c0] sm:$0xff] }
 0x465   : > { %8184 = vmatmul.mubr.f32.vlgmr.msra.gmra.mrb[0].mxu1 %v4266_v46  ;;  %v4613_v46 = vld [vmem:[#allocation8 + $0x2c8] sm:$0xff] }
 0x466   : > { %8186 = vmatprep.mubr.f32.mxu1 %v11098_v49  ;;  %9002 = vmatpush3.bf16.msra.mxu1 %v8999_v26  ;;  %v11110_v26 = vld [vmem:[#allocation2 + $0x61] sm:$0xff]  ;;  %v9015_v15 = vpack.c.bf16 %v4613_v46, %v4612_v33  ;;  %v11123_v33 = vld [vmem:[#allocation2 + $0x99] sm:$0xff] }
 0x467   : > { %9004 = vmatprep.subr.bf16.mxu1 %v9003_v36  ;;  %11581 = vst [vmem:[#allocation47_spill] sm:$0xff] %v11110_v26  ;;  %v4618_v46 = vld [vmem:[#allocation8 + $0x2f0] sm:$0xff] }
 0x469   : > { %8187 = vmatmul.mubr.f32.gmra.mrb[2].mxu1 %v11101_v60  ;;  %v4614_v60 = vld [vmem:[#allocation8 + $0x2d0] sm:$0xff] }
 0x46a   : > { %8189 = vmatprep.mubr.f32.mxu1 %v11104_v7  ;;  %9006 = vmatpush3.bf16.msra.mxu1 %v9003_v36  ;;  %v4615_v7 = vld [vmem:[#allocation8 + $0x2d8] sm:$0xff] }
 0x46b   : > { %9008 = vmatprep.subr.bf16.mxu1 %v9007_v34  ;;  %v9019_v48 = vpack.c.bf16 %v4615_v7, %v4614_v60  ;;  %v11119_v36 = vld [vmem:[#allocation2 + $0x81] sm:$0xff]  ;;  %v4911_v7 = vld [vmem:[#allocation8 + $0x300] sm:$0xff] }
 0x46d   : > { %8190 = vmatmul.mubr.f32.gmra.mrb[4].mxu1 %v11107_v17  ;;  %v4616_v17 = vld [vmem:[#allocation8 + $0x2e0] sm:$0xff] }
 0x46e   : > { %8192 = vmatprep.mubr.f32.mxu1 %v11110_v26  ;;  %9010 = vmatpush3.bf16.msra.mxu1 %v9007_v34  ;;  %v4617_v26 = vld [vmem:[#allocation8 + $0x2e8] sm:$0xff] }
 0x46f   : > { %9012 = vmatprep.subr.bf16.mxu1 %v9011_v35  ;;  %v9023_v34 = vpack.c.bf16 %v4617_v26, %v4616_v17  ;;  %v4921_v26 = vld [vmem:[#allocation8 + $0x350] sm:$0xff] }
 0x471   : > { %8193 = vmatmul.mubr.f32.gmra.mrb[6].mxu1 %v11113_v0  ;;  %v4619_v0 = vld [vmem:[#allocation8 + $0x2f8] sm:$0xff] }
 0x472   : > { %8195 = vmatprep.mubr.f32.mxu1 %v11116_v37  ;;  %9014 = vmatpush3.bf16.msra.mxu1 %v9011_v35  ;;  %v9027_v60 = vpack.c.bf16 %v4619_v0, %v4618_v46  ;;  %v4912_v35 = vld [vmem:[#allocation8 + $0x308] sm:$0xff]  ;;  %v4923_v46 = vld [vmem:[#allocation8 + $0x360] sm:$0xff] }
 0x473   : > { %9016 = vmatprep.subr.bf16.mxu1 %v9015_v15  ;;  %v11592_v0 = vld [vmem:[#allocation22_spill] sm:$0xff] }
 0x475   : > { %8196 = vmatmul.mubr.f32.gmra.mrb[8].mxu1 %v11119_v36 }
 0x476   : > { %8198 = vmatprep.mubr.f32.mxu1 %v10773_v16  ;;  %9018 = vmatpush3.bf16.msra.mxu1 %v9015_v15  ;;  %v9031_v16 = vpack.c.bf16 %v4912_v35, %v4911_v7  ;;  %v4922_v15 = vld [vmem:[#allocation8 + $0x358] sm:$0xff]  ;;  %v4925_v35 = vld [vmem:[#allocation8 + $0x370] sm:$0xff] }
 0x477   : > { %9020 = vmatprep.subr.bf16.mxu1 %v9019_v48 }
 0x479   : > { %8199 = vmatmul.mubr.f32.gmra.mrb[10].mxu1 %v11123_v33 }
 0x47a   : > { %8201 = vmatprep.mubr.f32.mxu1 %v10781_v23  ;;  %9022 = vmatpush3.bf16.msra.mxu1 %v9019_v48  ;;  %v4913_v23 = vld [vmem:[#allocation8 + $0x310] sm:$0xff] }
 0x47b   : > { %9024 = vmatprep.subr.bf16.mxu1 %v9023_v34  ;;  %v11593_v48 = vld [vmem:[#allocation23_spill] sm:$0xff] }
 0x47d   : > { %8202 = vmatmul.mubr.f32.gmra.mrb[12].mxu1 %v10779_v43  ;;  %v11583_v43 = vmax.f32 %v10869_v8, 0.0  ;;  %v11590_v8 = vld [vmem:[#allocation20_spill] sm:$0xff] }
 0x47e   : > { %8204 = vmatprep.mubr.f32.mxu1 %v10791_v31  ;;  %9026 = vmatpush3.bf16.msra.mxu1 %v9023_v34  ;;  %v11584_v31 = vld [vmem:[#allocation13_spill] sm:$0xff]  ;;  %v9051_v34 = vpack.c.bf16 %v4922_v15, %v4921_v26  ;;  %v5219_v26 = vld [vmem:[#allocation8 + $0x390] sm:$0xff]  ;;  %v5220_v15 = vld [vmem:[#allocation8 + $0x398] sm:$0xff] }
 0x47f   : > { %9028 = vmatprep.subr.bf16.mxu1 %v9027_v60 }
 0x481   : > { %8205 = vmatmul.mubr.f32.gmra.mrb[14].mxu1 %v10788_v59  ;;  %v4914_v59 = vld [vmem:[#allocation8 + $0x318] sm:$0xff] }
 0x482   : > { %8207 = vmatprep.mubr.f32.mxu1 %v10801_v30  ;;  %9030 = vmatpush3.bf16.msra.mxu1 %v9027_v60  ;;  %v9035_v30 = vpack.c.bf16 %v4914_v59, %v4913_v23  ;;  %v4924_v60 = vld [vmem:[#allocation8 + $0x368] sm:$0xff]  ;;  %v5217_v59 = vld [vmem:[#allocation8 + $0x380] sm:$0xff] }
 0x483   : > { %9032 = vmatprep.subr.bf16.mxu1 %v9031_v16  ;;  %v9055_v7 = vpack.c.bf16 %v4924_v60, %v4923_v46  ;;  %v5223_v60 = vld [vmem:[#allocation8 + $0x3b0] sm:$0xff] }
 0x485   : > { %8208 = vmatmul.mubr.f32.gmra.mrb[16].mxu1 %v10798_v29  ;;  %v11585_v29 = vmax.f32 %v11584_v31, 0.0  ;;  %v5218_v31 = vld [vmem:[#allocation8 + $0x388] sm:$0xff] }
 0x486   : > { %8210 = vmatprep.mubr.f32.mxu1 %v10811_v47  ;;  %v4916_v47 = vld [vmem:[#allocation8 + $0x328] sm:$0xff] }
 0x489   : > { %8211 = vmatmul.mubr.f32.gmra.mrb[18].mxu1 %v10808_v44  ;;  %v4915_v44 = vld [vmem:[#allocation8 + $0x320] sm:$0xff] }
 0x48a   : > { %8213 = vmatprep.mubr.f32.mxu1 %v10821_v63  ;;  %v11587_v63 = vld [vmem:[#allocation17_spill] sm:$0xff] }
 0x48d   : > { %8214 = vmatmul.mubr.f32.gmra.mrb[20].mxu1 %v10818_v62  ;;  %v11586_v62 = vld [vmem:[#allocation16_spill] sm:$0xff] }
 0x48e   : > { %8216 = vmatprep.mubr.f32.mxu1 %v10831_v21  ;;  %v4917_v21 = vld [vmem:[#allocation8 + $0x330] sm:$0xff] }
 0x491   : > { %8217 = vmatmul.mubr.f32.gmra.mrb[22].mxu1 %v10828_v22  ;;  %v9039_v22 = vpack.c.bf16 %v4916_v47, %v4915_v44  ;;  %v11598_v44 = vld [vmem:[#allocation28_spill] sm:$0xff]  ;;  %v11600_v47 = vld [vmem:[#allocation30_spill] sm:$0xff] }
 0x492   : > { %8219 = vmatprep.mubr.f32.mxu1 %v10841_v41  ;;  %v11588_v41 = vld [vmem:[#allocation18_spill] sm:$0xff] }
 0x495   : > { %8220 = vmatmul.mubr.f32.gmra.mrb[24].mxu1 %v10838_v40  ;;  %v4918_v40 = vld [vmem:[#allocation8 + $0x338] sm:$0xff] }
 0x496   : > { %8222 = vmatprep.mubr.f32.mxu1 %v10851_v51  ;;  %v9043_v51 = vpack.c.bf16 %v4918_v40, %v4917_v21  ;;  %v11604_v21 = vld [vmem:[#allocation34_spill] sm:$0xff]  ;;  %v11605_v40 = vld [vmem:[#allocation35_spill] sm:$0xff] }
 0x499   : > { %8223 = vmatmul.mubr.f32.gmra.mrb[26].mxu1 %v10848_v50  ;;  %v11589_v50 = vld [vmem:[#allocation19_spill] sm:$0xff] }
 0x49a   : > { %8225 = vmatprep.mubr.f32.mxu1 %v10861_v4  ;;  %v4920_v4 = vld [vmem:[#allocation8 + $0x348] sm:$0xff] }
 0x49d   : > { %8226 = vmatmul.mubr.f32.gmra.mrb[28].mxu1 %v10858_v2  ;;  %v4919_v2 = vld [vmem:[#allocation8 + $0x340] sm:$0xff] }
 0x49e   : > { %8228 = vmatprep.mubr.f32.mxu1 %v11583_v43  ;;  %v9047_v17 = vpack.c.bf16 %v4920_v4, %v4919_v2  ;;  %v11594_v43 = vld [vmem:[#allocation24_spill] sm:$0xff]  ;;  %v11609_v2 = vld [vmem:[#allocation39_spill] sm:$0xff] }
 0x49f   : > { %v11610_v4 = vld [vmem:[#allocation40_spill] sm:$0xff] }
 0x4a1   : > { %8229 = vmatmul.mubr.f32.gmra.mrb[30].mxu1 %v11585_v29  ;;  %v11595_v29 = vld [vmem:[#allocation25_spill] sm:$0xff] }
 0x4a2   : > { %8263 = vmatprep.mubr.f32.mxu1 %v10972_v10  ;;  %v11591_v10 = vld [vmem:[#allocation21_spill] sm:$0xff] }
 0x4a5   : > { %8264 = vmatmul.mubr.f32.vlgmr.msra.gmra.mrb[0].mxu1 %v11586_v62  ;;  %v11601_v62 = vld [vmem:[#allocation31_spill] sm:$0xff] }
 0x4a6   : > { %8266 = vmatprep.mubr.f32.mxu1 %v11587_v63  ;;  %9034 = vmatpush3.bf16.msra.mxu1 %v9031_v16  ;;  %v4926_v16 = vld [vmem:[#allocation8 + $0x378] sm:$0xff] }
 0x4a7   : > { %9036 = vmatprep.subr.bf16.mxu1 %v9035_v30  ;;  %v9059_v23 = vpack.c.bf16 %v4926_v16, %v4925_v35  ;;  %v11602_v63 = vld [vmem:[#allocation32_spill] sm:$0xff]  ;;  %v5226_v16 = vld [vmem:[#allocation8 + $0x3c8] sm:$0xff] }
 0x4a9   : > { %8267 = vmatmul.mubr.f32.gmra.mrb[2].mxu1 %v11588_v41  ;;  %v11606_v41 = vld [vmem:[#allocation36_spill] sm:$0xff] }
 0x4aa   : > { %8269 = vmatprep.mubr.f32.mxu1 %v11589_v50  ;;  %9038 = vmatpush3.bf16.msra.mxu1 %v9035_v30  ;;  %v11596_v30 = vld [vmem:[#allocation26_spill] sm:$0xff]  ;;  %v11607_v50 = vld [vmem:[#allocation37_spill] sm:$0xff] }
 0x4ab   : > { %9040 = vmatprep.subr.bf16.mxu1 %v9039_v22 }
 0x4ad   : > { %8270 = vmatmul.mubr.f32.gmra.mrb[4].mxu1 %v11590_v8  ;;  %v11611_v8 = vld [vmem:[#allocation41_spill] sm:$0xff] }
 0x4ae   : > { %8272 = vmatprep.mubr.f32.mxu1 %v11591_v10  ;;  %9042 = vmatpush3.bf16.msra.mxu1 %v9039_v22  ;;  %v11603_v22 = vld [vmem:[#allocation33_spill] sm:$0xff]  ;;  %v11178_v10 = vld [vmem:[#allocation2 + $0x182] sm:$0xff] }
 0x4af   : > { %9044 = vmatprep.subr.bf16.mxu1 %v9043_v51 }
 0x4b1   : > { %8273 = vmatmul.mubr.f32.gmra.mrb[6].mxu1 %v11592_v0  ;;  %v9067_v0 = vpack.c.bf16 %v5220_v15, %v5219_v26  ;;  %v5200_v26 = vld [vmem:[#allocation2 + $0xf1] sm:$0xff]  ;;  %v5201_v15 = vld [vmem:[#allocation2 + $0xf9] sm:$0xff] }
 0x4b2   : > { %8275 = vmatprep.mubr.f32.mxu1 %v11593_v48  ;;  %9046 = vmatpush3.bf16.msra.mxu1 %v9043_v51  ;;  %v11608_v51 = vld [vmem:[#allocation38_spill] sm:$0xff]  ;;  %v5221_v48 = vld [vmem:[#allocation8 + $0x3a0] sm:$0xff] }
 0x4b3   : > { %9048 = vmatprep.subr.bf16.mxu1 %v9047_v17 }
 0x4b5   : > { %8276 = vmatmul.mubr.f32.gmra.mrb[8].mxu1 %v10999_v11  ;;  %v9063_v11 = vpack.c.bf16 %v5218_v31, %v5217_v59  ;;  %v5232_v59 = vld [vmem:[#allocation8 + $0x3f8] sm:$0xff]  ;;  %v5524_v31 = vld [vmem:[#allocation8 + $0x408] sm:$0xff] }
 0x4b6   : > { %8278 = vmatprep.mubr.f32.mxu1 %v11002_v18  ;;  %9050 = vmatpush3.bf16.msra.mxu1 %v9047_v17  ;;  %v11597_v18 = vld [vmem:[#allocation27_spill] sm:$0xff]  ;;  %v11181_v17 = vld [vmem:[#allocation2 + $0x18a] sm:$0xff] }
 0x4b7   : > { %9052 = vmatprep.subr.bf16.mxu1 %v9051_v34 }
 0x4b9   : > { %8279 = vmatmul.mubr.f32.gmra.mrb[10].mxu1 %v11005_v39  ;;  %v11599_v39 = vld [vmem:[#allocation29_spill] sm:$0xff] }
 0x4ba   : > { %8281 = vmatprep.mubr.f32.mxu1 %v11594_v43  ;;  %9054 = vmatpush3.bf16.msra.mxu1 %v9051_v34  ;;  %v5222_v34 = vld [vmem:[#allocation8 + $0x3a8] sm:$0xff]  ;;  %v5228_v43 = vld [vmem:[#allocation8 + $0x3d8] sm:$0xff] }
 0x4bb   : > { %9056 = vmatprep.subr.bf16.mxu1 %v9055_v7  ;;  %v9071_v46 = vpack.c.bf16 %v5222_v34, %v5221_v48  ;;  %v5203_v48 = vld [vmem:[#allocation2 + $0x111] sm:$0xff]  ;;  %v5204_v34 = vld [vmem:[#allocation2 + $0x121] sm:$0xff] }
 0x4bd   : > { %8282 = vmatmul.mubr.f32.gmra.mrb[12].mxu1 %v11595_v29  ;;  %v11619_v29 = vld [vmem:[#allocation47_spill] sm:$0xff] }
 0x4be   : > { %8284 = vmatprep.mubr.f32.mxu1 %v11596_v30  ;;  %9058 = vmatpush3.bf16.msra.mxu1 %v9055_v7  ;;  %v5224_v7 = vld [vmem:[#allocation8 + $0x3b8] sm:$0xff] }
 0x4bf   : > { %9060 = vmatprep.subr.bf16.mxu1 %v9059_v23  ;;  %v9075_v35 = vpack.c.bf16 %v5224_v7, %v5223_v60  ;;  %v5206_v60 = vld [vmem:[#allocation2 + $0x139] sm:$0xff]  ;;  %v5207_v7 = vld [vmem:[#allocation2 + $0x141] sm:$0xff] }
 0x4c1   : > { %8285 = vmatmul.mubr.f32.gmra.mrb[14].mxu1 %v11597_v18  ;;  %v11620_v18 = vld [vmem:[#allocation48_spill] sm:$0xff] }
 0x4c2   : > { %8287 = vmatprep.mubr.f32.mxu1 %v11598_v44  ;;  %9062 = vmatpush3.bf16.msra.mxu1 %v9059_v23  ;;  %v5230_v23 = vld [vmem:[#allocation8 + $0x3e8] sm:$0xff] }
 0x4c3   : > { %9064 = vmatprep.subr.bf16.mxu1 %v9063_v11 }
 0x4c5   : > { %8288 = vmatmul.mubr.f32.gmra.mrb[16].mxu1 %v11599_v39  ;;  %v5533_v39 = vld [vmem:[#allocation8 + $0x450] sm:$0xff] }
 0x4c6   : > { %8290 = vmatprep.mubr.f32.mxu1 %v11600_v47  ;;  %v5534_v47 = vld [vmem:[#allocation8 + $0x458] sm:$0xff] }
 0x4c9   : > { %8291 = vmatmul.mubr.f32.gmra.mrb[18].mxu1 %v11601_v62  ;;  %v5192_v62 = vld [vmem:[#allocation2 + $0x91] sm:$0xff] }
 0x4ca   : > { %8293 = vmatprep.mubr.f32.mxu1 %v11602_v63  ;;  %v9115_v63 = vpack.c.bf16 %v5534_v47, %v5533_v39  ;;  %v11228_v39 = vld [vmem:[%s11384_s4] ss:$0 sm:$0xff] }
 0x4cd   : > { %8294 = vmatmul.mubr.f32.gmra.mrb[20].mxu1 %v11603_v22  ;;  %v5535_v22 = vld [vmem:[#allocation8 + $0x460] sm:$0xff] }
 0x4ce   : > { %8296 = vmatprep.mubr.f32.mxu1 %v11604_v21  ;;  %v5536_v21 = vld [vmem:[#allocation8 + $0x468] sm:$0xff] }
 0x4d1   : > { %8297 = vmatmul.mubr.f32.gmra.mrb[22].mxu1 %v11605_v40  ;;  %v5194_v40 = vld [vmem:[#allocation2 + $0xa9] sm:$0xff] }
 0x4d2   : > { %8299 = vmatprep.mubr.f32.mxu1 %v11606_v41  ;;  %v5195_v41 = vld [vmem:[#allocation2 + $0xb1] sm:$0xff] }
 0x4d5   : > { %8300 = vmatmul.mubr.f32.gmra.mrb[24].mxu1 %v11607_v50  ;;  %v5537_v50 = vld [vmem:[#allocation8 + $0x470] sm:$0xff] }
 0x4d6   : > { %8302 = vmatprep.mubr.f32.mxu1 %v11608_v51  ;;  %v5538_v51 = vld [vmem:[#allocation8 + $0x478] sm:$0xff] }
 0x4d9   : > { %8303 = vmatmul.mubr.f32.gmra.mrb[26].mxu1 %v11609_v2  ;;  %v5196_v2 = vld [vmem:[#allocation2 + $0xc1] sm:$0xff] }
 0x4da   : > { %8305 = vmatprep.mubr.f32.mxu1 %v11610_v4  ;;  %v5197_v4 = vld [vmem:[#allocation2 + $0xc9] sm:$0xff] }
 0x4dd   : > { %8306 = vmatmul.mubr.f32.gmra.mrb[28].mxu1 %v11611_v8  ;;  %v5198_v8 = vld [vmem:[#allocation2 + $0xd9] sm:$0xff] }
 0x4de   : > { %8308 = vmatprep.mubr.f32.mxu1 %v11178_v10 }
 0x4e1   : > { %8309 = vmatmul.mubr.f32.gmra.mrb[30].mxu1 %v11181_v17 }
 0x4e2   : > { %8343 = vmatprep.mubr.f32.mxu1 %v10888_v19  ;;  %v5225_v19 = vld [vmem:[#allocation8 + $0x3c0] sm:$0xff] }
 0x4e5   : > { %8344 = vmatmul.mubr.f32.vlgmr.msra.gmra.mrb[0].mxu1 %v10891_v24  ;;  %v9079_v24 = vpack.c.bf16 %v5226_v16, %v5225_v19  ;;  %v5209_v19 = vld [vmem:[#allocation2 + $0x159] sm:$0xff]  ;;  %v5210_v16 = vld [vmem:[#allocation2 + $0x169] sm:$0xff] }
 0x4e6   : > { %8346 = vmatprep.mubr.f32.mxu1 %v10894_v53  ;;  %9066 = vmatpush3.bf16.msra.mxu1 %v9063_v11  ;;  %v5227_v53 = vld [vmem:[#allocation8 + $0x3d0] sm:$0xff]  ;;  %v5532_v11 = vld [vmem:[#allocation8 + $0x448] sm:$0xff] }
 0x4e7   : > { %9068 = vmatprep.subr.bf16.mxu1 %v9067_v0 }
 0x4e9   : > { %8347 = vmatmul.mubr.f32.gmra.mrb[2].mxu1 %v10897_v38  ;;  %v9083_v38 = vpack.c.bf16 %v5228_v43, %v5227_v53  ;;  %v5212_v53 = vld [vmem:[#allocation2 + $0x181] sm:$0xff]  ;;  %v5214_v43 = vld [vmem:[#allocation2 + $0x199] sm:$0xff] }
 0x4ea   : > { %8349 = vmatprep.mubr.f32.mxu1 %v10900_v57  ;;  %9070 = vmatpush3.bf16.msra.mxu1 %v9067_v0  ;;  %v5229_v57 = vld [vmem:[#allocation8 + $0x3e0] sm:$0xff] }
 0x4eb   : > { %9072 = vmatprep.subr.bf16.mxu1 %v9071_v46  ;;  %v5202_v0 = vld [vmem:[#allocation2 + $0x109] sm:$0xff] }
 0x4ed   : > { %8350 = vmatmul.mubr.f32.gmra.mrb[4].mxu1 %v10903_v9  ;;  %v9087_v9 = vpack.c.bf16 %v5230_v23, %v5229_v57  ;;  %v5215_v57 = vld [vmem:[#allocation2 + $0x1a1] sm:$0xff]  ;;  %v5490_v23 = vld [vmem:[#allocation2 + $0x32] sm:$0xff] }
 0x4ee   : > { %8352 = vmatprep.mubr.f32.mxu1 %v10906_v13  ;;  %9074 = vmatpush3.bf16.msra.mxu1 %v9071_v46  ;;  %v5231_v13 = vld [vmem:[#allocation8 + $0x3f0] sm:$0xff]  ;;  %v5205_v46 = vld [vmem:[#allocation2 + $0x129] sm:$0xff] }
 0x4ef   : > { %9076 = vmatprep.subr.bf16.mxu1 %v9075_v35 }
 0x4f1   : > { %8353 = vmatmul.mubr.f32.gmra.mrb[6].mxu1 %v10909_v12  ;;  %v9091_v12 = vpack.c.bf16 %v5232_v59, %v5231_v13  ;;  %v5492_v13 = vld [vmem:[#allocation2 + $0x4a] sm:$0xff]  ;;  %v5493_v59 = vld [vmem:[#allocation2 + $0x52] sm:$0xff] }
 0x4f2   : > { %8355 = vmatprep.mubr.f32.mxu1 %v10912_v27  ;;  %9078 = vmatpush3.bf16.msra.mxu1 %v9075_v35  ;;  %v5523_v27 = vld [vmem:[#allocation8 + $0x400] sm:$0xff] }
 0x4f3   : > { %9080 = vmatprep.subr.bf16.mxu1 %v9079_v24  ;;  %v5208_v35 = vld [vmem:[#allocation2 + $0x151] sm:$0xff] }
 0x4f5   : > { %8356 = vmatmul.mubr.f32.gmra.mrb[8].mxu1 %v10915_v45  ;;  %v9095_v45 = vpack.c.bf16 %v5524_v31, %v5523_v27  ;;  %v5495_v27 = vld [vmem:[#allocation2 + $0x6a] sm:$0xff]  ;;  %v5496_v31 = vld [vmem:[#allocation2 + $0x7a] sm:$0xff] }
 0x4f6   : > { %8358 = vmatprep.mubr.f32.mxu1 %v10918_v55  ;;  %9082 = vmatpush3.bf16.msra.mxu1 %v9079_v24  ;;  %v11612_v55 = vld [vmem:[#allocation14_spill] sm:$0xff] }
 0x4f7   : > { %9084 = vmatprep.subr.bf16.mxu1 %v9083_v38  ;;  %v5211_v24 = vld [vmem:[#allocation2 + $0x171] sm:$0xff] }
 0x4f9   : > { %8359 = vmatmul.mubr.f32.gmra.mrb[10].mxu1 %v10921_v61  ;;  %v11613_v61 = vld [vmem:[#allocation15_spill] sm:$0xff] }
 0x4fa   : > { %8361 = vmatprep.mubr.f32.mxu1 %v10924_v1  ;;  %9086 = vmatpush3.bf16.msra.mxu1 %v9083_v38  ;;  %v11614_v1 = vld [vmem:[#allocation42_spill] sm:$0xff]  ;;  %v5213_v38 = vld [vmem:[#allocation2 + $0x189] sm:$0xff] }
 0x4fb   : > { %9088 = vmatprep.subr.bf16.mxu1 %v9087_v9 }
 0x4fd   : > { %8362 = vmatmul.mubr.f32.gmra.mrb[12].mxu1 %v10927_v5  ;;  %v11615_v5 = vld [vmem:[#allocation43_spill] sm:$0xff] }
 0x4fe   : > { %8364 = vmatprep.mubr.f32.mxu1 %v10930_v56  ;;  %9090 = vmatpush3.bf16.msra.mxu1 %v9087_v9  ;;  %v9714_v56 = vld [vmem:[#allocation2] sm:$0xff] }
 0x4ff   : > { %9092 = vmatprep.subr.bf16.mxu1 %v9091_v12  ;;  %v5491_v9 = vld [vmem:[#allocation2 + $0x3a] sm:$0xff] }
 0x501   : > { %8365 = vmatmul.mubr.f32.gmra.mrb[14].mxu1 %v10933_v20  ;;  %v5525_v20 = vld [vmem:[#allocation8 + $0x410] sm:$0xff] }
 0x502   : > { %8367 = vmatprep.mubr.f32.mxu1 %v10936_v28  ;;  %9094 = vmatpush3.bf16.msra.mxu1 %v9091_v12  ;;  %v5526_v28 = vld [vmem:[#allocation8 + $0x418] sm:$0xff] }
 0x503   : > { %9096 = vmatprep.subr.bf16.mxu1 %v9095_v45  ;;  %v5494_v12 = vld [vmem:[#allocation2 + $0x62] sm:$0xff] }
 0x505   : > { %8368 = vmatmul.mubr.f32.gmra.mrb[16].mxu1 %v10939_v14  ;;  %v9099_v14 = vpack.c.bf16 %v5526_v28, %v5525_v20  ;;  %v5503_v20 = vld [vmem:[#allocation2 + $0xca] sm:$0xff]  ;;  %v5504_v28 = vld [vmem:[#allocation2 + $0xda] sm:$0xff] }
 0x506   : > { %8370 = vmatprep.mubr.f32.mxu1 %v10942_v54  ;;  %v5527_v54 = vld [vmem:[#allocation8 + $0x420] sm:$0xff] }
 0x509   : > { %8371 = vmatmul.mubr.f32.gmra.mrb[18].mxu1 %v10945_v42  ;;  %v5528_v42 = vld [vmem:[#allocation8 + $0x428] sm:$0xff] }
 0x50a   : > { %8373 = vmatprep.mubr.f32.mxu1 %v10948_v52  ;;  %v11616_v52 = vld [vmem:[#allocation44_spill] sm:$0xff] }
 0x50d   : > { %8374 = vmatmul.mubr.f32.gmra.mrb[20].mxu1 %v10951_v58  ;;  %v11617_v58 = vld [vmem:[#allocation45_spill] sm:$0xff] }
 0x50e   : > { %8376 = vmatprep.mubr.f32.mxu1 %v10954_v3  ;;  %v9103_v3 = vpack.c.bf16 %v5528_v42, %v5527_v54  ;;  %v5506_v54 = vld [vmem:[#allocation2 + $0xf2] sm:$0xff]  ;;  %v5507_v42 = vld [vmem:[#allocation2 + $0xfa] sm:$0xff] }
 0x511   : > { %8377 = vmatmul.mubr.f32.gmra.mrb[22].mxu1 %v10957_v6  ;;  %v5529_v6 = vld [vmem:[#allocation8 + $0x430] sm:$0xff] }
 0x512   : > { %8379 = vmatprep.mubr.f32.mxu1 %v10960_v25  ;;  %v5530_v25 = vld [vmem:[#allocation8 + $0x438] sm:$0xff] }
 0x513   : > { %v9107_v30 = vpack.c.bf16 %v5530_v25, %v5529_v6  ;;  %v5511_v6 = vld [vmem:[#allocation2 + $0x12a] sm:$0xff]  ;;  %v5512_v25 = vld [vmem:[#allocation2 + $0x13a] sm:$0xff] }
 0x515   : > { %8380 = vmatmul.mubr.f32.gmra.mrb[24].mxu1 %v10963_v32  ;;  %v11618_v32 = vld [vmem:[#allocation46_spill] sm:$0xff] }
 0x516   : > { %8382 = vmatprep.mubr.f32.mxu1 %v11612_v55  ;;  %v5498_v55 = vld [vmem:[#allocation2 + $0x92] sm:$0xff] }
 0x519   : > { %8383 = vmatmul.mubr.f32.gmra.mrb[26].mxu1 %v11613_v61  ;;  %v5499_v61 = vld [vmem:[#allocation2 + $0x9a] sm:$0xff] }
 0x51a   : > { %8385 = vmatprep.mubr.f32.mxu1 %v11614_v1  ;;  %v5500_v1 = vld [vmem:[#allocation2 + $0xaa] sm:$0xff] }
 0x51d   : > { %8386 = vmatmul.mubr.f32.gmra.mrb[28].mxu1 %v11615_v5  ;;  %v5501_v5 = vld [vmem:[#allocation2 + $0xb2] sm:$0xff] }
 0x51e   : > { %8388 = vmatprep.mubr.f32.mxu1 %v9714_v56 }
 0x521   : > { %8389 = vmatmul.mubr.f32.gmra.mrb[30].mxu1 %v9714_v56  ;;  %v5502_v56 = vld [vmem:[#allocation2 + $0xc2] sm:$0xff] }
 0x522   : > { %8423 = vmatprep.mubr.f32.mxu1 %v11098_v49  ;;  %v5531_v49 = vld [vmem:[#allocation8 + $0x440] sm:$0xff] }
 0x523   : > { %v9111_v44 = vpack.c.bf16 %v5532_v11, %v5531_v49  ;;  %v5516_v49 = vld [vmem:[#allocation2 + $0x16a] sm:$0xff]  ;;  %v5517_v11 = vld [vmem:[#allocation2 + $0x172] sm:$0xff] }
 0x525   : > { %8424 = vmatmul.mubr.f32.vlgmr.msra.gmra.mrb[0].mxu1 %v11616_v52  ;;  %v5508_v52 = vld [vmem:[#allocation2 + $0x10a] sm:$0xff] }
 0x526   : > { %8426 = vmatprep.mubr.f32.mxu1 %v11617_v58  ;;  %9098 = vmatpush3.bf16.msra.mxu1 %v9095_v45  ;;  %v5497_v45 = vld [vmem:[#allocation2 + $0x82] sm:$0xff]  ;;  %v5509_v58 = vld [vmem:[#allocation2 + $0x112] sm:$0xff] }
 0x527   : > { %9100 = vmatprep.subr.bf16.mxu1 %v9099_v14 }
 0x529   : > { %8427 = vmatmul.mubr.f32.gmra.mrb[2].mxu1 %v11618_v32  ;;  %v5513_v32 = vld [vmem:[#allocation2 + $0x142] sm:$0xff] }
 0x52a   : > { %8429 = vmatprep.mubr.f32.mxu1 %v11619_v29  ;;  %9102 = vmatpush3.bf16.msra.mxu1 %v9099_v14  ;;  %v5505_v14 = vld [vmem:[#allocation2 + $0xe2] sm:$0xff]  ;;  %v5514_v29 = vld [vmem:[#allocation2 + $0x152] sm:$0xff] }
 0x52b   : > { %9104 = vmatprep.subr.bf16.mxu1 %v9103_v3 }
 0x52d   : > { %8430 = vmatmul.mubr.f32.gmra.mrb[4].mxu1 %v11620_v18  ;;  %v5520_v18 = vld [vmem:[#allocation2 + $0x19a] sm:$0xff] }
 0x52e   : > { %8432 = vmatprep.mubr.f32.mxu1 %v11116_v37  ;;  %9106 = vmatpush3.bf16.msra.mxu1 %v9103_v3  ;;  %v9119_v37 = vpack.c.bf16 %v5536_v21, %v5535_v22  ;;  %v5510_v3 = vld [vmem:[#allocation2 + $0x122] sm:$0xff] }
 0x52f   : > { %9108 = vmatprep.subr.bf16.mxu1 %v9107_v30 }
 0x531   : > { %8433 = vmatmul.mubr.f32.gmra.mrb[6].mxu1 %v11119_v36  ;;  %v9123_v36 = vpack.c.bf16 %v5538_v51, %v5537_v50 }
 0x532   : > { %8435 = vmatprep.mubr.f32.mxu1 %v5192_v62  ;;  %9110 = vmatpush3.bf16.msra.mxu1 %v9107_v30  ;;  %v5515_v30 = vld [vmem:[#allocation2 + $0x15a] sm:$0xff] }
 0x533   : > { %9112 = vmatprep.subr.bf16.mxu1 %v9111_v44 }
 0x535   : > { %8436 = vmatmul.mubr.f32.gmra.mrb[8].mxu1 %v11123_v33  ;;  %v5199_v33 = vld [vmem:[#allocation2 + $0xe1] sm:$0xff] }
 0x536   : > { %8438 = vmatprep.mubr.f32.mxu1 %v5194_v40  ;;  %9114 = vmatpush3.bf16.msra.mxu1 %v9111_v44  ;;  %v5521_v44 = vld [vmem:[#allocation2 + $0x1a2] sm:$0xff] }
 0x537   : > { %9116 = vmatprep.subr.bf16.mxu1 %v9115_v63 }
 0x539   : > { %8439 = vmatmul.mubr.f32.gmra.mrb[10].mxu1 %v5195_v41 }
 0x53a   : > { %8441 = vmatprep.mubr.f32.mxu1 %v5196_v2  ;;  %9118 = vmatpush3.bf16.msra.mxu1 %v9115_v63 }
 0x53b   : > { %9120 = vmatprep.subr.bf16.mxu1 %v9119_v37 }
 0x53d   : > { %8442 = vmatmul.mubr.f32.gmra.mrb[12].mxu1 %v5197_v4  ;;  %v9717_v4 = vld [vmem:[%s10129_s10 + $0x39] sm:$0xff] }
 0x53e   : > { %8444 = vmatprep.mubr.f32.mxu1 %v5198_v8  ;;  %9122 = vmatpush3.bf16.msra.mxu1 %v9119_v37 }
 0x53f   : > { %9124 = vmatprep.subr.bf16.mxu1 %v9123_v36 }
 0x541   : > { %8445 = vmatmul.mubr.f32.gmra.mrb[14].mxu1 %v5199_v33  ;;  %v9718_v33 = vld [vmem:[%s10129_s10 + $0x31] sm:$0xff] }
 0x542   : > { %8447 = vmatprep.mubr.f32.mxu1 %v5200_v26  ;;  %9126 = vmatpush3.bf16.msra.mxu1 %v9123_v36 }
 0x545   : > { %8448 = vmatmul.mubr.f32.gmra.mrb[16].mxu1 %v5201_v15 }
 0x546   : > { %8450 = vmatprep.mubr.f32.mxu1 %v5202_v0 }
 0x549   : > { %8451 = vmatmul.mubr.f32.gmra.mrb[18].mxu1 %v5203_v48 }
 0x54a   : > { %8453 = vmatprep.mubr.f32.mxu1 %v5204_v34 }
 0x54d   : > { %8454 = vmatmul.mubr.f32.gmra.mrb[20].mxu1 %v5205_v46 }
 0x54e   : > { %8456 = vmatprep.mubr.f32.mxu1 %v5206_v60 }
 0x551   : > { %8457 = vmatmul.mubr.f32.gmra.mrb[22].mxu1 %v5207_v7  ;;  %v9719_v7 = vld [vmem:[%s10129_s10 + $0x51] sm:$0xff] }
 0x552   : > { %8459 = vmatprep.mubr.f32.mxu1 %v5208_v35 }
 0x555   : > { %8460 = vmatmul.mubr.f32.gmra.mrb[24].mxu1 %v5209_v19  ;;  %v9720_v19 = vld [vmem:[%s10129_s10 + $0x49] sm:$0xff] }
 0x556   : > { %8462 = vmatprep.mubr.f32.mxu1 %v5210_v16 }
 0x559   : > { %8463 = vmatmul.mubr.f32.gmra.mrb[26].mxu1 %v5211_v24 }
 0x55a   : > { %8465 = vmatprep.mubr.f32.mxu1 %v5212_v53 }
 0x55d   : > { %8466 = vmatmul.mubr.f32.gmra.mrb[28].mxu1 %v5213_v38 }
 0x55e   : > { %8468 = vmatprep.mubr.f32.mxu1 %v5214_v43 }
 0x561   : > { %8469 = vmatmul.mubr.f32.gmra.mrb[30].mxu1 %v5215_v57 }
 0x562   : > { %8503 = vmatprep.mubr.f32.mxu1 %v5490_v23 }
 0x565   : > { %8504 = vmatmul.mubr.f32.vlgmr.msra.gmra.mrb[0].mxu1 %v5491_v9  ;;  %v9721_v9 = vld [vmem:[%s10129_s10 + $0x69] sm:$0xff] }
 0x566   : > { %8506 = vmatprep.mubr.f32.mxu1 %v5492_v13 }
 0x569   : > { %8507 = vmatmul.mubr.f32.gmra.mrb[2].mxu1 %v5493_v59  ;;  %v9722_v59 = vld [vmem:[%s10129_s10 + $0x61] sm:$0xff] }
 0x56a   : > { %8509 = vmatprep.mubr.f32.mxu1 %v5494_v12 }
 0x56d   : > { %8510 = vmatmul.mubr.f32.gmra.mrb[4].mxu1 %v5495_v27 }
 0x56e   : > { %8512 = vmatprep.mubr.f32.mxu1 %v5496_v31 }
 0x571   : > { %8513 = vmatmul.mubr.f32.gmra.mrb[6].mxu1 %v5497_v45 }
 0x572   : > { %8515 = vmatprep.mubr.f32.mxu1 %v5498_v55 }
 0x575   : > { %8516 = vmatmul.mubr.f32.gmra.mrb[8].mxu1 %v5499_v61 }
 0x576   : > { %8518 = vmatprep.mubr.f32.mxu1 %v5500_v1 }
 0x579   : > { %8519 = vmatmul.mubr.f32.gmra.mrb[10].mxu1 %v5501_v5  ;;  %v9723_v5 = vld [vmem:[%s10129_s10 + $0x81] sm:$0xff] }
 0x57a   : > { %8521 = vmatprep.mubr.f32.mxu1 %v5502_v56 }
 0x57d   : > { %8522 = vmatmul.mubr.f32.gmra.mrb[12].mxu1 %v5503_v20  ;;  %v9724_v20 = vld [vmem:[%s10129_s10 + $0x79] sm:$0xff] }
 0x57e   : > { %8524 = vmatprep.mubr.f32.mxu1 %v5504_v28 }
 0x581   : > { %8525 = vmatmul.mubr.f32.gmra.mrb[14].mxu1 %v5505_v14 }
 0x582   : > { %8527 = vmatprep.mubr.f32.mxu1 %v5506_v54 }
 0x585   : > { %8528 = vmatmul.mubr.f32.gmra.mrb[16].mxu1 %v5507_v42 }
 0x586   : > { %8530 = vmatprep.mubr.f32.mxu1 %v5508_v52 }
 0x589   : > { %8531 = vmatmul.mubr.f32.gmra.mrb[18].mxu1 %v5509_v58 }
 0x58a   : > { %8533 = vmatprep.mubr.f32.mxu1 %v5510_v3 }
 0x58d   : > { %8534 = vmatmul.mubr.f32.gmra.mrb[20].mxu1 %v5511_v6  ;;  %v9725_v6 = vld [vmem:[%s10129_s10 + $0x99] sm:$0xff] }
 0x58e   : > { %8536 = vmatprep.mubr.f32.mxu1 %v5512_v25 }
 0x591   : > { %8537 = vmatmul.mubr.f32.gmra.mrb[22].mxu1 %v5513_v32  ;;  %v9726_v32 = vld [vmem:[%s10129_s10 + $0x91] sm:$0xff] }
 0x592   : > { %8539 = vmatprep.mubr.f32.mxu1 %v5514_v29 }
 0x595   : > { %8540 = vmatmul.mubr.f32.gmra.mrb[24].mxu1 %v5515_v30 }
 0x596   : > { %8542 = vmatprep.mubr.f32.mxu1 %v5516_v49 }
 0x599   : > { %8543 = vmatmul.mubr.f32.gmra.mrb[26].mxu1 %v5517_v11 }
 0x59a   : > { %8545 = vmatprep.mubr.f32.mxu1 %v11178_v10  ;;  %v9715_v10 = vld [vmem:[%s10129_s10 + $0x21] sm:$0xff] }
 0x59d   : > { %8546 = vmatmul.mubr.f32.gmra.mrb[28].mxu1 %v11181_v17  ;;  %v9716_v17 = vld [vmem:[%s10129_s10 + $0x19] sm:$0xff] }
 0x59e   : > { %8548 = vmatprep.mubr.f32.mxu1 %v5520_v18 }
 0x5a1   : > { %8549 = vmatmul.mubr.f32.gmra.mrb[30].mxu1 %v5521_v44 }
 0x638   : > { %v8505_v47 = vpop.f32.mrb[0].mxu1 }
 0x639   : > { %v5804_v62 = vadd.f32 %v8505_v47, %v11228_v39  ;;  %v5605_v63 = vpop.f32.mrb[1].mxu1 }
 0x63a   : > { %v5803_v22 = vadd.f32 %v11228_v39, %v5605_v63 }
 0x63b   : > { %v5836_v21 = vadd.f32 %v9715_v10, %v5804_v62  ;;  %v9727_v62 = vld [vmem:[%s10129_s10 + $0xb1] sm:$0xff] }
 0x63c   : > { %v5835_v40 = vadd.f32 %v9716_v17, %v5803_v22  ;;  %v8508_v37 = vpop.f32.mrb[2].mxu1  ;;  %v9728_v22 = vld [vmem:[%s10129_s10 + $0xa9] sm:$0xff] }
 0x63d   : > { %v5868_v41 = vmax.f32 %v5836_v21, 0.0  ;;  %v5806_v50 = vadd.f32 %v8508_v37, %v11228_v39  ;;  %v5615_v51 = vpop.f32.mrb[3].mxu1 }
 0x63e   : > { %v5867_v2 = vmax.f32 %v5835_v40, 0.0  ;;  %v5805_v36 = vadd.f32 %v11228_v39, %v5615_v51  ;;  %v9729_v51 = vld [vmem:[%s10129_s10 + $0xc9] sm:$0xff] }
 0x63f   : > { %5900 = vst [vmem:[%s11237_s12 + $0x8] sm:$0xff] %v5868_v41  ;;  %v5838_v8 = vadd.f32 %v9717_v4, %v5806_v50 }
 0x640   : > { %5899 = vst [vmem:[%s11237_s12] sm:$0xff] %v5867_v2  ;;  %v5837_v26 = vadd.f32 %v9718_v33, %v5805_v36  ;;  %v8511_v15 = vpop.f32.mrb[4].mxu1  ;;  %v9730_v36 = vld [vmem:[%s10129_s10 + $0xc1] sm:$0xff] }
 0x641   : > { %v5870_v0 = vmax.f32 %v5838_v8, 0.0  ;;  %v5808_v48 = vadd.f32 %v8511_v15, %v11228_v39  ;;  %v5625_v34 = vpop.f32.mrb[5].mxu1 }
 0x642   : > { %v5869_v46 = vmax.f32 %v5837_v26, 0.0  ;;  %v5807_v60 = vadd.f32 %v11228_v39, %v5625_v34  ;;  %v9731_v34 = vld [vmem:[%s10129_s10 + $0xe1] sm:$0xff] }
 0x643   : > { %5902 = vst [vmem:[%s11237_s12 + $0x18] sm:$0xff] %v5870_v0  ;;  %v5840_v35 = vadd.f32 %v9719_v7, %v5808_v48 }
 0x644   : > { %5901 = vst [vmem:[%s11237_s12 + $0x10] sm:$0xff] %v5869_v46  ;;  %v5839_v16 = vadd.f32 %v9720_v19, %v5807_v60  ;;  %v8514_v24 = vpop.f32.mrb[6].mxu1  ;;  %v9732_v60 = vld [vmem:[%s10129_s10 + $0xd9] sm:$0xff] }
 0x645   : > { %v5872_v53 = vmax.f32 %v5840_v35, 0.0  ;;  %v5810_v43 = vadd.f32 %v8514_v24, %v11228_v39  ;;  %v5635_v38 = vpop.f32.mrb[7].mxu1 }
 0x646   : > { %v5871_v57 = vmax.f32 %v5839_v16, 0.0  ;;  %v5809_v23 = vadd.f32 %v11228_v39, %v5635_v38  ;;  %v9733_v38 = vld [vmem:[%s10129_s10 + $0xf9] sm:$0xff] }
 0x647   : > { %5904 = vst [vmem:[%s11237_s12 + $0x28] sm:$0xff] %v5872_v53  ;;  %v5842_v13 = vadd.f32 %v9721_v9, %v5810_v43 }
 0x648   : > { %5903 = vst [vmem:[%s11237_s12 + $0x20] sm:$0xff] %v5871_v57  ;;  %v5841_v12 = vadd.f32 %v9722_v59, %v5809_v23  ;;  %v8517_v27 = vpop.f32.mrb[8].mxu1  ;;  %v9734_v23 = vld [vmem:[%s10129_s10 + $0xf1] sm:$0xff] }
 0x649   : > { %v5874_v31 = vmax.f32 %v5842_v13, 0.0  ;;  %v5812_v45 = vadd.f32 %v8517_v27, %v11228_v39  ;;  %v5645_v55 = vpop.f32.mrb[9].mxu1 }
 0x64a   : > { %v5873_v61 = vmax.f32 %v5841_v12, 0.0  ;;  %v5811_v1 = vadd.f32 %v11228_v39, %v5645_v55  ;;  %v9735_v55 = vld [vmem:[%s10129_s10 + $0x111] sm:$0xff] }
 0x64b   : > { %5906 = vst [vmem:[%s11237_s12 + $0x38] sm:$0xff] %v5874_v31  ;;  %v5844_v56 = vadd.f32 %v9723_v5, %v5812_v45 }
 0x64c   : > { %5905 = vst [vmem:[%s11237_s12 + $0x30] sm:$0xff] %v5873_v61  ;;  %v5843_v28 = vadd.f32 %v9724_v20, %v5811_v1  ;;  %v8520_v14 = vpop.f32.mrb[10].mxu1  ;;  %v9736_v1 = vld [vmem:[%s10129_s10 + $0x109] sm:$0xff] }
 0x64d   : > { %v5876_v54 = vmax.f32 %v5844_v56, 0.0  ;;  %v5814_v42 = vadd.f32 %v8520_v14, %v11228_v39  ;;  %v5655_v52 = vpop.f32.mrb[11].mxu1 }
 0x64e   : > { %v5875_v58 = vmax.f32 %v5843_v28, 0.0  ;;  %v5813_v3 = vadd.f32 %v11228_v39, %v5655_v52  ;;  %v9737_v52 = vld [vmem:[%s10129_s10 + $0x129] sm:$0xff] }
 0x64f   : > { %5908 = vst [vmem:[%s11237_s12 + $0x48] sm:$0xff] %v5876_v54  ;;  %v5846_v25 = vadd.f32 %v9725_v6, %v5814_v42 }
 0x650   : > { %5907 = vst [vmem:[%s11237_s12 + $0x40] sm:$0xff] %v5875_v58  ;;  %v5845_v29 = vadd.f32 %v9726_v32, %v5813_v3  ;;  %v8523_v30 = vpop.f32.mrb[12].mxu1  ;;  %v9738_v3 = vld [vmem:[%s10129_s10 + $0x121] sm:$0xff] }
 0x651   : > { %v5878_v49 = vmax.f32 %v5846_v25, 0.0  ;;  %v5816_v11 = vadd.f32 %v8523_v30, %v11228_v39  ;;  %v5665_v18 = vpop.f32.mrb[13].mxu1 }
 0x652   : > { %v5877_v44 = vmax.f32 %v5845_v29, 0.0  ;;  %v5815_v47 = vadd.f32 %v11228_v39, %v5665_v18  ;;  %v9739_v18 = vld [vmem:[%s10129_s10 + $0x141] sm:$0xff] }
 0x653   : > { %5910 = vst [vmem:[%s11237_s12 + $0x58] sm:$0xff] %v5878_v49  ;;  %v5848_v63 = vadd.f32 %v9727_v62, %v5816_v11 }
 0x654   : > { %5909 = vst [vmem:[%s11237_s12 + $0x50] sm:$0xff] %v5877_v44  ;;  %v5847_v10 = vadd.f32 %v9728_v22, %v5815_v47  ;;  %v8526_v21 = vpop.f32.mrb[14].mxu1  ;;  %v9740_v47 = vld [vmem:[%s10129_s10 + $0x139] sm:$0xff] }
 0x655   : > { %v5880_v17 = vmax.f32 %v5848_v63, 0.0  ;;  %v5818_v40 = vadd.f32 %v8526_v21, %v11228_v39  ;;  %v5675_v37 = vpop.f32.mrb[15].mxu1 }
 0x656   : > { %v5879_v41 = vmax.f32 %v5847_v10, 0.0  ;;  %v5817_v50 = vadd.f32 %v11228_v39, %v5675_v37  ;;  %v9741_v37 = vld [vmem:[%s10129_s10 + $0x159] sm:$0xff] }
 0x657   : > { %5912 = vst [vmem:[%s11237_s12 + $0x68] sm:$0xff] %v5880_v17  ;;  %v5850_v2 = vadd.f32 %v9729_v51, %v5818_v40 }
 0x658   : > { %5911 = vst [vmem:[%s11237_s12 + $0x60] sm:$0xff] %v5879_v41  ;;  %v5849_v4 = vadd.f32 %v9730_v36, %v5817_v50  ;;  %v8529_v8 = vpop.f32.mrb[16].mxu1  ;;  %v9742_v50 = vld [vmem:[%s10129_s10 + $0x151] sm:$0xff] }
 0x659   : > { %v5882_v33 = vmax.f32 %v5850_v2, 0.0  ;;  %v5820_v26 = vadd.f32 %v8529_v8, %v11228_v39  ;;  %v5685_v15 = vpop.f32.mrb[17].mxu1 }
 0x65a   : > { %v5881_v0 = vmax.f32 %v5849_v4, 0.0  ;;  %v5819_v48 = vadd.f32 %v11228_v39, %v5685_v15  ;;  %v9743_v15 = vld [vmem:[%s10129_s10 + $0x171] sm:$0xff] }
 0x65b   : > { %5914 = vst [vmem:[%s11237_s12 + $0x78] sm:$0xff] %v5882_v33  ;;  %v5852_v46 = vadd.f32 %v9731_v34, %v5820_v26 }
 0x65c   : > { %5913 = vst [vmem:[%s11237_s12 + $0x70] sm:$0xff] %v5881_v0  ;;  %v5851_v7 = vadd.f32 %v9732_v60, %v5819_v48  ;;  %v8532_v35 = vpop.f32.mrb[18].mxu1  ;;  %v9744_v48 = vld [vmem:[%s10129_s10 + $0x169] sm:$0xff] }
 0x65d   : > { %v5884_v19 = vmax.f32 %v5852_v46, 0.0  ;;  %v5822_v16 = vadd.f32 %v8532_v35, %v11228_v39  ;;  %v5695_v24 = vpop.f32.mrb[19].mxu1 }
 0x65e   : > { %v5883_v53 = vmax.f32 %v5851_v7, 0.0  ;;  %v5821_v43 = vadd.f32 %v11228_v39, %v5695_v24  ;;  %v9745_v24 = vld [vmem:[%s10129_s10 + $0x189] sm:$0xff] }
 0x65f   : > { %5916 = vst [vmem:[%s11237_s12 + $0x88] sm:$0xff] %v5884_v19  ;;  %v5854_v57 = vadd.f32 %v9733_v38, %v5822_v16 }
 0x660   : > { %5915 = vst [vmem:[%s11237_s12 + $0x80] sm:$0xff] %v5883_v53  ;;  %v5853_v9 = vadd.f32 %v9734_v23, %v5821_v43  ;;  %v8535_v13 = vpop.f32.mrb[20].mxu1  ;;  %v9746_v43 = vld [vmem:[%s10129_s10 + $0x181] sm:$0xff]  ;;  %s9839_s10 = scalar_lea.vmem %s9838_s9, 8192 }
 0x661   : > { %v5886_v59 = vmax.f32 %v5854_v57, 0.0  ;;  %v5824_v12 = vadd.f32 %v8535_v13, %v11228_v39  ;;  %v5705_v27 = vpop.f32.mrb[21].mxu1  ;;  %p9841_p9 = scmp.lt.s32.totalorder %s9839_s10, %s9833_s14 }
 0x662   : > { %v5885_v31 = vmax.f32 %v5853_v9, 0.0  ;;  %v5823_v45 = vadd.f32 %v11228_v39, %v5705_v27 }
 0x663   : > { %5918 = vst [vmem:[%s11237_s12 + $0x98] sm:$0xff] %v5886_v59  ;;  %v5856_v61 = vadd.f32 %v9735_v55, %v5824_v12  ;;  %p9842_p12 = por %p9841_p9, %p9840_p7 }
 0x664   : > { %5917 = vst [vmem:[%s11237_s12 + $0x90] sm:$0xff] %v5885_v31  ;;  %v5855_v5 = vadd.f32 %v9736_v1, %v5823_v45  ;;  %v8538_v56 = vpop.f32.mrb[22].mxu1 }
 0x665   : > { %v5888_v20 = vmax.f32 %v5856_v61, 0.0  ;;  %v5826_v28 = vadd.f32 %v8538_v56, %v11228_v39  ;;  %v5715_v14 = vpop.f32.mrb[23].mxu1  ;;  %p9843_p1 = pnand %p9842_p12, %p9836_p3 }
 0x666   : > { %v5887_v54 = vmax.f32 %v5855_v5, 0.0  ;;  %v5825_v42 = vadd.f32 %v11228_v39, %v5715_v14 }
 0x667   : > { %5920 = vst [vmem:[%s11237_s12 + $0xa8] sm:$0xff] %v5888_v20  ;;  %v5858_v58 = vadd.f32 %v9737_v52, %v5826_v28 }
 0x668   : > { %5919 = vst [vmem:[%s11237_s12 + $0xa0] sm:$0xff] %v5887_v54  ;;  %v5857_v6 = vadd.f32 %v9738_v3, %v5825_v42  ;;  %v8541_v25 = vpop.f32.mrb[24].mxu1 }
 0x669   : > { %v5890_v32 = vmax.f32 %v5858_v58, 0.0  ;;  %v5828_v29 = vadd.f32 %v8541_v25, %v11228_v39  ;;  %v5725_v30 = vpop.f32.mrb[25].mxu1 }
 0x66a   : > { %v5889_v49 = vmax.f32 %v5857_v6, 0.0  ;;  %v5827_v11 = vadd.f32 %v11228_v39, %v5725_v30 }
 0x66b   : > { %5922 = vst [vmem:[%s11237_s12 + $0xb8] sm:$0xff] %v5890_v32  ;;  %v5860_v44 = vadd.f32 %v9739_v18, %v5828_v29 }
 0x66c   : > { %5921 = vst [vmem:[%s11237_s12 + $0xb0] sm:$0xff] %v5889_v49  ;;  %v5859_v62 = vadd.f32 %v9740_v47, %v5827_v11  ;;  %v8544_v63 = vpop.f32.mrb[26].mxu1 }
 0x66d   : > { %v5892_v22 = vmax.f32 %v5860_v44, 0.0  ;;  %v5830_v10 = vadd.f32 %v8544_v63, %v11228_v39  ;;  %v5735_v21 = vpop.f32.mrb[27].mxu1 }
 0x66e   : > { %v5891_v17 = vmax.f32 %v5859_v62, 0.0  ;;  %v5829_v40 = vadd.f32 %v11228_v39, %v5735_v21 }
 0x66f   : > { %5924 = vst [vmem:[%s11237_s12 + $0xc8] sm:$0xff] %v5892_v22  ;;  %v5862_v41 = vadd.f32 %v9741_v37, %v5830_v10 }
 0x670   : > { %5923 = vst [vmem:[%s11237_s12 + $0xc0] sm:$0xff] %v5891_v17  ;;  %v5861_v51 = vadd.f32 %v9742_v50, %v5829_v40  ;;  %v8547_v2 = vpop.f32.mrb[28].mxu1 }
 0x671   : > { %v5894_v36 = vmax.f32 %v5862_v41, 0.0  ;;  %v5832_v4 = vadd.f32 %v8547_v2, %v11228_v39  ;;  %v5745_v8 = vpop.f32.mrb[29].mxu1 }
 0x672   : > { %v5893_v33 = vmax.f32 %v5861_v51, 0.0  ;;  %v5831_v26 = vadd.f32 %v11228_v39, %v5745_v8 }
 0x673   : > { %5926 = vst [vmem:[%s11237_s12 + $0xd8] sm:$0xff] %v5894_v36  ;;  %v5864_v0 = vadd.f32 %v9743_v15, %v5832_v4 }
 0x674   : > { %5925 = vst [vmem:[%s11237_s12 + $0xd0] sm:$0xff] %v5893_v33  ;;  %v5863_v34 = vadd.f32 %v9744_v48, %v5831_v26  ;;  %v8550_v46 = vpop.f32.mrb[30].mxu1 }
 0x675   : > { %v5896_v60 = vmax.f32 %v5864_v0, 0.0  ;;  %v5834_v7 = vadd.f32 %v8550_v46, %v11228_v39  ;;  %v5755_v35 = vpop.f32.mrb[31].mxu1 }
 0x676   : > { %v5895_v19 = vmax.f32 %v5863_v34, 0.0  ;;  %v5833_v16 = vadd.f32 %v11228_v39, %v5755_v35 }
 0x677   : > { %5928 = vst [vmem:[%s11237_s12 + $0xe8] sm:$0xff] %v5896_v60  ;;  %v5866_v53 = vadd.f32 %v9745_v24, %v5834_v7 }
 0x678   : > { %5927 = vst [vmem:[%s11237_s12 + $0xe0] sm:$0xff] %v5895_v19  ;;  %v5865_v38 = vadd.f32 %v9746_v43, %v5833_v16 }
 0x679   : > { %v5898_v57 = vmax.f32 %v5866_v53, 0.0 }
 0x67a   : > { %v5897_v39 = vmax.f32 %v5865_v38, 0.0 }
 0x67b   : > { %5930 = vst [vmem:[%s11237_s12 + $0xf8] sm:$0xff] %v5898_v57 }
 0x67c   : > { %5929 = vst [vmem:[%s11237_s12 + $0xf0] sm:$0xff] %v5897_v39 }
 0x67d   : > { %9846 = shalt.err (!%p9843_p1)
}
 0x67e   : > { %s9847_s24 = scalar_lea.hbm %s11332_s15, 4096  ;;  %s9851_s8 = scalar_lea.hbm %s11385_s5, 8192 }
 0x67f   : > { %p9848_p13 = scmp.ne.s32.totalorder %s11332_s15, %s9847_s24  ;;  %p9852_p4 = scmp.lt.u32.totalorder %s11332_s15, %s11385_s5 }
 0x680   : > { %p9853_p5 = scmp.lt.u32.totalorder %s9851_s8, %s9847_s24  ;;  %p9855_p11 = scmp.lt.u32.totalorder %s9847_s24, %s11332_s15 }
 0x681   : > { %p9849_p6 = pnand %p9848_p13, %p11621_p0 }
 0x682   : > { %p9854_p8 = por %p9853_p5, %p9852_p4 }
 0x683   : > { %p9850_p10 = pneg %p9849_p6 }
 0x684   : > { %p9856_p2 = por %p9855_p11, %p9854_p8 }
 0x686   : > { %p9857_p3 = pnand %p9856_p2, %p9850_p10 }
 0x688   : > { %9860 = shalt.err (!%p9857_p3)
}
 0x689   : > { %s9912_s13 = smov 128   ;;  %s9913_s7 = smov 8  }
 0x68a   : > { %9652 = dma.vmem_to_hbm [thread:$0]  (%p11621_p0), %s11334_s30, 4096, %s11332_s15, %s5932_s22, %s9912_s13, %s9912_s13, %s9913_s7  }
 0x68b PF: > { %s5960_s28 = sand.u32 1, %s9891_s18   ;;  %p11622_p7 = scmp.ne.s32.totalorder %s11465_s25, 0 }
 0x68c   : > { %p11623_p9 = scmp.ge.s32.totalorder %s9903_s21, 2  ;;  %s5961_s14 = scalar_lea.sflag [#allocation5], %s5960_s28 }
 0x68e   : > { %p9666_p12 = pnand %p11623_p9, %p11622_p7 }
 0x690   : > { %9886 = dma.done.wait (!%p9666_p12), %s5961_s14, 4096  }
 0x691   : > { %9888 = vsyncadd (!%p9666_p12), %s5961_s14, 4294963200  ;;  %p19_p1 = scmp.ge.s32.totalorder %s10060_s29, 4   ;;  %s11624_s18 = smov %s9895_s19 }
 0x692   : > { %s11625_s19 = smov %s9899_s20  ;;  %s11626_s20 = smov %s10076_s27 }
 0x693   : > { %s11627_s21 = smov %s10060_s29  ;;  %21 = sbr.rel (!%p19_p1) target bundleno = 6 (0x6), region = 114 }
 0x69a   :  { %5966 = vsyncpa [#allocation4], 1 }
 0x69b   :  { %5968 = vsyncpa [#allocation4 + $0x1], 1 }
 0x69c   :  { %5969 = vsyncpa [#allocation7], 1 }
 0x69d   :  { %5970 = vsyncpa [#allocation5], 1 }
 0x69e   :  { %5972 = vsyncpa [#allocation5 + $0x1], 1 }

</bundles_post_ra>
